<compile_context>
chip_gen: v7x
topology: tpu7x:2x2x1
jax: 0.10.0
libtpu: 0.0.40
codegen_flags: <defaults>
</compile_context>

<pallas_src>
import functools

import numpy as np
import jax
import jax.numpy as jnp
from jax import lax
from jax.experimental import pallas as pl
from jax.experimental.pallas import tpu as pltpu

NEG_SLOPE = 0.1
KSIZE = 7
PAD = 3


def _leaky(x):
    return jnp.where(x > 0, x, NEG_SLOPE * x)


def cbam_kernel(x_ref, fcwt_ref, fcb_ref, masks_ref, convw_ref, o_ref, *, width):
    # x_ref    : (bt, C, HW) VMEM  — bt batch elements, lane-dense spatial dim
    # fcwt_ref : (C, C)      VMEM  — transposed 1x1-conv weight (C_in, C_out)
    # fcb_ref  : (1, C)      VMEM
    # masks_ref: (49, HW)    VMEM  — precomputed 0/1 zero-padding masks per tap
    # convw_ref: (2*49,)     SMEM  — 7x7 conv weights, [mean-channel | max-channel]
    bt, C, HW = x_ref.shape
    x = x_ref[...].astype(jnp.float32)

    # ---- Channel attention ----
    pooled = jnp.mean(x, axis=-1)                        # (bt, C) single lane reduce
    if C >= 128:
        # MXU path for realistic channel counts.
        fc = jnp.dot(pooled, fcwt_ref[...],
                     preferred_element_type=jnp.float32) + fcb_ref[...]
    else:
        # Tiny C: exact f32 elementwise sum (MXU would be pure padding here).
        fc = jnp.sum(pooled[:, :, None] * fcwt_ref[...][None, :, :],
                     axis=1) + fcb_ref[...]
    ca = x * _leaky(fc)[:, :, None]                      # (bt, C, HW)

    # ---- Spatial attention ----
    mean_c = jnp.mean(ca, axis=1)                        # (bt, HW)
    max_c = jnp.max(ca, axis=1)                          # (bt, HW)

    acc = jnp.zeros((bt, HW), jnp.float32)
    for ky in range(KSIZE):
        dy = ky - PAD
        for kx in range(KSIZE):
            dx = kx - PAD
            k = ky * KSIZE + kx
            s = dy * width + dx                          # flat-index shift of this tap
            w_mean = convw_ref[k]                        # scalar from SMEM
            w_max = convw_ref[KSIZE * KSIZE + k]         # scalar from SMEM
            if s == 0:
                sm, sx = mean_c, max_c
            else:
                shift = (-s) % HW                        # out[p] = in[p + s]
                sm = pltpu.roll(mean_c, shift, 1)        # XLU lane rotate
                sx = pltpu.roll(max_c, shift, 1)
            m = masks_ref[k:k + 1, :]                    # (1, HW) 0/1 border mask
            acc = acc + m * (w_mean * sm + w_max * sx)

    sa = _leaky(acc)                                     # (bt, HW)
    o_ref[...] = (ca * sa[:, None, :]).astype(o_ref.dtype)


def _border_masks(H, W):
    """0/1 masks selecting in-bounds source pixels for each of the 49 taps."""
    ys, xs = np.meshgrid(np.arange(H), np.arange(W), indexing="ij")
    masks = np.zeros((KSIZE * KSIZE, H * W), np.float32)
    for ky in range(KSIZE):
        for kx in range(KSIZE):
            dy, dx = ky - PAD, kx - PAD
            valid = ((ys + dy >= 0) & (ys + dy < H)
                     & (xs + dx >= 0) & (xs + dx < W))
            masks[ky * KSIZE + kx] = valid.reshape(-1).astype(np.float32)
    return jnp.asarray(masks)


def cbam_pallas(x, fc_w, fc_b, conv_w, *, batch_block=8):
    # TODO(synk): for very large C*H*W (e.g. C=512 at 64x64 on v7x's 64 MiB VMEM),
    # split into a pooling pass + a scale/conv pass tiled over C and set
    # vmem_limit_bytes; at the demo shapes a whole-image block easily fits.
    B, C, H, W = x.shape
    HW = H * W
    bt = min(batch_block, B)
    while B % bt:
        bt -= 1

    x2 = x.reshape(B, C, HW)                              # lane-dense spatial dim
    fcw_t = jnp.asarray(fc_w, jnp.float32).T              # (C_in, C_out)
    fcb2 = jnp.asarray(fc_b, jnp.float32).reshape(1, C)
    conv_flat = jnp.asarray(conv_w, jnp.float32).reshape(-1)   # (2*7*7,)
    masks = _border_masks(H, W)                           # (49, HW)

    kernel = functools.partial(cbam_kernel, width=W)

    out2 = pl.pallas_call(
        kernel,
        out_shape=jax.ShapeDtypeStruct((B, C, HW), x.dtype),
        grid_spec=pltpu.PrefetchScalarGridSpec(
            num_scalar_prefetch=0,
            grid=(B // bt,),
            in_specs=[
                pl.BlockSpec((bt, C, HW), lambda b: (b, 0, 0)),
                pl.BlockSpec((C, C), lambda b: (0, 0)),
                pl.BlockSpec((1, C), lambda b: (0, 0)),
                pl.BlockSpec((KSIZE * KSIZE, HW), lambda b: (0, 0)),
                pl.BlockSpec(memory_space=pltpu.MemorySpace.SMEM),
            ],
            out_specs=pl.BlockSpec((bt, C, HW), lambda b: (b, 0, 0)),
        ),
        compiler_params=pltpu.CompilerParams(
            dimension_semantics=("parallel",)),
    )(x2, fcw_t, fcb2, masks, conv_flat)
    return out2.reshape(B, C, H, W)


def cbam_ref(x, fc_w, fc_b, conv_w):
    """Pure-JAX reference matching the PyTorch module semantics."""
    pooled = jnp.mean(x, axis=(2, 3))                                   # (B, C)
    fc = jnp.sum(fc_w[None, :, :] * pooled[:, None, :], axis=-1) + fc_b[None, :]
    ca = x * _leaky(fc)[:, :, None, None]
    mean_c = jnp.mean(ca, axis=1, keepdims=True)
    max_c = jnp.max(ca, axis=1, keepdims=True)
    cat = jnp.concatenate([mean_c, max_c], axis=1)                      # (B,2,H,W)
    conv = lax.conv_general_dilated(
        cat, conv_w[None], window_strides=(1, 1),
        padding=[(PAD, PAD), (PAD, PAD)],
        dimension_numbers=('NCHW', 'OIHW', 'NCHW'))                     # (B,1,H,W)
    return ca * _leaky(conv)


if __name__ == "__main__":
    key = jax.random.PRNGKey(0)
    k_x, k_w, k_b, k_c = jax.random.split(key, 4)

    B, C, H, W = 2, 4, 16, 16
    x = jax.random.normal(k_x, (B, C, H, W), dtype=jnp.float32)

    # ChannelAttention.fc = Conv2d(C, C, 1, bias=True)  -> weight (C, C), bias (C,)
    # SpatialAttention.cv1 = Conv2d(2, 1, 7, pad=3, bias=False) -> weight (2, 7, 7)
    fc_w = jax.random.normal(k_w, (C, C), dtype=jnp.float32) * 0.3
    fc_b = jax.random.normal(k_b, (C,), dtype=jnp.float32) * 0.1
    conv_w = jax.random.normal(k_c, (2, KSIZE, KSIZE), dtype=jnp.float32) * 0.1

    out = jax.block_until_ready(cbam_pallas(x, fc_w, fc_b, conv_w))
    ref = jax.block_until_ready(cbam_ref(x, fc_w, fc_b, conv_w))

    assert out.shape == (B, C, H, W)
    assert jnp.allclose(out, ref, atol=1e-5, rtol=1e-5), "mismatch vs reference"
    print("KERNEL_OK")
</pallas_src>

<mosaic_0001>
module attributes {stable_mosaic.version = 11 : i64} {
  func.func @cbam_kernel(%arg0: i32, %arg1: memref<2x4x256xf32, #tpu.memory_space<vmem>>, %arg2: memref<4x4xf32, #tpu.memory_space<vmem>>, %arg3: memref<1x4xf32, #tpu.memory_space<vmem>>, %arg4: memref<49x256xf32, #tpu.memory_space<vmem>>, %arg5: memref<98xf32, #tpu.memory_space<smem>>, %arg6: memref<2x4x256xf32, #tpu.memory_space<vmem>>) attributes {dimension_semantics = [#tpu.dimension_semantics<parallel>], iteration_bounds = array<i64: 1>, scalar_prefetch = 0 : i64, scratch_operands = 0 : i64, tpu.core_type = #tpu.core_type<tc>, window_params = [{transform_indices = @transform_0, window_bounds = array<i64: 2, 4, 256>}, {pipeline_mode = #tpu.pipeline_mode<synchronous>, transform_indices = @transform_1, window_bounds = array<i64: 4, 4>}, {pipeline_mode = #tpu.pipeline_mode<synchronous>, transform_indices = @transform_2, window_bounds = array<i64: 1, 4>}, {pipeline_mode = #tpu.pipeline_mode<synchronous>, transform_indices = @transform_3, window_bounds = array<i64: 49, 256>}, {transform_indices = @transform_4, window_bounds = array<i64: 98>}, {transform_indices = @transform_5, window_bounds = array<i64: 2, 4, 256>}]} {
    %c0 = arith.constant 0 : index
    %c0_0 = arith.constant 0 : index
    %c0_1 = arith.constant 0 : index
    %0 = vector.load %arg1[%c0, %c0_0, %c0_1] : memref<2x4x256xf32, #tpu.memory_space<vmem>>, vector<2x4x256xf32>
    %cst = arith.constant dense<0.000000e+00> : vector<2x4xf32>
    %1 = vector.multi_reduction <add>, %0, %cst [2] : vector<2x4x256xf32> to vector<2x4xf32>
    %cst_2 = arith.constant 2.560000e+02 : f32
    %2 = vector.broadcast %cst_2 : f32 to vector<2x4xf32>
    %3 = arith.divf %1, %2 : vector<2x4xf32>
    %4 = vector.shape_cast %3 : vector<2x4xf32> to vector<2x4x1xf32>
    %c0_3 = arith.constant 0 : index
    %c0_4 = arith.constant 0 : index
    %5 = vector.load %arg2[%c0_3, %c0_4] : memref<4x4xf32, #tpu.memory_space<vmem>>, vector<4x4xf32>
    %6 = vector.shape_cast %5 : vector<4x4xf32> to vector<1x4x4xf32>
    %7 = vector.broadcast %4 : vector<2x4x1xf32> to vector<2x4x4xf32>
    %8 = vector.broadcast %6 : vector<1x4x4xf32> to vector<2x4x4xf32>
    %9 = arith.mulf %7, %8 : vector<2x4x4xf32>
    %cst_5 = arith.constant dense<0.000000e+00> : vector<2x4xf32>
    %10 = vector.multi_reduction <add>, %9, %cst_5 [1] : vector<2x4x4xf32> to vector<2x4xf32>
    %c0_6 = arith.constant 0 : index
    %c0_7 = arith.constant 0 : index
    %11 = vector.load %arg3[%c0_6, %c0_7] : memref<1x4xf32, #tpu.memory_space<vmem>>, vector<1x4xf32>
    %12 = vector.broadcast %11 : vector<1x4xf32> to vector<2x4xf32>
    %13 = arith.addf %10, %12 : vector<2x4xf32>
    %cst_8 = arith.constant 0.000000e+00 : f32
    %14 = vector.broadcast %cst_8 : f32 to vector<2x4xf32>
    %15 = arith.cmpf ogt, %13, %14 : vector<2x4xf32>
    %cst_9 = arith.constant 1.000000e-01 : f32
    %16 = vector.broadcast %cst_9 : f32 to vector<2x4xf32>
    %17 = arith.mulf %16, %13 : vector<2x4xf32>
    %18 = arith.select %15, %13, %17 : vector<2x4xi1>, vector<2x4xf32>
    %19 = vector.shape_cast %18 : vector<2x4xf32> to vector<2x4x1xf32>
    %20 = vector.broadcast %19 : vector<2x4x1xf32> to vector<2x4x256xf32>
    %21 = arith.mulf %0, %20 : vector<2x4x256xf32>
    %cst_10 = arith.constant dense<0.000000e+00> : vector<2x256xf32>
    %22 = vector.multi_reduction <add>, %21, %cst_10 [1] : vector<2x4x256xf32> to vector<2x256xf32>
    %cst_11 = arith.constant 4.000000e+00 : f32
    %23 = vector.broadcast %cst_11 : f32 to vector<2x256xf32>
    %24 = arith.divf %22, %23 : vector<2x256xf32>
    %cst_12 = arith.constant dense<0xFF800000> : vector<2x256xf32>
    %25 = vector.multi_reduction <maximumf>, %21, %cst_12 [1] : vector<2x4x256xf32> to vector<2x256xf32>
    %cst_13 = arith.constant 0.000000e+00 : f32
    %26 = vector.broadcast %cst_13 : f32 to vector<2x256xf32>
    %c0_14 = arith.constant 0 : index
    %27 = memref.load %arg5[%c0_14] : memref<98xf32, #tpu.memory_space<smem>>
    %c49 = arith.constant 49 : index
    %28 = memref.load %arg5[%c49] : memref<98xf32, #tpu.memory_space<smem>>
    %c51_i32 = arith.constant 51 : i32
    %29 = tpu.dynamic_rotate %24 by %c51_i32 dim 1 : vector<2x256xf32>, i32 -> vector<2x256xf32>
    %c51_i32_15 = arith.constant 51 : i32
    %30 = tpu.dynamic_rotate %25 by %c51_i32_15 dim 1 : vector<2x256xf32>, i32 -> vector<2x256xf32>
    %c0_16 = arith.constant 0 : index
    %c0_17 = arith.constant 0 : index
    %31 = vector.load %arg4[%c0_16, %c0_17] : memref<49x256xf32, #tpu.memory_space<vmem>>, vector<1x256xf32>
    %32 = vector.broadcast %27 : f32 to vector<2x256xf32>
    %33 = arith.mulf %32, %29 : vector<2x256xf32>
    %34 = vector.broadcast %28 : f32 to vector<2x256xf32>
    %35 = arith.mulf %34, %30 : vector<2x256xf32>
    %36 = arith.addf %33, %35 : vector<2x256xf32>
    %37 = vector.broadcast %31 : vector<1x256xf32> to vector<2x256xf32>
    %38 = arith.mulf %37, %36 : vector<2x256xf32>
    %39 = arith.addf %26, %38 : vector<2x256xf32>
    %c1 = arith.constant 1 : index
    %40 = memref.load %arg5[%c1] : memref<98xf32, #tpu.memory_space<smem>>
    %c50 = arith.constant 50 : index
    %41 = memref.load %arg5[%c50] : memref<98xf32, #tpu.memory_space<smem>>
    %c50_i32 = arith.constant 50 : i32
    %42 = tpu.dynamic_rotate %24 by %c50_i32 dim 1 : vector<2x256xf32>, i32 -> vector<2x256xf32>
    %c50_i32_18 = arith.constant 50 : i32
    %43 = tpu.dynamic_rotate %25 by %c50_i32_18 dim 1 : vector<2x256xf32>, i32 -> vector<2x256xf32>
    %c1_19 = arith.constant 1 : index
    %c0_20 = arith.constant 0 : index
    %44 = vector.load %arg4[%c1_19, %c0_20] : memref<49x256xf32, #tpu.memory_space<vmem>>, vector<1x256xf32>
    %45 = vector.broadcast %40 : f32 to vector<2x256xf32>
    %46 = arith.mulf %45, %42 : vector<2x256xf32>
    %47 = vector.broadcast %41 : f32 to vector<2x256xf32>
    %48 = arith.mulf %47, %43 : vector<2x256xf32>
    %49 = arith.addf %46, %48 : vector<2x256xf32>
    %50 = vector.broadcast %44 : vector<1x256xf32> to vector<2x256xf32>
    %51 = arith.mulf %50, %49 : vector<2x256xf32>
    %52 = arith.addf %39, %51 : vector<2x256xf32>
    %c2 = arith.constant 2 : index
    %53 = memref.load %arg5[%c2] : memref<98xf32, #tpu.memory_space<smem>>
    %c51 = arith.constant 51 : index
    %54 = memref.load %arg5[%c51] : memref<98xf32, #tpu.memory_space<smem>>
    %c49_i32 = arith.constant 49 : i32
    %55 = tpu.dynamic_rotate %24 by %c49_i32 dim 1 : vector<2x256xf32>, i32 -> vector<2x256xf32>
    %c49_i32_21 = arith.constant 49 : i32
    %56 = tpu.dynamic_rotate %25 by %c49_i32_21 dim 1 : vector<2x256xf32>, i32 -> vector<2x256xf32>
    %c2_22 = arith.constant 2 : index
    %c0_23 = arith.constant 0 : index
    %57 = vector.load %arg4[%c2_22, %c0_23] : memref<49x256xf32, #tpu.memory_space<vmem>>, vector<1x256xf32>
    %58 = vector.broadcast %53 : f32 to vector<2x256xf32>
    %59 = arith.mulf %58, %55 : vector<2x256xf32>
    %60 = vector.broadcast %54 : f32 to vector<2x256xf32>
    %61 = arith.mulf %60, %56 : vector<2x256xf32>
    %62 = arith.addf %59, %61 : vector<2x256xf32>
    %63 = vector.broadcast %57 : vector<1x256xf32> to vector<2x256xf32>
    %64 = arith.mulf %63, %62 : vector<2x256xf32>
    %65 = arith.addf %52, %64 : vector<2x256xf32>
    %c3 = arith.constant 3 : index
    %66 = memref.load %arg5[%c3] : memref<98xf32, #tpu.memory_space<smem>>
    %c52 = arith.constant 52 : index
    %67 = memref.load %arg5[%c52] : memref<98xf32, #tpu.memory_space<smem>>
    %c48_i32 = arith.constant 48 : i32
    %68 = tpu.dynamic_rotate %24 by %c48_i32 dim 1 : vector<2x256xf32>, i32 -> vector<2x256xf32>
    %c48_i32_24 = arith.constant 48 : i32
    %69 = tpu.dynamic_rotate %25 by %c48_i32_24 dim 1 : vector<2x256xf32>, i32 -> vector<2x256xf32>
    %c3_25 = arith.constant 3 : index
    %c0_26 = arith.constant 0 : index
    %70 = vector.load %arg4[%c3_25, %c0_26] : memref<49x256xf32, #tpu.memory_space<vmem>>, vector<1x256xf32>
    %71 = vector.broadcast %66 : f32 to vector<2x256xf32>
    %72 = arith.mulf %71, %68 : vector<2x256xf32>
    %73 = vector.broadcast %67 : f32 to vector<2x256xf32>
    %74 = arith.mulf %73, %69 : vector<2x256xf32>
    %75 = arith.addf %72, %74 : vector<2x256xf32>
    %76 = vector.broadcast %70 : vector<1x256xf32> to vector<2x256xf32>
    %77 = arith.mulf %76, %75 : vector<2x256xf32>
    %78 = arith.addf %65, %77 : vector<2x256xf32>
    %c4 = arith.constant 4 : index
    %79 = memref.load %arg5[%c4] : memref<98xf32, #tpu.memory_space<smem>>
    %c53 = arith.constant 53 : index
    %80 = memref.load %arg5[%c53] : memref<98xf32, #tpu.memory_space<smem>>
    %c47_i32 = arith.constant 47 : i32
    %81 = tpu.dynamic_rotate %24 by %c47_i32 dim 1 : vector<2x256xf32>, i32 -> vector<2x256xf32>
    %c47_i32_27 = arith.constant 47 : i32
    %82 = tpu.dynamic_rotate %25 by %c47_i32_27 dim 1 : vector<2x256xf32>, i32 -> vector<2x256xf32>
    %c4_28 = arith.constant 4 : index
    %c0_29 = arith.constant 0 : index
    %83 = vector.load %arg4[%c4_28, %c0_29] : memref<49x256xf32, #tpu.memory_space<vmem>>, vector<1x256xf32>
    %84 = vector.broadcast %79 : f32 to vector<2x256xf32>
    %85 = arith.mulf %84, %81 : vector<2x256xf32>
    %86 = vector.broadcast %80 : f32 to vector<2x256xf32>
    %87 = arith.mulf %86, %82 : vector<2x256xf32>
    %88 = arith.addf %85, %87 : vector<2x256xf32>
    %89 = vector.broadcast %83 : vector<1x256xf32> to vector<2x256xf32>
    %90 = arith.mulf %89, %88 : vector<2x256xf32>
    %91 = arith.addf %78, %90 : vector<2x256xf32>
    %c5 = arith.constant 5 : index
    %92 = memref.load %arg5[%c5] : memref<98xf32, #tpu.memory_space<smem>>
    %c54 = arith.constant 54 : index
    %93 = memref.load %arg5[%c54] : memref<98xf32, #tpu.memory_space<smem>>
    %c46_i32 = arith.constant 46 : i32
    %94 = tpu.dynamic_rotate %24 by %c46_i32 dim 1 : vector<2x256xf32>, i32 -> vector<2x256xf32>
    %c46_i32_30 = arith.constant 46 : i32
    %95 = tpu.dynamic_rotate %25 by %c46_i32_30 dim 1 : vector<2x256xf32>, i32 -> vector<2x256xf32>
    %c5_31 = arith.constant 5 : index
    %c0_32 = arith.constant 0 : index
    %96 = vector.load %arg4[%c5_31, %c0_32] : memref<49x256xf32, #tpu.memory_space<vmem>>, vector<1x256xf32>
    %97 = vector.broadcast %92 : f32 to vector<2x256xf32>
    %98 = arith.mulf %97, %94 : vector<2x256xf32>
    %99 = vector.broadcast %93 : f32 to vector<2x256xf32>
    %100 = arith.mulf %99, %95 : vector<2x256xf32>
    %101 = arith.addf %98, %100 : vector<2x256xf32>
    %102 = vector.broadcast %96 : vector<1x256xf32> to vector<2x256xf32>
    %103 = arith.mulf %102, %101 : vector<2x256xf32>
    %104 = arith.addf %91, %103 : vector<2x256xf32>
    %c6 = arith.constant 6 : index
    %105 = memref.load %arg5[%c6] : memref<98xf32, #tpu.memory_space<smem>>
    %c55 = arith.constant 55 : index
    %106 = memref.load %arg5[%c55] : memref<98xf32, #tpu.memory_space<smem>>
    %c45_i32 = arith.constant 45 : i32
    %107 = tpu.dynamic_rotate %24 by %c45_i32 dim 1 : vector<2x256xf32>, i32 -> vector<2x256xf32>
    %c45_i32_33 = arith.constant 45 : i32
    %108 = tpu.dynamic_rotate %25 by %c45_i32_33 dim 1 : vector<2x256xf32>, i32 -> vector<2x256xf32>
    %c6_34 = arith.constant 6 : index
    %c0_35 = arith.constant 0 : index
    %109 = vector.load %arg4[%c6_34, %c0_35] : memref<49x256xf32, #tpu.memory_space<vmem>>, vector<1x256xf32>
    %110 = vector.broadcast %105 : f32 to vector<2x256xf32>
    %111 = arith.mulf %110, %107 : vector<2x256xf32>
    %112 = vector.broadcast %106 : f32 to vector<2x256xf32>
    %113 = arith.mulf %112, %108 : vector<2x256xf32>
    %114 = arith.addf %111, %113 : vector<2x256xf32>
    %115 = vector.broadcast %109 : vector<1x256xf32> to vector<2x256xf32>
    %116 = arith.mulf %115, %114 : vector<2x256xf32>
    %117 = arith.addf %104, %116 : vector<2x256xf32>
    %c7 = arith.constant 7 : index
    %118 = memref.load %arg5[%c7] : memref<98xf32, #tpu.memory_space<smem>>
    %c56 = arith.constant 56 : index
    %119 = memref.load %arg5[%c56] : memref<98xf32, #tpu.memory_space<smem>>
    %c35_i32 = arith.constant 35 : i32
    %120 = tpu.dynamic_rotate %24 by %c35_i32 dim 1 : vector<2x256xf32>, i32 -> vector<2x256xf32>
    %c35_i32_36 = arith.constant 35 : i32
    %121 = tpu.dynamic_rotate %25 by %c35_i32_36 dim 1 : vector<2x256xf32>, i32 -> vector<2x256xf32>
    %c7_37 = arith.constant 7 : index
    %c0_38 = arith.constant 0 : index
    %122 = vector.load %arg4[%c7_37, %c0_38] : memref<49x256xf32, #tpu.memory_space<vmem>>, vector<1x256xf32>
    %123 = vector.broadcast %118 : f32 to vector<2x256xf32>
    %124 = arith.mulf %123, %120 : vector<2x256xf32>
    %125 = vector.broadcast %119 : f32 to vector<2x256xf32>
    %126 = arith.mulf %125, %121 : vector<2x256xf32>
    %127 = arith.addf %124, %126 : vector<2x256xf32>
    %128 = vector.broadcast %122 : vector<1x256xf32> to vector<2x256xf32>
    %129 = arith.mulf %128, %127 : vector<2x256xf32>
    %130 = arith.addf %117, %129 : vector<2x256xf32>
    %c8 = arith.constant 8 : index
    %131 = memref.load %arg5[%c8] : memref<98xf32, #tpu.memory_space<smem>>
    %c57 = arith.constant 57 : index
    %132 = memref.load %arg5[%c57] : memref<98xf32, #tpu.memory_space<smem>>
    %c34_i32 = arith.constant 34 : i32
    %133 = tpu.dynamic_rotate %24 by %c34_i32 dim 1 : vector<2x256xf32>, i32 -> vector<2x256xf32>
    %c34_i32_39 = arith.constant 34 : i32
    %134 = tpu.dynamic_rotate %25 by %c34_i32_39 dim 1 : vector<2x256xf32>, i32 -> vector<2x256xf32>
    %c8_40 = arith.constant 8 : index
    %c0_41 = arith.constant 0 : index
    %135 = vector.load %arg4[%c8_40, %c0_41] : memref<49x256xf32, #tpu.memory_space<vmem>>, vector<1x256xf32>
    %136 = vector.broadcast %131 : f32 to vector<2x256xf32>
    %137 = arith.mulf %136, %133 : vector<2x256xf32>
    %138 = vector.broadcast %132 : f32 to vector<2x256xf32>
    %139 = arith.mulf %138, %134 : vector<2x256xf32>
    %140 = arith.addf %137, %139 : vector<2x256xf32>
    %141 = vector.broadcast %135 : vector<1x256xf32> to vector<2x256xf32>
    %142 = arith.mulf %141, %140 : vector<2x256xf32>
    %143 = arith.addf %130, %142 : vector<2x256xf32>
    %c9 = arith.constant 9 : index
    %144 = memref.load %arg5[%c9] : memref<98xf32, #tpu.memory_space<smem>>
    %c58 = arith.constant 58 : index
    %145 = memref.load %arg5[%c58] : memref<98xf32, #tpu.memory_space<smem>>
    %c33_i32 = arith.constant 33 : i32
    %146 = tpu.dynamic_rotate %24 by %c33_i32 dim 1 : vector<2x256xf32>, i32 -> vector<2x256xf32>
    %c33_i32_42 = arith.constant 33 : i32
    %147 = tpu.dynamic_rotate %25 by %c33_i32_42 dim 1 : vector<2x256xf32>, i32 -> vector<2x256xf32>
    %c9_43 = arith.constant 9 : index
    %c0_44 = arith.constant 0 : index
    %148 = vector.load %arg4[%c9_43, %c0_44] : memref<49x256xf32, #tpu.memory_space<vmem>>, vector<1x256xf32>
    %149 = vector.broadcast %144 : f32 to vector<2x256xf32>
    %150 = arith.mulf %149, %146 : vector<2x256xf32>
    %151 = vector.broadcast %145 : f32 to vector<2x256xf32>
    %152 = arith.mulf %151, %147 : vector<2x256xf32>
    %153 = arith.addf %150, %152 : vector<2x256xf32>
    %154 = vector.broadcast %148 : vector<1x256xf32> to vector<2x256xf32>
    %155 = arith.mulf %154, %153 : vector<2x256xf32>
    %156 = arith.addf %143, %155 : vector<2x256xf32>
    %c10 = arith.constant 10 : index
    %157 = memref.load %arg5[%c10] : memref<98xf32, #tpu.memory_space<smem>>
    %c59 = arith.constant 59 : index
    %158 = memref.load %arg5[%c59] : memref<98xf32, #tpu.memory_space<smem>>
    %c32_i32 = arith.constant 32 : i32
    %159 = tpu.dynamic_rotate %24 by %c32_i32 dim 1 : vector<2x256xf32>, i32 -> vector<2x256xf32>
    %c32_i32_45 = arith.constant 32 : i32
    %160 = tpu.dynamic_rotate %25 by %c32_i32_45 dim 1 : vector<2x256xf32>, i32 -> vector<2x256xf32>
    %c10_46 = arith.constant 10 : index
    %c0_47 = arith.constant 0 : index
    %161 = vector.load %arg4[%c10_46, %c0_47] : memref<49x256xf32, #tpu.memory_space<vmem>>, vector<1x256xf32>
    %162 = vector.broadcast %157 : f32 to vector<2x256xf32>
    %163 = arith.mulf %162, %159 : vector<2x256xf32>
    %164 = vector.broadcast %158 : f32 to vector<2x256xf32>
    %165 = arith.mulf %164, %160 : vector<2x256xf32>
    %166 = arith.addf %163, %165 : vector<2x256xf32>
    %167 = vector.broadcast %161 : vector<1x256xf32> to vector<2x256xf32>
    %168 = arith.mulf %167, %166 : vector<2x256xf32>
    %169 = arith.addf %156, %168 : vector<2x256xf32>
    %c11 = arith.constant 11 : index
    %170 = memref.load %arg5[%c11] : memref<98xf32, #tpu.memory_space<smem>>
    %c60 = arith.constant 60 : index
    %171 = memref.load %arg5[%c60] : memref<98xf32, #tpu.memory_space<smem>>
    %c31_i32 = arith.constant 31 : i32
    %172 = tpu.dynamic_rotate %24 by %c31_i32 dim 1 : vector<2x256xf32>, i32 -> vector<2x256xf32>
    %c31_i32_48 = arith.constant 31 : i32
    %173 = tpu.dynamic_rotate %25 by %c31_i32_48 dim 1 : vector<2x256xf32>, i32 -> vector<2x256xf32>
    %c11_49 = arith.constant 11 : index
    %c0_50 = arith.constant 0 : index
    %174 = vector.load %arg4[%c11_49, %c0_50] : memref<49x256xf32, #tpu.memory_space<vmem>>, vector<1x256xf32>
    %175 = vector.broadcast %170 : f32 to vector<2x256xf32>
    %176 = arith.mulf %175, %172 : vector<2x256xf32>
    %177 = vector.broadcast %171 : f32 to vector<2x256xf32>
    %178 = arith.mulf %177, %173 : vector<2x256xf32>
    %179 = arith.addf %176, %178 : vector<2x256xf32>
    %180 = vector.broadcast %174 : vector<1x256xf32> to vector<2x256xf32>
    %181 = arith.mulf %180, %179 : vector<2x256xf32>
    %182 = arith.addf %169, %181 : vector<2x256xf32>
    %c12 = arith.constant 12 : index
    %183 = memref.load %arg5[%c12] : memref<98xf32, #tpu.memory_space<smem>>
    %c61 = arith.constant 61 : index
    %184 = memref.load %arg5[%c61] : memref<98xf32, #tpu.memory_space<smem>>
    %c30_i32 = arith.constant 30 : i32
    %185 = tpu.dynamic_rotate %24 by %c30_i32 dim 1 : vector<2x256xf32>, i32 -> vector<2x256xf32>
    %c30_i32_51 = arith.constant 30 : i32
    %186 = tpu.dynamic_rotate %25 by %c30_i32_51 dim 1 : vector<2x256xf32>, i32 -> vector<2x256xf32>
    %c12_52 = arith.constant 12 : index
    %c0_53 = arith.constant 0 : index
    %187 = vector.load %arg4[%c12_52, %c0_53] : memref<49x256xf32, #tpu.memory_space<vmem>>, vector<1x256xf32>
    %188 = vector.broadcast %183 : f32 to vector<2x256xf32>
    %189 = arith.mulf %188, %185 : vector<2x256xf32>
    %190 = vector.broadcast %184 : f32 to vector<2x256xf32>
    %191 = arith.mulf %190, %186 : vector<2x256xf32>
    %192 = arith.addf %189, %191 : vector<2x256xf32>
    %193 = vector.broadcast %187 : vector<1x256xf32> to vector<2x256xf32>
    %194 = arith.mulf %193, %192 : vector<2x256xf32>
    %195 = arith.addf %182, %194 : vector<2x256xf32>
    %c13 = arith.constant 13 : index
    %196 = memref.load %arg5[%c13] : memref<98xf32, #tpu.memory_space<smem>>
    %c62 = arith.constant 62 : index
    %197 = memref.load %arg5[%c62] : memref<98xf32, #tpu.memory_space<smem>>
    %c29_i32 = arith.constant 29 : i32
    %198 = tpu.dynamic_rotate %24 by %c29_i32 dim 1 : vector<2x256xf32>, i32 -> vector<2x256xf32>
    %c29_i32_54 = arith.constant 29 : i32
    %199 = tpu.dynamic_rotate %25 by %c29_i32_54 dim 1 : vector<2x256xf32>, i32 -> vector<2x256xf32>
    %c13_55 = arith.constant 13 : index
    %c0_56 = arith.constant 0 : index
    %200 = vector.load %arg4[%c13_55, %c0_56] : memref<49x256xf32, #tpu.memory_space<vmem>>, vector<1x256xf32>
    %201 = vector.broadcast %196 : f32 to vector<2x256xf32>
    %202 = arith.mulf %201, %198 : vector<2x256xf32>
    %203 = vector.broadcast %197 : f32 to vector<2x256xf32>
    %204 = arith.mulf %203, %199 : vector<2x256xf32>
    %205 = arith.addf %202, %204 : vector<2x256xf32>
    %206 = vector.broadcast %200 : vector<1x256xf32> to vector<2x256xf32>
    %207 = arith.mulf %206, %205 : vector<2x256xf32>
    %208 = arith.addf %195, %207 : vector<2x256xf32>
    %c14 = arith.constant 14 : index
    %209 = memref.load %arg5[%c14] : memref<98xf32, #tpu.memory_space<smem>>
    %c63 = arith.constant 63 : index
    %210 = memref.load %arg5[%c63] : memref<98xf32, #tpu.memory_space<smem>>
    %c19_i32 = arith.constant 19 : i32
    %211 = tpu.dynamic_rotate %24 by %c19_i32 dim 1 : vector<2x256xf32>, i32 -> vector<2x256xf32>
    %c19_i32_57 = arith.constant 19 : i32
    %212 = tpu.dynamic_rotate %25 by %c19_i32_57 dim 1 : vector<2x256xf32>, i32 -> vector<2x256xf32>
    %c14_58 = arith.constant 14 : index
    %c0_59 = arith.constant 0 : index
    %213 = vector.load %arg4[%c14_58, %c0_59] : memref<49x256xf32, #tpu.memory_space<vmem>>, vector<1x256xf32>
    %214 = vector.broadcast %209 : f32 to vector<2x256xf32>
    %215 = arith.mulf %214, %211 : vector<2x256xf32>
    %216 = vector.broadcast %210 : f32 to vector<2x256xf32>
    %217 = arith.mulf %216, %212 : vector<2x256xf32>
    %218 = arith.addf %215, %217 : vector<2x256xf32>
    %219 = vector.broadcast %213 : vector<1x256xf32> to vector<2x256xf32>
    %220 = arith.mulf %219, %218 : vector<2x256xf32>
    %221 = arith.addf %208, %220 : vector<2x256xf32>
    %c15 = arith.constant 15 : index
    %222 = memref.load %arg5[%c15] : memref<98xf32, #tpu.memory_space<smem>>
    %c64 = arith.constant 64 : index
    %223 = memref.load %arg5[%c64] : memref<98xf32, #tpu.memory_space<smem>>
    %c18_i32 = arith.constant 18 : i32
    %224 = tpu.dynamic_rotate %24 by %c18_i32 dim 1 : vector<2x256xf32>, i32 -> vector<2x256xf32>
    %c18_i32_60 = arith.constant 18 : i32
    %225 = tpu.dynamic_rotate %25 by %c18_i32_60 dim 1 : vector<2x256xf32>, i32 -> vector<2x256xf32>
    %c15_61 = arith.constant 15 : index
    %c0_62 = arith.constant 0 : index
    %226 = vector.load %arg4[%c15_61, %c0_62] : memref<49x256xf32, #tpu.memory_space<vmem>>, vector<1x256xf32>
    %227 = vector.broadcast %222 : f32 to vector<2x256xf32>
    %228 = arith.mulf %227, %224 : vector<2x256xf32>
    %229 = vector.broadcast %223 : f32 to vector<2x256xf32>
    %230 = arith.mulf %229, %225 : vector<2x256xf32>
    %231 = arith.addf %228, %230 : vector<2x256xf32>
    %232 = vector.broadcast %226 : vector<1x256xf32> to vector<2x256xf32>
    %233 = arith.mulf %232, %231 : vector<2x256xf32>
    %234 = arith.addf %221, %233 : vector<2x256xf32>
    %c16 = arith.constant 16 : index
    %235 = memref.load %arg5[%c16] : memref<98xf32, #tpu.memory_space<smem>>
    %c65 = arith.constant 65 : index
    %236 = memref.load %arg5[%c65] : memref<98xf32, #tpu.memory_space<smem>>
    %c17_i32 = arith.constant 17 : i32
    %237 = tpu.dynamic_rotate %24 by %c17_i32 dim 1 : vector<2x256xf32>, i32 -> vector<2x256xf32>
    %c17_i32_63 = arith.constant 17 : i32
    %238 = tpu.dynamic_rotate %25 by %c17_i32_63 dim 1 : vector<2x256xf32>, i32 -> vector<2x256xf32>
    %c16_64 = arith.constant 16 : index
    %c0_65 = arith.constant 0 : index
    %239 = vector.load %arg4[%c16_64, %c0_65] : memref<49x256xf32, #tpu.memory_space<vmem>>, vector<1x256xf32>
    %240 = vector.broadcast %235 : f32 to vector<2x256xf32>
    %241 = arith.mulf %240, %237 : vector<2x256xf32>
    %242 = vector.broadcast %236 : f32 to vector<2x256xf32>
    %243 = arith.mulf %242, %238 : vector<2x256xf32>
    %244 = arith.addf %241, %243 : vector<2x256xf32>
    %245 = vector.broadcast %239 : vector<1x256xf32> to vector<2x256xf32>
    %246 = arith.mulf %245, %244 : vector<2x256xf32>
    %247 = arith.addf %234, %246 : vector<2x256xf32>
    %c17 = arith.constant 17 : index
    %248 = memref.load %arg5[%c17] : memref<98xf32, #tpu.memory_space<smem>>
    %c66 = arith.constant 66 : index
    %249 = memref.load %arg5[%c66] : memref<98xf32, #tpu.memory_space<smem>>
    %c16_i32 = arith.constant 16 : i32
    %250 = tpu.dynamic_rotate %24 by %c16_i32 dim 1 : vector<2x256xf32>, i32 -> vector<2x256xf32>
    %c16_i32_66 = arith.constant 16 : i32
    %251 = tpu.dynamic_rotate %25 by %c16_i32_66 dim 1 : vector<2x256xf32>, i32 -> vector<2x256xf32>
    %c17_67 = arith.constant 17 : index
    %c0_68 = arith.constant 0 : index
    %252 = vector.load %arg4[%c17_67, %c0_68] : memref<49x256xf32, #tpu.memory_space<vmem>>, vector<1x256xf32>
    %253 = vector.broadcast %248 : f32 to vector<2x256xf32>
    %254 = arith.mulf %253, %250 : vector<2x256xf32>
    %255 = vector.broadcast %249 : f32 to vector<2x256xf32>
    %256 = arith.mulf %255, %251 : vector<2x256xf32>
    %257 = arith.addf %254, %256 : vector<2x256xf32>
    %258 = vector.broadcast %252 : vector<1x256xf32> to vector<2x256xf32>
    %259 = arith.mulf %258, %257 : vector<2x256xf32>
    %260 = arith.addf %247, %259 : vector<2x256xf32>
    %c18 = arith.constant 18 : index
    %261 = memref.load %arg5[%c18] : memref<98xf32, #tpu.memory_space<smem>>
    %c67 = arith.constant 67 : index
    %262 = memref.load %arg5[%c67] : memref<98xf32, #tpu.memory_space<smem>>
    %c15_i32 = arith.constant 15 : i32
    %263 = tpu.dynamic_rotate %24 by %c15_i32 dim 1 : vector<2x256xf32>, i32 -> vector<2x256xf32>
    %c15_i32_69 = arith.constant 15 : i32
    %264 = tpu.dynamic_rotate %25 by %c15_i32_69 dim 1 : vector<2x256xf32>, i32 -> vector<2x256xf32>
    %c18_70 = arith.constant 18 : index
    %c0_71 = arith.constant 0 : index
    %265 = vector.load %arg4[%c18_70, %c0_71] : memref<49x256xf32, #tpu.memory_space<vmem>>, vector<1x256xf32>
    %266 = vector.broadcast %261 : f32 to vector<2x256xf32>
    %267 = arith.mulf %266, %263 : vector<2x256xf32>
    %268 = vector.broadcast %262 : f32 to vector<2x256xf32>
    %269 = arith.mulf %268, %264 : vector<2x256xf32>
    %270 = arith.addf %267, %269 : vector<2x256xf32>
    %271 = vector.broadcast %265 : vector<1x256xf32> to vector<2x256xf32>
    %272 = arith.mulf %271, %270 : vector<2x256xf32>
    %273 = arith.addf %260, %272 : vector<2x256xf32>
    %c19 = arith.constant 19 : index
    %274 = memref.load %arg5[%c19] : memref<98xf32, #tpu.memory_space<smem>>
    %c68 = arith.constant 68 : index
    %275 = memref.load %arg5[%c68] : memref<98xf32, #tpu.memory_space<smem>>
    %c14_i32 = arith.constant 14 : i32
    %276 = tpu.dynamic_rotate %24 by %c14_i32 dim 1 : vector<2x256xf32>, i32 -> vector<2x256xf32>
    %c14_i32_72 = arith.constant 14 : i32
    %277 = tpu.dynamic_rotate %25 by %c14_i32_72 dim 1 : vector<2x256xf32>, i32 -> vector<2x256xf32>
    %c19_73 = arith.constant 19 : index
    %c0_74 = arith.constant 0 : index
    %278 = vector.load %arg4[%c19_73, %c0_74] : memref<49x256xf32, #tpu.memory_space<vmem>>, vector<1x256xf32>
    %279 = vector.broadcast %274 : f32 to vector<2x256xf32>
    %280 = arith.mulf %279, %276 : vector<2x256xf32>
    %281 = vector.broadcast %275 : f32 to vector<2x256xf32>
    %282 = arith.mulf %281, %277 : vector<2x256xf32>
    %283 = arith.addf %280, %282 : vector<2x256xf32>
    %284 = vector.broadcast %278 : vector<1x256xf32> to vector<2x256xf32>
    %285 = arith.mulf %284, %283 : vector<2x256xf32>
    %286 = arith.addf %273, %285 : vector<2x256xf32>
    %c20 = arith.constant 20 : index
    %287 = memref.load %arg5[%c20] : memref<98xf32, #tpu.memory_space<smem>>
    %c69 = arith.constant 69 : index
    %288 = memref.load %arg5[%c69] : memref<98xf32, #tpu.memory_space<smem>>
    %c13_i32 = arith.constant 13 : i32
    %289 = tpu.dynamic_rotate %24 by %c13_i32 dim 1 : vector<2x256xf32>, i32 -> vector<2x256xf32>
    %c13_i32_75 = arith.constant 13 : i32
    %290 = tpu.dynamic_rotate %25 by %c13_i32_75 dim 1 : vector<2x256xf32>, i32 -> vector<2x256xf32>
    %c20_76 = arith.constant 20 : index
    %c0_77 = arith.constant 0 : index
    %291 = vector.load %arg4[%c20_76, %c0_77] : memref<49x256xf32, #tpu.memory_space<vmem>>, vector<1x256xf32>
    %292 = vector.broadcast %287 : f32 to vector<2x256xf32>
    %293 = arith.mulf %292, %289 : vector<2x256xf32>
    %294 = vector.broadcast %288 : f32 to vector<2x256xf32>
    %295 = arith.mulf %294, %290 : vector<2x256xf32>
    %296 = arith.addf %293, %295 : vector<2x256xf32>
    %297 = vector.broadcast %291 : vector<1x256xf32> to vector<2x256xf32>
    %298 = arith.mulf %297, %296 : vector<2x256xf32>
    %299 = arith.addf %286, %298 : vector<2x256xf32>
    %c21 = arith.constant 21 : index
    %300 = memref.load %arg5[%c21] : memref<98xf32, #tpu.memory_space<smem>>
    %c70 = arith.constant 70 : index
    %301 = memref.load %arg5[%c70] : memref<98xf32, #tpu.memory_space<smem>>
    %c3_i32 = arith.constant 3 : i32
    %302 = tpu.dynamic_rotate %24 by %c3_i32 dim 1 : vector<2x256xf32>, i32 -> vector<2x256xf32>
    %c3_i32_78 = arith.constant 3 : i32
    %303 = tpu.dynamic_rotate %25 by %c3_i32_78 dim 1 : vector<2x256xf32>, i32 -> vector<2x256xf32>
    %c21_79 = arith.constant 21 : index
    %c0_80 = arith.constant 0 : index
    %304 = vector.load %arg4[%c21_79, %c0_80] : memref<49x256xf32, #tpu.memory_space<vmem>>, vector<1x256xf32>
    %305 = vector.broadcast %300 : f32 to vector<2x256xf32>
    %306 = arith.mulf %305, %302 : vector<2x256xf32>
    %307 = vector.broadcast %301 : f32 to vector<2x256xf32>
    %308 = arith.mulf %307, %303 : vector<2x256xf32>
    %309 = arith.addf %306, %308 : vector<2x256xf32>
    %310 = vector.broadcast %304 : vector<1x256xf32> to vector<2x256xf32>
    %311 = arith.mulf %310, %309 : vector<2x256xf32>
    %312 = arith.addf %299, %311 : vector<2x256xf32>
    %c22 = arith.constant 22 : index
    %313 = memref.load %arg5[%c22] : memref<98xf32, #tpu.memory_space<smem>>
    %c71 = arith.constant 71 : index
    %314 = memref.load %arg5[%c71] : memref<98xf32, #tpu.memory_space<smem>>
    %c2_i32 = arith.constant 2 : i32
    %315 = tpu.dynamic_rotate %24 by %c2_i32 dim 1 : vector<2x256xf32>, i32 -> vector<2x256xf32>
    %c2_i32_81 = arith.constant 2 : i32
    %316 = tpu.dynamic_rotate %25 by %c2_i32_81 dim 1 : vector<2x256xf32>, i32 -> vector<2x256xf32>
    %c22_82 = arith.constant 22 : index
    %c0_83 = arith.constant 0 : index
    %317 = vector.load %arg4[%c22_82, %c0_83] : memref<49x256xf32, #tpu.memory_space<vmem>>, vector<1x256xf32>
    %318 = vector.broadcast %313 : f32 to vector<2x256xf32>
    %319 = arith.mulf %318, %315 : vector<2x256xf32>
    %320 = vector.broadcast %314 : f32 to vector<2x256xf32>
    %321 = arith.mulf %320, %316 : vector<2x256xf32>
    %322 = arith.addf %319, %321 : vector<2x256xf32>
    %323 = vector.broadcast %317 : vector<1x256xf32> to vector<2x256xf32>
    %324 = arith.mulf %323, %322 : vector<2x256xf32>
    %325 = arith.addf %312, %324 : vector<2x256xf32>
    %c23 = arith.constant 23 : index
    %326 = memref.load %arg5[%c23] : memref<98xf32, #tpu.memory_space<smem>>
    %c72 = arith.constant 72 : index
    %327 = memref.load %arg5[%c72] : memref<98xf32, #tpu.memory_space<smem>>
    %c1_i32 = arith.constant 1 : i32
    %328 = tpu.dynamic_rotate %24 by %c1_i32 dim 1 : vector<2x256xf32>, i32 -> vector<2x256xf32>
    %c1_i32_84 = arith.constant 1 : i32
    %329 = tpu.dynamic_rotate %25 by %c1_i32_84 dim 1 : vector<2x256xf32>, i32 -> vector<2x256xf32>
    %c23_85 = arith.constant 23 : index
    %c0_86 = arith.constant 0 : index
    %330 = vector.load %arg4[%c23_85, %c0_86] : memref<49x256xf32, #tpu.memory_space<vmem>>, vector<1x256xf32>
    %331 = vector.broadcast %326 : f32 to vector<2x256xf32>
    %332 = arith.mulf %331, %328 : vector<2x256xf32>
    %333 = vector.broadcast %327 : f32 to vector<2x256xf32>
    %334 = arith.mulf %333, %329 : vector<2x256xf32>
    %335 = arith.addf %332, %334 : vector<2x256xf32>
    %336 = vector.broadcast %330 : vector<1x256xf32> to vector<2x256xf32>
    %337 = arith.mulf %336, %335 : vector<2x256xf32>
    %338 = arith.addf %325, %337 : vector<2x256xf32>
    %c24 = arith.constant 24 : index
    %339 = memref.load %arg5[%c24] : memref<98xf32, #tpu.memory_space<smem>>
    %c73 = arith.constant 73 : index
    %340 = memref.load %arg5[%c73] : memref<98xf32, #tpu.memory_space<smem>>
    %c24_87 = arith.constant 24 : index
    %c0_88 = arith.constant 0 : index
    %341 = vector.load %arg4[%c24_87, %c0_88] : memref<49x256xf32, #tpu.memory_space<vmem>>, vector<1x256xf32>
    %342 = vector.broadcast %339 : f32 to vector<2x256xf32>
    %343 = arith.mulf %342, %24 : vector<2x256xf32>
    %344 = vector.broadcast %340 : f32 to vector<2x256xf32>
    %345 = arith.mulf %344, %25 : vector<2x256xf32>
    %346 = arith.addf %343, %345 : vector<2x256xf32>
    %347 = vector.broadcast %341 : vector<1x256xf32> to vector<2x256xf32>
    %348 = arith.mulf %347, %346 : vector<2x256xf32>
    %349 = arith.addf %338, %348 : vector<2x256xf32>
    %c25 = arith.constant 25 : index
    %350 = memref.load %arg5[%c25] : memref<98xf32, #tpu.memory_space<smem>>
    %c74 = arith.constant 74 : index
    %351 = memref.load %arg5[%c74] : memref<98xf32, #tpu.memory_space<smem>>
    %c255_i32 = arith.constant 255 : i32
    %352 = tpu.dynamic_rotate %24 by %c255_i32 dim 1 : vector<2x256xf32>, i32 -> vector<2x256xf32>
    %c255_i32_89 = arith.constant 255 : i32
    %353 = tpu.dynamic_rotate %25 by %c255_i32_89 dim 1 : vector<2x256xf32>, i32 -> vector<2x256xf32>
    %c25_90 = arith.constant 25 : index
    %c0_91 = arith.constant 0 : index
    %354 = vector.load %arg4[%c25_90, %c0_91] : memref<49x256xf32, #tpu.memory_space<vmem>>, vector<1x256xf32>
    %355 = vector.broadcast %350 : f32 to vector<2x256xf32>
    %356 = arith.mulf %355, %352 : vector<2x256xf32>
    %357 = vector.broadcast %351 : f32 to vector<2x256xf32>
    %358 = arith.mulf %357, %353 : vector<2x256xf32>
    %359 = arith.addf %356, %358 : vector<2x256xf32>
    %360 = vector.broadcast %354 : vector<1x256xf32> to vector<2x256xf32>
    %361 = arith.mulf %360, %359 : vector<2x256xf32>
    %362 = arith.addf %349, %361 : vector<2x256xf32>
    %c26 = arith.constant 26 : index
    %363 = memref.load %arg5[%c26] : memref<98xf32, #tpu.memory_space<smem>>
    %c75 = arith.constant 75 : index
    %364 = memref.load %arg5[%c75] : memref<98xf32, #tpu.memory_space<smem>>
    %c254_i32 = arith.constant 254 : i32
    %365 = tpu.dynamic_rotate %24 by %c254_i32 dim 1 : vector<2x256xf32>, i32 -> vector<2x256xf32>
    %c254_i32_92 = arith.constant 254 : i32
    %366 = tpu.dynamic_rotate %25 by %c254_i32_92 dim 1 : vector<2x256xf32>, i32 -> vector<2x256xf32>
    %c26_93 = arith.constant 26 : index
    %c0_94 = arith.constant 0 : index
    %367 = vector.load %arg4[%c26_93, %c0_94] : memref<49x256xf32, #tpu.memory_space<vmem>>, vector<1x256xf32>
    %368 = vector.broadcast %363 : f32 to vector<2x256xf32>
    %369 = arith.mulf %368, %365 : vector<2x256xf32>
    %370 = vector.broadcast %364 : f32 to vector<2x256xf32>
    %371 = arith.mulf %370, %366 : vector<2x256xf32>
    %372 = arith.addf %369, %371 : vector<2x256xf32>
    %373 = vector.broadcast %367 : vector<1x256xf32> to vector<2x256xf32>
    %374 = arith.mulf %373, %372 : vector<2x256xf32>
    %375 = arith.addf %362, %374 : vector<2x256xf32>
    %c27 = arith.constant 27 : index
    %376 = memref.load %arg5[%c27] : memref<98xf32, #tpu.memory_space<smem>>
    %c76 = arith.constant 76 : index
    %377 = memref.load %arg5[%c76] : memref<98xf32, #tpu.memory_space<smem>>
    %c253_i32 = arith.constant 253 : i32
    %378 = tpu.dynamic_rotate %24 by %c253_i32 dim 1 : vector<2x256xf32>, i32 -> vector<2x256xf32>
    %c253_i32_95 = arith.constant 253 : i32
    %379 = tpu.dynamic_rotate %25 by %c253_i32_95 dim 1 : vector<2x256xf32>, i32 -> vector<2x256xf32>
    %c27_96 = arith.constant 27 : index
    %c0_97 = arith.constant 0 : index
    %380 = vector.load %arg4[%c27_96, %c0_97] : memref<49x256xf32, #tpu.memory_space<vmem>>, vector<1x256xf32>
    %381 = vector.broadcast %376 : f32 to vector<2x256xf32>
    %382 = arith.mulf %381, %378 : vector<2x256xf32>
    %383 = vector.broadcast %377 : f32 to vector<2x256xf32>
    %384 = arith.mulf %383, %379 : vector<2x256xf32>
    %385 = arith.addf %382, %384 : vector<2x256xf32>
    %386 = vector.broadcast %380 : vector<1x256xf32> to vector<2x256xf32>
    %387 = arith.mulf %386, %385 : vector<2x256xf32>
    %388 = arith.addf %375, %387 : vector<2x256xf32>
    %c28 = arith.constant 28 : index
    %389 = memref.load %arg5[%c28] : memref<98xf32, #tpu.memory_space<smem>>
    %c77 = arith.constant 77 : index
    %390 = memref.load %arg5[%c77] : memref<98xf32, #tpu.memory_space<smem>>
    %c243_i32 = arith.constant 243 : i32
    %391 = tpu.dynamic_rotate %24 by %c243_i32 dim 1 : vector<2x256xf32>, i32 -> vector<2x256xf32>
    %c243_i32_98 = arith.constant 243 : i32
    %392 = tpu.dynamic_rotate %25 by %c243_i32_98 dim 1 : vector<2x256xf32>, i32 -> vector<2x256xf32>
    %c28_99 = arith.constant 28 : index
    %c0_100 = arith.constant 0 : index
    %393 = vector.load %arg4[%c28_99, %c0_100] : memref<49x256xf32, #tpu.memory_space<vmem>>, vector<1x256xf32>
    %394 = vector.broadcast %389 : f32 to vector<2x256xf32>
    %395 = arith.mulf %394, %391 : vector<2x256xf32>
    %396 = vector.broadcast %390 : f32 to vector<2x256xf32>
    %397 = arith.mulf %396, %392 : vector<2x256xf32>
    %398 = arith.addf %395, %397 : vector<2x256xf32>
    %399 = vector.broadcast %393 : vector<1x256xf32> to vector<2x256xf32>
    %400 = arith.mulf %399, %398 : vector<2x256xf32>
    %401 = arith.addf %388, %400 : vector<2x256xf32>
    %c29 = arith.constant 29 : index
    %402 = memref.load %arg5[%c29] : memref<98xf32, #tpu.memory_space<smem>>
    %c78 = arith.constant 78 : index
    %403 = memref.load %arg5[%c78] : memref<98xf32, #tpu.memory_space<smem>>
    %c242_i32 = arith.constant 242 : i32
    %404 = tpu.dynamic_rotate %24 by %c242_i32 dim 1 : vector<2x256xf32>, i32 -> vector<2x256xf32>
    %c242_i32_101 = arith.constant 242 : i32
    %405 = tpu.dynamic_rotate %25 by %c242_i32_101 dim 1 : vector<2x256xf32>, i32 -> vector<2x256xf32>
    %c29_102 = arith.constant 29 : index
    %c0_103 = arith.constant 0 : index
    %406 = vector.load %arg4[%c29_102, %c0_103] : memref<49x256xf32, #tpu.memory_space<vmem>>, vector<1x256xf32>
    %407 = vector.broadcast %402 : f32 to vector<2x256xf32>
    %408 = arith.mulf %407, %404 : vector<2x256xf32>
    %409 = vector.broadcast %403 : f32 to vector<2x256xf32>
    %410 = arith.mulf %409, %405 : vector<2x256xf32>
    %411 = arith.addf %408, %410 : vector<2x256xf32>
    %412 = vector.broadcast %406 : vector<1x256xf32> to vector<2x256xf32>
    %413 = arith.mulf %412, %411 : vector<2x256xf32>
    %414 = arith.addf %401, %413 : vector<2x256xf32>
    %c30 = arith.constant 30 : index
    %415 = memref.load %arg5[%c30] : memref<98xf32, #tpu.memory_space<smem>>
    %c79 = arith.constant 79 : index
    %416 = memref.load %arg5[%c79] : memref<98xf32, #tpu.memory_space<smem>>
    %c241_i32 = arith.constant 241 : i32
    %417 = tpu.dynamic_rotate %24 by %c241_i32 dim 1 : vector<2x256xf32>, i32 -> vector<2x256xf32>
    %c241_i32_104 = arith.constant 241 : i32
    %418 = tpu.dynamic_rotate %25 by %c241_i32_104 dim 1 : vector<2x256xf32>, i32 -> vector<2x256xf32>
    %c30_105 = arith.constant 30 : index
    %c0_106 = arith.constant 0 : index
    %419 = vector.load %arg4[%c30_105, %c0_106] : memref<49x256xf32, #tpu.memory_space<vmem>>, vector<1x256xf32>
    %420 = vector.broadcast %415 : f32 to vector<2x256xf32>
    %421 = arith.mulf %420, %417 : vector<2x256xf32>
    %422 = vector.broadcast %416 : f32 to vector<2x256xf32>
    %423 = arith.mulf %422, %418 : vector<2x256xf32>
    %424 = arith.addf %421, %423 : vector<2x256xf32>
    %425 = vector.broadcast %419 : vector<1x256xf32> to vector<2x256xf32>
    %426 = arith.mulf %425, %424 : vector<2x256xf32>
    %427 = arith.addf %414, %426 : vector<2x256xf32>
    %c31 = arith.constant 31 : index
    %428 = memref.load %arg5[%c31] : memref<98xf32, #tpu.memory_space<smem>>
    %c80 = arith.constant 80 : index
    %429 = memref.load %arg5[%c80] : memref<98xf32, #tpu.memory_space<smem>>
    %c240_i32 = arith.constant 240 : i32
    %430 = tpu.dynamic_rotate %24 by %c240_i32 dim 1 : vector<2x256xf32>, i32 -> vector<2x256xf32>
    %c240_i32_107 = arith.constant 240 : i32
    %431 = tpu.dynamic_rotate %25 by %c240_i32_107 dim 1 : vector<2x256xf32>, i32 -> vector<2x256xf32>
    %c31_108 = arith.constant 31 : index
    %c0_109 = arith.constant 0 : index
    %432 = vector.load %arg4[%c31_108, %c0_109] : memref<49x256xf32, #tpu.memory_space<vmem>>, vector<1x256xf32>
    %433 = vector.broadcast %428 : f32 to vector<2x256xf32>
    %434 = arith.mulf %433, %430 : vector<2x256xf32>
    %435 = vector.broadcast %429 : f32 to vector<2x256xf32>
    %436 = arith.mulf %435, %431 : vector<2x256xf32>
    %437 = arith.addf %434, %436 : vector<2x256xf32>
    %438 = vector.broadcast %432 : vector<1x256xf32> to vector<2x256xf32>
    %439 = arith.mulf %438, %437 : vector<2x256xf32>
    %440 = arith.addf %427, %439 : vector<2x256xf32>
    %c32 = arith.constant 32 : index
    %441 = memref.load %arg5[%c32] : memref<98xf32, #tpu.memory_space<smem>>
    %c81 = arith.constant 81 : index
    %442 = memref.load %arg5[%c81] : memref<98xf32, #tpu.memory_space<smem>>
    %c239_i32 = arith.constant 239 : i32
    %443 = tpu.dynamic_rotate %24 by %c239_i32 dim 1 : vector<2x256xf32>, i32 -> vector<2x256xf32>
    %c239_i32_110 = arith.constant 239 : i32
    %444 = tpu.dynamic_rotate %25 by %c239_i32_110 dim 1 : vector<2x256xf32>, i32 -> vector<2x256xf32>
    %c32_111 = arith.constant 32 : index
    %c0_112 = arith.constant 0 : index
    %445 = vector.load %arg4[%c32_111, %c0_112] : memref<49x256xf32, #tpu.memory_space<vmem>>, vector<1x256xf32>
    %446 = vector.broadcast %441 : f32 to vector<2x256xf32>
    %447 = arith.mulf %446, %443 : vector<2x256xf32>
    %448 = vector.broadcast %442 : f32 to vector<2x256xf32>
    %449 = arith.mulf %448, %444 : vector<2x256xf32>
    %450 = arith.addf %447, %449 : vector<2x256xf32>
    %451 = vector.broadcast %445 : vector<1x256xf32> to vector<2x256xf32>
    %452 = arith.mulf %451, %450 : vector<2x256xf32>
    %453 = arith.addf %440, %452 : vector<2x256xf32>
    %c33 = arith.constant 33 : index
    %454 = memref.load %arg5[%c33] : memref<98xf32, #tpu.memory_space<smem>>
    %c82 = arith.constant 82 : index
    %455 = memref.load %arg5[%c82] : memref<98xf32, #tpu.memory_space<smem>>
    %c238_i32 = arith.constant 238 : i32
    %456 = tpu.dynamic_rotate %24 by %c238_i32 dim 1 : vector<2x256xf32>, i32 -> vector<2x256xf32>
    %c238_i32_113 = arith.constant 238 : i32
    %457 = tpu.dynamic_rotate %25 by %c238_i32_113 dim 1 : vector<2x256xf32>, i32 -> vector<2x256xf32>
    %c33_114 = arith.constant 33 : index
    %c0_115 = arith.constant 0 : index
    %458 = vector.load %arg4[%c33_114, %c0_115] : memref<49x256xf32, #tpu.memory_space<vmem>>, vector<1x256xf32>
    %459 = vector.broadcast %454 : f32 to vector<2x256xf32>
    %460 = arith.mulf %459, %456 : vector<2x256xf32>
    %461 = vector.broadcast %455 : f32 to vector<2x256xf32>
    %462 = arith.mulf %461, %457 : vector<2x256xf32>
    %463 = arith.addf %460, %462 : vector<2x256xf32>
    %464 = vector.broadcast %458 : vector<1x256xf32> to vector<2x256xf32>
    %465 = arith.mulf %464, %463 : vector<2x256xf32>
    %466 = arith.addf %453, %465 : vector<2x256xf32>
    %c34 = arith.constant 34 : index
    %467 = memref.load %arg5[%c34] : memref<98xf32, #tpu.memory_space<smem>>
    %c83 = arith.constant 83 : index
    %468 = memref.load %arg5[%c83] : memref<98xf32, #tpu.memory_space<smem>>
    %c237_i32 = arith.constant 237 : i32
    %469 = tpu.dynamic_rotate %24 by %c237_i32 dim 1 : vector<2x256xf32>, i32 -> vector<2x256xf32>
    %c237_i32_116 = arith.constant 237 : i32
    %470 = tpu.dynamic_rotate %25 by %c237_i32_116 dim 1 : vector<2x256xf32>, i32 -> vector<2x256xf32>
    %c34_117 = arith.constant 34 : index
    %c0_118 = arith.constant 0 : index
    %471 = vector.load %arg4[%c34_117, %c0_118] : memref<49x256xf32, #tpu.memory_space<vmem>>, vector<1x256xf32>
    %472 = vector.broadcast %467 : f32 to vector<2x256xf32>
    %473 = arith.mulf %472, %469 : vector<2x256xf32>
    %474 = vector.broadcast %468 : f32 to vector<2x256xf32>
    %475 = arith.mulf %474, %470 : vector<2x256xf32>
    %476 = arith.addf %473, %475 : vector<2x256xf32>
    %477 = vector.broadcast %471 : vector<1x256xf32> to vector<2x256xf32>
    %478 = arith.mulf %477, %476 : vector<2x256xf32>
    %479 = arith.addf %466, %478 : vector<2x256xf32>
    %c35 = arith.constant 35 : index
    %480 = memref.load %arg5[%c35] : memref<98xf32, #tpu.memory_space<smem>>
    %c84 = arith.constant 84 : index
    %481 = memref.load %arg5[%c84] : memref<98xf32, #tpu.memory_space<smem>>
    %c227_i32 = arith.constant 227 : i32
    %482 = tpu.dynamic_rotate %24 by %c227_i32 dim 1 : vector<2x256xf32>, i32 -> vector<2x256xf32>
    %c227_i32_119 = arith.constant 227 : i32
    %483 = tpu.dynamic_rotate %25 by %c227_i32_119 dim 1 : vector<2x256xf32>, i32 -> vector<2x256xf32>
    %c35_120 = arith.constant 35 : index
    %c0_121 = arith.constant 0 : index
    %484 = vector.load %arg4[%c35_120, %c0_121] : memref<49x256xf32, #tpu.memory_space<vmem>>, vector<1x256xf32>
    %485 = vector.broadcast %480 : f32 to vector<2x256xf32>
    %486 = arith.mulf %485, %482 : vector<2x256xf32>
    %487 = vector.broadcast %481 : f32 to vector<2x256xf32>
    %488 = arith.mulf %487, %483 : vector<2x256xf32>
    %489 = arith.addf %486, %488 : vector<2x256xf32>
    %490 = vector.broadcast %484 : vector<1x256xf32> to vector<2x256xf32>
    %491 = arith.mulf %490, %489 : vector<2x256xf32>
    %492 = arith.addf %479, %491 : vector<2x256xf32>
    %c36 = arith.constant 36 : index
    %493 = memref.load %arg5[%c36] : memref<98xf32, #tpu.memory_space<smem>>
    %c85 = arith.constant 85 : index
    %494 = memref.load %arg5[%c85] : memref<98xf32, #tpu.memory_space<smem>>
    %c226_i32 = arith.constant 226 : i32
    %495 = tpu.dynamic_rotate %24 by %c226_i32 dim 1 : vector<2x256xf32>, i32 -> vector<2x256xf32>
    %c226_i32_122 = arith.constant 226 : i32
    %496 = tpu.dynamic_rotate %25 by %c226_i32_122 dim 1 : vector<2x256xf32>, i32 -> vector<2x256xf32>
    %c36_123 = arith.constant 36 : index
    %c0_124 = arith.constant 0 : index
    %497 = vector.load %arg4[%c36_123, %c0_124] : memref<49x256xf32, #tpu.memory_space<vmem>>, vector<1x256xf32>
    %498 = vector.broadcast %493 : f32 to vector<2x256xf32>
    %499 = arith.mulf %498, %495 : vector<2x256xf32>
    %500 = vector.broadcast %494 : f32 to vector<2x256xf32>
    %501 = arith.mulf %500, %496 : vector<2x256xf32>
    %502 = arith.addf %499, %501 : vector<2x256xf32>
    %503 = vector.broadcast %497 : vector<1x256xf32> to vector<2x256xf32>
    %504 = arith.mulf %503, %502 : vector<2x256xf32>
    %505 = arith.addf %492, %504 : vector<2x256xf32>
    %c37 = arith.constant 37 : index
    %506 = memref.load %arg5[%c37] : memref<98xf32, #tpu.memory_space<smem>>
    %c86 = arith.constant 86 : index
    %507 = memref.load %arg5[%c86] : memref<98xf32, #tpu.memory_space<smem>>
    %c225_i32 = arith.constant 225 : i32
    %508 = tpu.dynamic_rotate %24 by %c225_i32 dim 1 : vector<2x256xf32>, i32 -> vector<2x256xf32>
    %c225_i32_125 = arith.constant 225 : i32
    %509 = tpu.dynamic_rotate %25 by %c225_i32_125 dim 1 : vector<2x256xf32>, i32 -> vector<2x256xf32>
    %c37_126 = arith.constant 37 : index
    %c0_127 = arith.constant 0 : index
    %510 = vector.load %arg4[%c37_126, %c0_127] : memref<49x256xf32, #tpu.memory_space<vmem>>, vector<1x256xf32>
    %511 = vector.broadcast %506 : f32 to vector<2x256xf32>
    %512 = arith.mulf %511, %508 : vector<2x256xf32>
    %513 = vector.broadcast %507 : f32 to vector<2x256xf32>
    %514 = arith.mulf %513, %509 : vector<2x256xf32>
    %515 = arith.addf %512, %514 : vector<2x256xf32>
    %516 = vector.broadcast %510 : vector<1x256xf32> to vector<2x256xf32>
    %517 = arith.mulf %516, %515 : vector<2x256xf32>
    %518 = arith.addf %505, %517 : vector<2x256xf32>
    %c38 = arith.constant 38 : index
    %519 = memref.load %arg5[%c38] : memref<98xf32, #tpu.memory_space<smem>>
    %c87 = arith.constant 87 : index
    %520 = memref.load %arg5[%c87] : memref<98xf32, #tpu.memory_space<smem>>
    %c224_i32 = arith.constant 224 : i32
    %521 = tpu.dynamic_rotate %24 by %c224_i32 dim 1 : vector<2x256xf32>, i32 -> vector<2x256xf32>
    %c224_i32_128 = arith.constant 224 : i32
    %522 = tpu.dynamic_rotate %25 by %c224_i32_128 dim 1 : vector<2x256xf32>, i32 -> vector<2x256xf32>
    %c38_129 = arith.constant 38 : index
    %c0_130 = arith.constant 0 : index
    %523 = vector.load %arg4[%c38_129, %c0_130] : memref<49x256xf32, #tpu.memory_space<vmem>>, vector<1x256xf32>
    %524 = vector.broadcast %519 : f32 to vector<2x256xf32>
    %525 = arith.mulf %524, %521 : vector<2x256xf32>
    %526 = vector.broadcast %520 : f32 to vector<2x256xf32>
    %527 = arith.mulf %526, %522 : vector<2x256xf32>
    %528 = arith.addf %525, %527 : vector<2x256xf32>
    %529 = vector.broadcast %523 : vector<1x256xf32> to vector<2x256xf32>
    %530 = arith.mulf %529, %528 : vector<2x256xf32>
    %531 = arith.addf %518, %530 : vector<2x256xf32>
    %c39 = arith.constant 39 : index
    %532 = memref.load %arg5[%c39] : memref<98xf32, #tpu.memory_space<smem>>
    %c88 = arith.constant 88 : index
    %533 = memref.load %arg5[%c88] : memref<98xf32, #tpu.memory_space<smem>>
    %c223_i32 = arith.constant 223 : i32
    %534 = tpu.dynamic_rotate %24 by %c223_i32 dim 1 : vector<2x256xf32>, i32 -> vector<2x256xf32>
    %c223_i32_131 = arith.constant 223 : i32
    %535 = tpu.dynamic_rotate %25 by %c223_i32_131 dim 1 : vector<2x256xf32>, i32 -> vector<2x256xf32>
    %c39_132 = arith.constant 39 : index
    %c0_133 = arith.constant 0 : index
    %536 = vector.load %arg4[%c39_132, %c0_133] : memref<49x256xf32, #tpu.memory_space<vmem>>, vector<1x256xf32>
    %537 = vector.broadcast %532 : f32 to vector<2x256xf32>
    %538 = arith.mulf %537, %534 : vector<2x256xf32>
    %539 = vector.broadcast %533 : f32 to vector<2x256xf32>
    %540 = arith.mulf %539, %535 : vector<2x256xf32>
    %541 = arith.addf %538, %540 : vector<2x256xf32>
    %542 = vector.broadcast %536 : vector<1x256xf32> to vector<2x256xf32>
    %543 = arith.mulf %542, %541 : vector<2x256xf32>
    %544 = arith.addf %531, %543 : vector<2x256xf32>
    %c40 = arith.constant 40 : index
    %545 = memref.load %arg5[%c40] : memref<98xf32, #tpu.memory_space<smem>>
    %c89 = arith.constant 89 : index
    %546 = memref.load %arg5[%c89] : memref<98xf32, #tpu.memory_space<smem>>
    %c222_i32 = arith.constant 222 : i32
    %547 = tpu.dynamic_rotate %24 by %c222_i32 dim 1 : vector<2x256xf32>, i32 -> vector<2x256xf32>
    %c222_i32_134 = arith.constant 222 : i32
    %548 = tpu.dynamic_rotate %25 by %c222_i32_134 dim 1 : vector<2x256xf32>, i32 -> vector<2x256xf32>
    %c40_135 = arith.constant 40 : index
    %c0_136 = arith.constant 0 : index
    %549 = vector.load %arg4[%c40_135, %c0_136] : memref<49x256xf32, #tpu.memory_space<vmem>>, vector<1x256xf32>
    %550 = vector.broadcast %545 : f32 to vector<2x256xf32>
    %551 = arith.mulf %550, %547 : vector<2x256xf32>
    %552 = vector.broadcast %546 : f32 to vector<2x256xf32>
    %553 = arith.mulf %552, %548 : vector<2x256xf32>
    %554 = arith.addf %551, %553 : vector<2x256xf32>
    %555 = vector.broadcast %549 : vector<1x256xf32> to vector<2x256xf32>
    %556 = arith.mulf %555, %554 : vector<2x256xf32>
    %557 = arith.addf %544, %556 : vector<2x256xf32>
    %c41 = arith.constant 41 : index
    %558 = memref.load %arg5[%c41] : memref<98xf32, #tpu.memory_space<smem>>
    %c90 = arith.constant 90 : index
    %559 = memref.load %arg5[%c90] : memref<98xf32, #tpu.memory_space<smem>>
    %c221_i32 = arith.constant 221 : i32
    %560 = tpu.dynamic_rotate %24 by %c221_i32 dim 1 : vector<2x256xf32>, i32 -> vector<2x256xf32>
    %c221_i32_137 = arith.constant 221 : i32
    %561 = tpu.dynamic_rotate %25 by %c221_i32_137 dim 1 : vector<2x256xf32>, i32 -> vector<2x256xf32>
    %c41_138 = arith.constant 41 : index
    %c0_139 = arith.constant 0 : index
    %562 = vector.load %arg4[%c41_138, %c0_139] : memref<49x256xf32, #tpu.memory_space<vmem>>, vector<1x256xf32>
    %563 = vector.broadcast %558 : f32 to vector<2x256xf32>
    %564 = arith.mulf %563, %560 : vector<2x256xf32>
    %565 = vector.broadcast %559 : f32 to vector<2x256xf32>
    %566 = arith.mulf %565, %561 : vector<2x256xf32>
    %567 = arith.addf %564, %566 : vector<2x256xf32>
    %568 = vector.broadcast %562 : vector<1x256xf32> to vector<2x256xf32>
    %569 = arith.mulf %568, %567 : vector<2x256xf32>
    %570 = arith.addf %557, %569 : vector<2x256xf32>
    %c42 = arith.constant 42 : index
    %571 = memref.load %arg5[%c42] : memref<98xf32, #tpu.memory_space<smem>>
    %c91 = arith.constant 91 : index
    %572 = memref.load %arg5[%c91] : memref<98xf32, #tpu.memory_space<smem>>
    %c211_i32 = arith.constant 211 : i32
    %573 = tpu.dynamic_rotate %24 by %c211_i32 dim 1 : vector<2x256xf32>, i32 -> vector<2x256xf32>
    %c211_i32_140 = arith.constant 211 : i32
    %574 = tpu.dynamic_rotate %25 by %c211_i32_140 dim 1 : vector<2x256xf32>, i32 -> vector<2x256xf32>
    %c42_141 = arith.constant 42 : index
    %c0_142 = arith.constant 0 : index
    %575 = vector.load %arg4[%c42_141, %c0_142] : memref<49x256xf32, #tpu.memory_space<vmem>>, vector<1x256xf32>
    %576 = vector.broadcast %571 : f32 to vector<2x256xf32>
    %577 = arith.mulf %576, %573 : vector<2x256xf32>
    %578 = vector.broadcast %572 : f32 to vector<2x256xf32>
    %579 = arith.mulf %578, %574 : vector<2x256xf32>
    %580 = arith.addf %577, %579 : vector<2x256xf32>
    %581 = vector.broadcast %575 : vector<1x256xf32> to vector<2x256xf32>
    %582 = arith.mulf %581, %580 : vector<2x256xf32>
    %583 = arith.addf %570, %582 : vector<2x256xf32>
    %c43 = arith.constant 43 : index
    %584 = memref.load %arg5[%c43] : memref<98xf32, #tpu.memory_space<smem>>
    %c92 = arith.constant 92 : index
    %585 = memref.load %arg5[%c92] : memref<98xf32, #tpu.memory_space<smem>>
    %c210_i32 = arith.constant 210 : i32
    %586 = tpu.dynamic_rotate %24 by %c210_i32 dim 1 : vector<2x256xf32>, i32 -> vector<2x256xf32>
    %c210_i32_143 = arith.constant 210 : i32
    %587 = tpu.dynamic_rotate %25 by %c210_i32_143 dim 1 : vector<2x256xf32>, i32 -> vector<2x256xf32>
    %c43_144 = arith.constant 43 : index
    %c0_145 = arith.constant 0 : index
    %588 = vector.load %arg4[%c43_144, %c0_145] : memref<49x256xf32, #tpu.memory_space<vmem>>, vector<1x256xf32>
    %589 = vector.broadcast %584 : f32 to vector<2x256xf32>
    %590 = arith.mulf %589, %586 : vector<2x256xf32>
    %591 = vector.broadcast %585 : f32 to vector<2x256xf32>
    %592 = arith.mulf %591, %587 : vector<2x256xf32>
    %593 = arith.addf %590, %592 : vector<2x256xf32>
    %594 = vector.broadcast %588 : vector<1x256xf32> to vector<2x256xf32>
    %595 = arith.mulf %594, %593 : vector<2x256xf32>
    %596 = arith.addf %583, %595 : vector<2x256xf32>
    %c44 = arith.constant 44 : index
    %597 = memref.load %arg5[%c44] : memref<98xf32, #tpu.memory_space<smem>>
    %c93 = arith.constant 93 : index
    %598 = memref.load %arg5[%c93] : memref<98xf32, #tpu.memory_space<smem>>
    %c209_i32 = arith.constant 209 : i32
    %599 = tpu.dynamic_rotate %24 by %c209_i32 dim 1 : vector<2x256xf32>, i32 -> vector<2x256xf32>
    %c209_i32_146 = arith.constant 209 : i32
    %600 = tpu.dynamic_rotate %25 by %c209_i32_146 dim 1 : vector<2x256xf32>, i32 -> vector<2x256xf32>
    %c44_147 = arith.constant 44 : index
    %c0_148 = arith.constant 0 : index
    %601 = vector.load %arg4[%c44_147, %c0_148] : memref<49x256xf32, #tpu.memory_space<vmem>>, vector<1x256xf32>
    %602 = vector.broadcast %597 : f32 to vector<2x256xf32>
    %603 = arith.mulf %602, %599 : vector<2x256xf32>
    %604 = vector.broadcast %598 : f32 to vector<2x256xf32>
    %605 = arith.mulf %604, %600 : vector<2x256xf32>
    %606 = arith.addf %603, %605 : vector<2x256xf32>
    %607 = vector.broadcast %601 : vector<1x256xf32> to vector<2x256xf32>
    %608 = arith.mulf %607, %606 : vector<2x256xf32>
    %609 = arith.addf %596, %608 : vector<2x256xf32>
    %c45 = arith.constant 45 : index
    %610 = memref.load %arg5[%c45] : memref<98xf32, #tpu.memory_space<smem>>
    %c94 = arith.constant 94 : index
    %611 = memref.load %arg5[%c94] : memref<98xf32, #tpu.memory_space<smem>>
    %c208_i32 = arith.constant 208 : i32
    %612 = tpu.dynamic_rotate %24 by %c208_i32 dim 1 : vector<2x256xf32>, i32 -> vector<2x256xf32>
    %c208_i32_149 = arith.constant 208 : i32
    %613 = tpu.dynamic_rotate %25 by %c208_i32_149 dim 1 : vector<2x256xf32>, i32 -> vector<2x256xf32>
    %c45_150 = arith.constant 45 : index
    %c0_151 = arith.constant 0 : index
    %614 = vector.load %arg4[%c45_150, %c0_151] : memref<49x256xf32, #tpu.memory_space<vmem>>, vector<1x256xf32>
    %615 = vector.broadcast %610 : f32 to vector<2x256xf32>
    %616 = arith.mulf %615, %612 : vector<2x256xf32>
    %617 = vector.broadcast %611 : f32 to vector<2x256xf32>
    %618 = arith.mulf %617, %613 : vector<2x256xf32>
    %619 = arith.addf %616, %618 : vector<2x256xf32>
    %620 = vector.broadcast %614 : vector<1x256xf32> to vector<2x256xf32>
    %621 = arith.mulf %620, %619 : vector<2x256xf32>
    %622 = arith.addf %609, %621 : vector<2x256xf32>
    %c46 = arith.constant 46 : index
    %623 = memref.load %arg5[%c46] : memref<98xf32, #tpu.memory_space<smem>>
    %c95 = arith.constant 95 : index
    %624 = memref.load %arg5[%c95] : memref<98xf32, #tpu.memory_space<smem>>
    %c207_i32 = arith.constant 207 : i32
    %625 = tpu.dynamic_rotate %24 by %c207_i32 dim 1 : vector<2x256xf32>, i32 -> vector<2x256xf32>
    %c207_i32_152 = arith.constant 207 : i32
    %626 = tpu.dynamic_rotate %25 by %c207_i32_152 dim 1 : vector<2x256xf32>, i32 -> vector<2x256xf32>
    %c46_153 = arith.constant 46 : index
    %c0_154 = arith.constant 0 : index
    %627 = vector.load %arg4[%c46_153, %c0_154] : memref<49x256xf32, #tpu.memory_space<vmem>>, vector<1x256xf32>
    %628 = vector.broadcast %623 : f32 to vector<2x256xf32>
    %629 = arith.mulf %628, %625 : vector<2x256xf32>
    %630 = vector.broadcast %624 : f32 to vector<2x256xf32>
    %631 = arith.mulf %630, %626 : vector<2x256xf32>
    %632 = arith.addf %629, %631 : vector<2x256xf32>
    %633 = vector.broadcast %627 : vector<1x256xf32> to vector<2x256xf32>
    %634 = arith.mulf %633, %632 : vector<2x256xf32>
    %635 = arith.addf %622, %634 : vector<2x256xf32>
    %c47 = arith.constant 47 : index
    %636 = memref.load %arg5[%c47] : memref<98xf32, #tpu.memory_space<smem>>
    %c96 = arith.constant 96 : index
    %637 = memref.load %arg5[%c96] : memref<98xf32, #tpu.memory_space<smem>>
    %c206_i32 = arith.constant 206 : i32
    %638 = tpu.dynamic_rotate %24 by %c206_i32 dim 1 : vector<2x256xf32>, i32 -> vector<2x256xf32>
    %c206_i32_155 = arith.constant 206 : i32
    %639 = tpu.dynamic_rotate %25 by %c206_i32_155 dim 1 : vector<2x256xf32>, i32 -> vector<2x256xf32>
    %c47_156 = arith.constant 47 : index
    %c0_157 = arith.constant 0 : index
    %640 = vector.load %arg4[%c47_156, %c0_157] : memref<49x256xf32, #tpu.memory_space<vmem>>, vector<1x256xf32>
    %641 = vector.broadcast %636 : f32 to vector<2x256xf32>
    %642 = arith.mulf %641, %638 : vector<2x256xf32>
    %643 = vector.broadcast %637 : f32 to vector<2x256xf32>
    %644 = arith.mulf %643, %639 : vector<2x256xf32>
    %645 = arith.addf %642, %644 : vector<2x256xf32>
    %646 = vector.broadcast %640 : vector<1x256xf32> to vector<2x256xf32>
    %647 = arith.mulf %646, %645 : vector<2x256xf32>
    %648 = arith.addf %635, %647 : vector<2x256xf32>
    %c48 = arith.constant 48 : index
    %649 = memref.load %arg5[%c48] : memref<98xf32, #tpu.memory_space<smem>>
    %c97 = arith.constant 97 : index
    %650 = memref.load %arg5[%c97] : memref<98xf32, #tpu.memory_space<smem>>
    %c205_i32 = arith.constant 205 : i32
    %651 = tpu.dynamic_rotate %24 by %c205_i32 dim 1 : vector<2x256xf32>, i32 -> vector<2x256xf32>
    %c205_i32_158 = arith.constant 205 : i32
    %652 = tpu.dynamic_rotate %25 by %c205_i32_158 dim 1 : vector<2x256xf32>, i32 -> vector<2x256xf32>
    %c48_159 = arith.constant 48 : index
    %c0_160 = arith.constant 0 : index
    %653 = vector.load %arg4[%c48_159, %c0_160] : memref<49x256xf32, #tpu.memory_space<vmem>>, vector<1x256xf32>
    %654 = vector.broadcast %649 : f32 to vector<2x256xf32>
    %655 = arith.mulf %654, %651 : vector<2x256xf32>
    %656 = vector.broadcast %650 : f32 to vector<2x256xf32>
    %657 = arith.mulf %656, %652 : vector<2x256xf32>
    %658 = arith.addf %655, %657 : vector<2x256xf32>
    %659 = vector.broadcast %653 : vector<1x256xf32> to vector<2x256xf32>
    %660 = arith.mulf %659, %658 : vector<2x256xf32>
    %661 = arith.addf %648, %660 : vector<2x256xf32>
    %cst_161 = arith.constant 0.000000e+00 : f32
    %662 = vector.broadcast %cst_161 : f32 to vector<2x256xf32>
    %663 = arith.cmpf ogt, %661, %662 : vector<2x256xf32>
    %cst_162 = arith.constant 1.000000e-01 : f32
    %664 = vector.broadcast %cst_162 : f32 to vector<2x256xf32>
    %665 = arith.mulf %664, %661 : vector<2x256xf32>
    %666 = arith.select %663, %661, %665 : vector<2x256xi1>, vector<2x256xf32>
    %667 = vector.shape_cast %666 : vector<2x256xf32> to vector<2x1x256xf32>
    %668 = vector.broadcast %667 : vector<2x1x256xf32> to vector<2x4x256xf32>
    %669 = arith.mulf %21, %668 : vector<2x4x256xf32>
    %c0_163 = arith.constant 0 : index
    %c0_164 = arith.constant 0 : index
    %c0_165 = arith.constant 0 : index
    %670 = vector.load %arg6[%c0_163, %c0_164, %c0_165] : memref<2x4x256xf32, #tpu.memory_space<vmem>>, vector<2x4x256xf32>
    tpu.vector_store %arg6[%c0_163, %c0_164, %c0_165], %669 {strides = array<i32>} : memref<2x4x256xf32, #tpu.memory_space<vmem>>, vector<2x4x256xf32>,
    return
  }
  func.func @transform_0(%arg0: i32) -> (i32, i32, i32) {
    %c0_i32 = arith.constant 0 : i32
    %c0_i32_0 = arith.constant 0 : i32
    %c0_i32_1 = arith.constant 0 : i32
    return %arg0, %c0_i32, %c0_i32_0 : i32, i32, i32
  }
  func.func @transform_1(%arg0: i32) -> (i32, i32) {
    %c0_i32 = arith.constant 0 : i32
    %c0_i32_0 = arith.constant 0 : i32
    %c0_i32_1 = arith.constant 0 : i32
    return %c0_i32, %c0_i32_0 : i32, i32
  }
  func.func @transform_2(%arg0: i32) -> (i32, i32) {
    %c0_i32 = arith.constant 0 : i32
    %c0_i32_0 = arith.constant 0 : i32
    %c0_i32_1 = arith.constant 0 : i32
    return %c0_i32, %c0_i32_0 : i32, i32
  }
  func.func @transform_3(%arg0: i32) -> (i32, i32) {
    %c0_i32 = arith.constant 0 : i32
    %c0_i32_0 = arith.constant 0 : i32
    %c0_i32_1 = arith.constant 0 : i32
    return %c0_i32, %c0_i32_0 : i32, i32
  }
  func.func @transform_4(%arg0: i32) -> i32 {
    %c0_i32 = arith.constant 0 : i32
    %c0_i32_0 = arith.constant 0 : i32
    return %c0_i32 : i32
  }
  func.func @transform_5(%arg0: i32) -> (i32, i32, i32) {
    %c0_i32 = arith.constant 0 : i32
    %c0_i32_0 = arith.constant 0 : i32
    %c0_i32_1 = arith.constant 0 : i32
    return %arg0, %c0_i32, %c0_i32_0 : i32, i32, i32
  }
}

</mosaic_0001>

<bundles_post_ra>
// kernel: tpu_custom_call.1
= control target key start
LH: loop header
LB: loop body
LE: loop exit
PB: predicated region body
PF: predicated region fallthrough
CT: control target
= control target key end

     0   :  { %s5955_s0 = inlined_call_operand.hbm [shape: f32[2,4,256], index: 0, kind: input, shape index: {}]   ;;  %s5956_s1 = inlined_call_operand.hbm [shape: f32[4,4], index: 1, kind: input, shape index: {}]   ;;  %s5957_s2 = inlined_call_operand.vmem [shape: f32[1,4], index: 2, kind: input, shape index: {}]   ;;  %s5958_s3 = inlined_call_operand.hbm [shape: f32[49,256], index: 3, kind: input, shape index: {}]   ;;  %s5959_s4 = inlined_call_operand.vmem [shape: f32[98], index: 4, kind: input, shape index: {}]   ;;  %s5960_s5 = inlined_call_operand.hbm [shape: f32[2,4,256], index: 5, kind: output, shape index: {}]  }
   0x1   :  { %6168 = sst [smem:[#allocation149_spill]] %s5960_s5 }
   0x2   :  { %10 = vsyncpa [#allocation3], 0 }
   0x3   :  { %11 = vsyncpa [#allocation7], 0 }
   0x4   :  { %12 = vsyncpa [#allocation5], 0 }
   0x5   :  { %13 = vsyncpa [#allocation4], 0  ;;  %s2548_s18 = smov [#allocation6]   ;;  %s2549_s20 = smov [#allocation2]  }
   0x6   :  { %s32_s19 = sshll.u32 %s2548_s18, 4  ;;  %s19_s21 = sshll.u32 %s2549_s20, 4  ;;  %s33_s19 = int_to_ptr.vmem [resolvable:$true] %s32_s19  ;;  %s2636_s21 = int_to_ptr.vmem [resolvable:$true] %s19_s21 }
   0x7   :  { %s2440_s24 = scalar_lea.hbm %s5956_s1, 64 }
   0x8   :  { %p2441_p0 = scmp.ne.s32.totalorder %s5956_s1, %s2440_s24  ;;  %p2444_p1 = scmp.lt.u32.totalorder %s2440_s24, %s5956_s1 }
   0xa   :  { %p2446_p2 = pnand %p2444_p1, %p2441_p0 }
   0xc   :  { %2449 = shalt.err (!%p2446_p2)
}
   0xd   :  { %s2450_s29 = scalar_lea.vmem %s33_s19, 64  ;;  %p2455_p4 = scmp.lt.s32.totalorder %s33_s19, %s33_s19 }
   0xe   :  { %p2451_p3 = scmp.ne.s32.totalorder %s33_s19, %s2450_s29  ;;  %p2456_p5 = scmp.lt.s32.totalorder %s2450_s29, %s2450_s29 }
  0x10   :  { %p2457_p6 = por %p2456_p5, %p2455_p4 }
  0x12   :  { %p2458_p7 = pnand %p2457_p6, %p2451_p3 }
  0x14   :  { %2461 = shalt.err (!%p2458_p7)
}
  0x15   :  { %35 = dma.hbm_to_vmem [thread:$0]  %s5956_s1, 64, %s33_s19, [#allocation7]  }
  0x16   :  { %s2462_s9 = scalar_lea.hbm %s5955_s0, 256 }
  0x17   :  { %p2463_p8 = scmp.ne.s32.totalorder %s5955_s0, %s2462_s9  ;;  %p2466_p9 = scmp.lt.u32.totalorder %s2462_s9, %s5955_s0 }
  0x19   :  { %p2468_p10 = pnand %p2466_p9, %p2463_p8 }
  0x1b   :  { %2471 = shalt.err (!%p2468_p10)
}
  0x1c   :  { %s2472_s14 = scalar_lea.vmem %s2636_s21, 256  ;;  %p2477_p12 = scmp.lt.s32.totalorder %s2636_s21, %s2636_s21 }
  0x1d   :  { %p2473_p11 = scmp.ne.s32.totalorder %s2636_s21, %s2472_s14  ;;  %p2478_p13 = scmp.lt.s32.totalorder %s2472_s14, %s2472_s14 }
  0x1f   :  { %p2479_p0 = por %p2478_p13, %p2477_p12 }
  0x21   :  { %p2480_p1 = pnand %p2479_p0, %p2473_p11 }
  0x23   :  { %2483 = shalt.err (!%p2480_p1)
}
  0x24   :  { %s5961_s1 = smov 128   ;;  %s5962_s15 = smov 8  }
  0x25   :  { %25 = dma.hbm_to_vmem [thread:$0]  %s5955_s0, 256, %s2636_s21, [#allocation3], %s5961_s1, %s5961_s1, %s5962_s15  }
  0x26   :  { %s2552_s18 = smov [#allocation8]   ;;  %s56_s23 = sshll.u32 %s5959_s4, 4  ;;  %s57_s23 = int_to_ptr.vmem [resolvable:$true] %s56_s23 }
  0x27   :  { %s43_s19 = sshll.u32 %s2552_s18, 4  ;;  %s2484_s26 = scalar_lea.hbm %s5958_s3, 1792  ;;  %s44_s19 = int_to_ptr.vmem [resolvable:$true] %s43_s19 }
  0x28   :  { %p2485_p2 = scmp.ne.s32.totalorder %s5958_s3, %s2484_s26  ;;  %p2488_p3 = scmp.lt.u32.totalorder %s2484_s26, %s5958_s3 }
  0x2a   :  { %p2490_p4 = pnand %p2488_p3, %p2485_p2 }
  0x2c   :  { %2493 = shalt.err (!%p2490_p4)
}
  0x2d   :  { %s2494_s0 = scalar_lea.vmem %s44_s19, 1792  ;;  %p2499_p6 = scmp.lt.s32.totalorder %s44_s19, %s44_s19 }
  0x2e   :  { %p2495_p5 = scmp.ne.s32.totalorder %s44_s19, %s2494_s0  ;;  %p2500_p7 = scmp.lt.s32.totalorder %s2494_s0, %s2494_s0 }
  0x30   :  { %p2501_p8 = por %p2500_p7, %p2499_p6 }
  0x32   :  { %p2502_p9 = pnand %p2501_p8, %p2495_p5 }
  0x34   :  { %2505 = shalt.err (!%p2502_p9)
}
  0x35   :  { %s2553_s4 = smov 256   ;;  %s2554_s21 = smov 16  }
  0x36   :  { %49 = dma.hbm_to_vmem [thread:$0]  %s5958_s3, 1792, %s44_s19, [#allocation7], %s2553_s4, %s2553_s4, %s2554_s21  }
  0x37   :  { %s2506_s8 = scalar_lea.vmem %s57_s23, 16  ;;  %p2511_p11 = scmp.lt.s32.totalorder %s57_s23, %s57_s23 }
  0x38   :  { %p2507_p10 = scmp.ne.s32.totalorder %s57_s23, %s2506_s8  ;;  %p2512_p12 = scmp.lt.s32.totalorder %s2506_s8, %s2506_s8 }
  0x3a   :  { %p2513_p13 = por %p2512_p12, %p2511_p11 }
  0x3c   :  { %p2514_p0 = pnand %p2513_p13, %p2507_p10 }
  0x3e   :  { %2517 = shalt.err (!%p2514_p0)
}
  0x3f   :  { %s2555_s9 = smov [#allocation9]  }
  0x40   :  { %59 = dma.vmem_to_smem %s57_s23, 16, %s2555_s9, [#allocation5]  }
  0x41   :  { %2540 = dma.done.wait [#allocation3], 256  }
  0x42   :  { %2541 = vsyncadd [#allocation3], 4294967040 }
  0x43   :  { %2542 = dma.done.wait [#allocation7], 1856  }
  0x44   :  { %2543 = vsyncadd [#allocation7], 4294965440 }
  0x45   :  { %2544 = dma.done.wait [#allocation5], 16  }
  0x46   :  { %2545 = vsyncadd [#allocation5], 4294967280 }
  0x47   :  { %72 = sfence }
  0x48   :  { %v73_v0 = vld [vmem:[#allocation2] sm:$0xff]  ;;  %vm81_vm0 = vcmask 1043456   ;;  %v2686_v1 = vld [vmem:[#allocation2 + $0x8] sm:$0xff]  ;;  %v95_v10 = vld [vmem:[#allocation6] sm:$0xf]  ;;  %vm98_vm1 = vcmask 27648   ;;  %v5975_v23 = vlaneseq }
  0x49   :  { %v77_v2 = vcombine.high %v73_v0, %v73_v0  ;;  %v82_v3 = vsel %vm81_vm0, %v73_v0, 0.0  ;;  %v78_v4 = vcombine.high %v2686_v1, %v2686_v1  ;;  %v87_v6 = vsel %vm81_vm0, %v2686_v1, 0.0  ;;  %v2282_v28 = vld [vmem:[%s5957_s2] ss:$0 sm:$0xff]  ;;  %s2330_s2 = sld [smem:[#allocation9 + $0x18]]  ;;  %s2331_s11 = sld [smem:[#allocation9 + $0x49]] }
  0x4a   :  { %v2699_v29 = vshrl.u32 %v5975_v23, 7  ;;  %v2556_v43 = vmov 839922192   ;;  %vm235_vm4 = vcmask 1041409   ;;  %s2557_s12 = smov 51   ;;  %s6020_s13 = smov 50  }
  0x4b   :  { %v83_v5 = vsel %vm81_vm0, %v77_v2, 0.0  ;;  %v88_v7 = vsel %vm81_vm0, %v78_v4, 0.0  ;;  %v145_v44 = vunpack.c.l.s4 %v2556_v43  ;;  %s2559_s14 = smov 49   ;;  %s2560_s16 = smov 48  }
  0x4c   :  { %v84_v8 = vadd.f32 %v83_v5, %v82_v3  ;;  %v89_v9 = vadd.f32 %v88_v7, %v87_v6  ;;  %6169 = vst [vmem:[#allocation15_spill] sm:$0xff] %v2699_v29  ;;  %v2702_v34 = vsub.s32 0, %v2699_v29  ;;  %s2561_s17 = smov 47   ;;  %s2562_s18 = smov 46  }
  0x4d   :  { %v146_v45 = vunpack.c.0.s8 %v145_v44  ;;  %s2563_s19 = smov 45   ;;  %s2564_s20 = smov 35  }
  0x4e   :  { %85 = vadd.xlane.f32.xlu0 %v84_v8  ;;  %s2565_s22 = smov 34   ;;  %s2566_s23 = smov 33  }
  0x4f   :  { %v149_v46 = vsub.s32 %v146_v45, %v2699_v29  ;;  %v2715_v57 = vstv %s2330_s2  ;;  %v2722_v2 = vstv %s2331_s11  ;;  %s2567_s24 = smov 32   ;;  %s2568_s25 = smov 31  }
  0x50   :  { %s2569_s26 = smov 30   ;;  %s2570_s27 = smov 29  }
  0x51   :  { %s2571_s28 = smov 19   ;;  %s2572_s29 = smov 18  }
  0x52   :  { %90 = vadd.xlane.f32.xlu0 %v89_v9  ;;  %s2573_s30 = smov 17   ;;  %s2574_s0 = smov 15  }
  0x53   :  { %s2575_s4 = smov 14   ;;  %s2576_s6 = smov 13  }
  0x54   :  { %s2577_s7 = smov 3   ;;  %s2578_s8 = smov 2  }
  0x55   :  { %s2579_s9 = smov 1   ;;  %s2580_s3 = smov 127  }
  0x56   :  { %s2581_s10 = smov 126   ;;  %s2582_s2 = smov 125  }
  0x57   :  { %s5963_s11 = smov 115   ;;  %s5965_s1 = smov 114  }
  0x58   :  { %s5967_s15 = smov 113   ;;  %s3310_s5 = sld [smem:[#allocation9 + $0x50]] }
  0xdb   :  { %v86_v11 = vpop.xlane.xlu0 %85 }
  0xdc   :  { %v93_v12 = vmul.f32 0.00390625, %v86_v11 }
  0xde   :  { %v96_v13 = vmul.f32 %v95_v10, %v93_v12 }
  0xdf   :  { %v91_v14 = vpop.xlane.xlu0 %90 }
  0xe0   :  { %v99_v15 = vsel %vm98_vm1, %v96_v13, 0.0  ;;  %v94_v16 = vmul.f32 0.00390625, %v91_v14 }
  0xe1   :  { %v100_v17 = vrot.slane %v99_v15, 4 }
  0xe2   :  { %v97_v18 = vmul.f32 %v95_v10, %v94_v16 }
  0xe3   :  { %v101_v19 = vadd.f32 %v100_v17, %v99_v15 }
  0xe4   :  { %v106_v20 = vsel %vm98_vm1, %v97_v18, 0.0 }
  0xe5   :  { %v102_v21 = vrot.slane %v101_v19, 2  ;;  %v107_v22 = vrot.slane %v106_v20, 4 }
  0xe7   :  { %v103_v24 = vadd.f32 %v102_v21, %v101_v19  ;;  %v108_v25 = vadd.f32 %v107_v22, %v106_v20 }
  0xe9   :  { %v109_v26 = vrot.slane %v108_v25, 2  ;;  %v104_v27 = vrot.slane %v103_v24, 1 }
  0xeb   :  { %v110_v30 = vadd.f32 %v109_v26, %v108_v25  ;;  %v105_v31 = vadd.f32 %v104_v27, %v103_v24 }
  0xed   :  { %v111_v32 = vrot.slane %v110_v30, 1  ;;  %v120_v33 = vadd.f32 %v2282_v28, %v105_v31 }
  0xef   :  { %vm122_vm2 = vcmp.gt.f32.partialorder %v120_v33, 0.0  ;;  %v124_v35 = vmul.f32 0.1, %v120_v33  ;;  %v112_v36 = vadd.f32 %v111_v32, %v110_v30 }
  0xf1   :  { %v126_v37 = vsel %vm122_vm2, %v120_v33, %v124_v35  ;;  %v121_v38 = vadd.f32 %v2282_v28, %v112_v36 }
  0xf2   :  { %v131_v39 = vrot.slane %v126_v37, %v2702_v34 }
  0xf3   :  { %vm123_vm3 = vcmp.gt.f32.partialorder %v121_v38, 0.0  ;;  %v125_v40 = vmul.f32 0.1, %v121_v38 }
  0xf4   :  { %133 = vbcast.lane.b32.xlu1 %v131_v39, 256 }
  0xf5   :  { %v127_v41 = vsel %vm123_vm3, %v121_v38, %v125_v40 }
  0xf6   :  { %v138_v42 = vrot.slane %v127_v41, %v2702_v34 }
  0xf8   :  { %140 = vbcast.lane.b32.xlu1 %v138_v42, 256 }
 0x166   :  { %v134_v47 = vpop.permute.xlu1 %133 }
 0x167   :  { %v150_v48 = vrot.slane %v134_v47, %v149_v46 }
 0x169   :  { %v2707_v49 = vmul.f32 %v150_v48, %v73_v0 }
 0x16a   :  { %v141_v50 = vpop.permute.xlu1 %140 }
 0x16b   :  { %6170 = vst [vmem:[#allocation16_spill] sm:$0xff] %v2707_v49  ;;  %v164_v51 = vcombine.high %v2707_v49, %v2707_v49  ;;  %v168_v52 = vsel %vm81_vm0, %v2707_v49, 0.0  ;;  %v201_v53 = vsel %vm81_vm0, %v2707_v49, -inf  ;;  %v157_v54 = vrot.slane %v141_v50, %v149_v46 }
 0x16c   :  { %v169_v55 = vrot.slane %v168_v52, 4  ;;  %v202_v56 = vrot.slane %v201_v53, 4 }
 0x16d   :  { %v175_v58 = vsel %vm81_vm0, %v164_v51, 0.0  ;;  %v208_v59 = vsel %vm81_vm0, %v164_v51, -inf  ;;  %v2720_v60 = vmul.f32 %v157_v54, %v2686_v1 }
 0x16e   :  { %v170_v61 = vadd.f32 %v169_v55, %v168_v52  ;;  %v176_v62 = vrot.slane %v175_v58, 4  ;;  %v203_v63 = vmax.f32 %v201_v53, %v202_v56  ;;  %v209_v0 = vrot.slane %v208_v59, 4 }
 0x16f   :  { %6171 = vst [vmem:[#allocation17_spill] sm:$0xff] %v2720_v60  ;;  %v165_v3 = vcombine.high %v2720_v60, %v2720_v60  ;;  %v182_v4 = vsel %vm81_vm0, %v2720_v60, 0.0  ;;  %v215_v5 = vsel %vm81_vm0, %v2720_v60, -inf }
 0x170   :  { %v171_v6 = vrot.slane %v170_v61, 2  ;;  %v177_v7 = vadd.f32 %v176_v62, %v175_v58  ;;  %v204_v8 = vrot.slane %v203_v63, 2  ;;  %v210_v1 = vmax.f32 %v208_v59, %v209_v0 }
 0x171   :  { %v183_v9 = vrot.slane %v182_v4, 4  ;;  %v189_v10 = vsel %vm81_vm0, %v165_v3, 0.0  ;;  %v216_v11 = vrot.slane %v215_v5, 4  ;;  %v222_v12 = vsel %vm81_vm0, %v165_v3, -inf }
 0x172   :  { %v172_v13 = vadd.f32 %v171_v6, %v170_v61  ;;  %v178_v14 = vrot.slane %v177_v7, 2  ;;  %v205_v15 = vmax.f32 %v203_v63, %v204_v8  ;;  %v211_v16 = vrot.slane %v210_v1, 2 }
 0x173   :  { %v184_v17 = vadd.f32 %v183_v9, %v182_v4  ;;  %v190_v18 = vrot.slane %v189_v10, 4  ;;  %v217_v19 = vmax.f32 %v215_v5, %v216_v11  ;;  %v223_v20 = vrot.slane %v222_v12, 4 }
 0x174   :  { %v173_v21 = vrot.slane %v172_v13, 1  ;;  %v179_v22 = vadd.f32 %v178_v14, %v177_v7  ;;  %v206_v24 = vrot.slane %v205_v15, 1  ;;  %v212_v25 = vmax.f32 %v210_v1, %v211_v16 }
 0x175   :  { %v185_v26 = vrot.slane %v184_v17, 2  ;;  %v191_v27 = vadd.f32 %v190_v18, %v189_v10  ;;  %v218_v28 = vrot.slane %v217_v19, 2  ;;  %v224_v30 = vmax.f32 %v222_v12, %v223_v20 }
 0x176   :  { %v174_v31 = vadd.f32 %v173_v21, %v172_v13  ;;  %v180_v32 = vrot.slane %v179_v22, 1  ;;  %v207_v33 = vmax.f32 %v205_v15, %v206_v24  ;;  %v213_v35 = vrot.slane %v212_v25, 1 }
 0x177   :  { %v186_v36 = vadd.f32 %v185_v26, %v184_v17  ;;  %v192_v37 = vrot.slane %v191_v27, 2  ;;  %v219_v38 = vmax.f32 %v217_v19, %v218_v28  ;;  %v225_v39 = vrot.slane %v224_v30, 2 }
 0x178   :  { %v181_v40 = vadd.f32 %v180_v32, %v179_v22  ;;  %v197_v41 = vmul.f32 0.25, %v174_v31  ;;  %v214_v42 = vmax.f32 %v212_v25, %v213_v35  ;;  %v1217_v50 = vmul.f32 %v2722_v2, %v207_v33 }
 0x179   :  { %v187_v43 = vrot.slane %v186_v36, 1  ;;  %v193_v44 = vadd.f32 %v192_v37, %v191_v27  ;;  %v220_v45 = vrot.slane %v219_v38, 1  ;;  %v226_v46 = vmax.f32 %v224_v30, %v225_v39 }
 0x17a   :  { %v198_v47 = vmul.f32 0.25, %v181_v40  ;;  %v1212_v48 = vmul.f32 %v2715_v57, %v197_v41  ;;  %v1218_v56 = vmul.f32 %v2722_v2, %v214_v42 }
 0x17b   :  { %v188_v51 = vadd.f32 %v187_v43, %v186_v36  ;;  %v194_v52 = vrot.slane %v193_v44, 1  ;;  %v221_v53 = vmax.f32 %v219_v38, %v220_v45  ;;  %v227_v54 = vrot.slane %v226_v46, 1 }
 0x17c   :  { %v1213_v55 = vmul.f32 %v2715_v57, %v198_v47  ;;  %v1221_v58 = vadd.f32 %v1217_v50, %v1212_v48 }
 0x17d   :  { %v195_v59 = vadd.f32 %v194_v52, %v193_v44  ;;  %v199_v61 = vmul.f32 0.25, %v188_v51  ;;  %v228_v62 = vmax.f32 %v226_v46, %v227_v54  ;;  %v2737_v63 = vsel %vm235_vm4, %v221_v53, %v207_v33 }
 0x17e   :  { %v1222_v0 = vadd.f32 %v1218_v56, %v1213_v55  ;;  %257 = vrot.lane.b32.xlu1 %v2737_v63, %s2557_s12  ;;  %v1219_v6 = vmul.f32 %v2722_v2, %v221_v53 }
 0x17f   :  { %v200_v3 = vmul.f32 0.25, %v195_v59  ;;  %v2742_v4 = vsel %vm235_vm4, %v199_v61, %v197_v41  ;;  %v1214_v5 = vmul.f32 %v2715_v57, %v199_v61  ;;  %v1220_v1 = vmul.f32 %v2722_v2, %v228_v62 }
 0x180   :  { %240 = vrot.lane.b32.xlu0 %v2742_v4, %s2557_s12  ;;  %v2756_v10 = vsel %vm235_vm4, %v228_v62, %v214_v42 }
 0x181   :  { %v2749_v7 = vsel %vm235_vm4, %v200_v3, %v198_v47  ;;  %v1215_v8 = vmul.f32 %v2715_v57, %v200_v3  ;;  %v1223_v9 = vadd.f32 %v1219_v6, %v1214_v5 }
 0x182   :  { %296 = vrot.lane.b32.xlu1 %v2737_v63, %s6020_s13 }
 0x183   :  { %v1224_v11 = vadd.f32 %v1220_v1, %v1215_v8  ;;  %v2759_v12 = vsel %vm235_vm4, %v1223_v9, %v1221_v58 }
 0x184   :  { %298 = vrot.lane.b32.xlu0 %v2756_v10, %s6020_s13 }
 0x185   :  { %v2764_v13 = vsel %vm235_vm4, %v1224_v11, %v1222_v0 }
 0x186   :  { %336 = vrot.lane.b32.xlu1 %v2737_v63, %s2559_s14 }
 0x188   :  { %338 = vrot.lane.b32.xlu0 %v2756_v10, %s2559_s14 }
 0x18a   :  { %376 = vrot.lane.b32.xlu1 %v2737_v63, %s2560_s16 }
 0x18c   :  { %378 = vrot.lane.b32.xlu0 %v2756_v10, %s2560_s16 }
 0x18e   :  { %416 = vrot.lane.b32.xlu1 %v2737_v63, %s2561_s17 }
 0x190   :  { %418 = vrot.lane.b32.xlu0 %v2756_v10, %s2561_s17 }
 0x192   :  { %456 = vrot.lane.b32.xlu1 %v2737_v63, %s2562_s18 }
 0x194   :  { %458 = vrot.lane.b32.xlu0 %v2756_v10, %s2562_s18 }
 0x196   :  { %496 = vrot.lane.b32.xlu1 %v2737_v63, %s2563_s19 }
 0x198   :  { %498 = vrot.lane.b32.xlu0 %v2756_v10, %s2563_s19 }
 0x19a   :  { %536 = vrot.lane.b32.xlu1 %v2737_v63, %s2564_s20 }
 0x19c   :  { %538 = vrot.lane.b32.xlu0 %v2756_v10, %s2564_s20 }
 0x19e   :  { %576 = vrot.lane.b32.xlu1 %v2737_v63, %s2565_s22 }
 0x1a0   :  { %578 = vrot.lane.b32.xlu0 %v2756_v10, %s2565_s22 }
 0x1a2   :  { %616 = vrot.lane.b32.xlu1 %v2737_v63, %s2566_s23 }
 0x1a4   :  { %618 = vrot.lane.b32.xlu0 %v2756_v10, %s2566_s23 }
 0x1a6   :  { %656 = vrot.lane.b32.xlu1 %v2737_v63, %s2567_s24 }
 0x1a8   :  { %658 = vrot.lane.b32.xlu0 %v2756_v10, %s2567_s24 }
 0x1aa   :  { %696 = vrot.lane.b32.xlu1 %v2737_v63, %s2568_s25 }
 0x1ac   :  { %698 = vrot.lane.b32.xlu0 %v2756_v10, %s2568_s25 }
 0x1ae   :  { %736 = vrot.lane.b32.xlu1 %v2737_v63, %s2569_s26 }
 0x1b0   :  { %738 = vrot.lane.b32.xlu0 %v2756_v10, %s2569_s26 }
 0x1b2   :  { %776 = vrot.lane.b32.xlu1 %v2737_v63, %s2570_s27 }
 0x1b4   :  { %778 = vrot.lane.b32.xlu0 %v2756_v10, %s2570_s27 }
 0x1b6   :  { %816 = vrot.lane.b32.xlu1 %v2737_v63, %s2571_s28 }
 0x1b8   :  { %818 = vrot.lane.b32.xlu0 %v2756_v10, %s2571_s28 }
 0x1ba   :  { %856 = vrot.lane.b32.xlu1 %v2737_v63, %s2572_s29 }
 0x1bc   :  { %858 = vrot.lane.b32.xlu0 %v2756_v10, %s2572_s29 }
 0x1be   :  { %896 = vrot.lane.b32.xlu1 %v2737_v63, %s2573_s30 }
 0x1c0   :  { %898 = vrot.lane.b32.xlu0 %v2756_v10, %s2573_s30 }
 0x1c2   :  { %936 = vrot.lane.b32.xlu1 %v2737_v63, %s2554_s21 }
 0x1c4   :  { %938 = vrot.lane.b32.xlu0 %v2756_v10, %s2554_s21 }
 0x1c6   :  { %976 = vrot.lane.b32.xlu1 %v2737_v63, %s2574_s0 }
 0x1c8   :  { %978 = vrot.lane.b32.xlu0 %v2756_v10, %s2574_s0 }
 0x1ca   :  { %1016 = vrot.lane.b32.xlu1 %v2737_v63, %s2575_s4 }
 0x1cc   :  { %1018 = vrot.lane.b32.xlu0 %v2756_v10, %s2575_s4 }
 0x1ce   :  { %1056 = vrot.lane.b32.xlu1 %v2737_v63, %s2576_s6 }
 0x1d0   :  { %1058 = vrot.lane.b32.xlu0 %v2756_v10, %s2576_s6 }
 0x1d2   :  { %1096 = vrot.lane.b32.xlu1 %v2737_v63, %s2577_s7 }
 0x1d4   :  { %1098 = vrot.lane.b32.xlu0 %v2756_v10, %s2577_s7 }
 0x1d6   :  { %1136 = vrot.lane.b32.xlu1 %v2737_v63, %s2578_s8 }
 0x1d8   :  { %1138 = vrot.lane.b32.xlu0 %v2756_v10, %s2578_s8 }
 0x1da   :  { %1176 = vrot.lane.b32.xlu1 %v2737_v63, %s2579_s9 }
 0x1dc   :  { %1178 = vrot.lane.b32.xlu0 %v2756_v10, %s2579_s9 }
 0x1de   :  { %1257 = vrot.lane.b32.xlu1 %v2737_v63, %s2580_s3 }
 0x1e0   :  { %1259 = vrot.lane.b32.xlu0 %v2756_v10, %s2580_s3 }
 0x1e2   :  { %1297 = vrot.lane.b32.xlu1 %v2737_v63, %s2581_s10 }
 0x1e4   :  { %1299 = vrot.lane.b32.xlu0 %v2756_v10, %s2581_s10 }
 0x1e6   :  { %1337 = vrot.lane.b32.xlu1 %v2737_v63, %s2582_s2 }
 0x1e8   :  { %1339 = vrot.lane.b32.xlu0 %v2756_v10, %s2582_s2 }
 0x1ea   :  { %1377 = vrot.lane.b32.xlu1 %v2737_v63, %s5963_s11 }
 0x1ec   :  { %1379 = vrot.lane.b32.xlu0 %v2756_v10, %s5963_s11  ;;  %s5969_s11 = smov 112  }
 0x1ee   :  { %1417 = vrot.lane.b32.xlu1 %v2737_v63, %s5965_s1 }
 0x1f0   :  { %v2872_v57 = vpop.permute.xlu1 %257  ;;  %1419 = vrot.lane.b32.xlu0 %v2756_v10, %s5965_s1  ;;  %s5971_s1 = smov 111  }
 0x1f1   :  { %6172 = vst [vmem:[#allocation18_spill] sm:$0xff] %v2872_v57 }
 0x1f2   :  { %1457 = vrot.lane.b32.xlu1 %v2737_v63, %s5967_s15  ;;  %v2878_v2 = vpop.permute.xlu0 %240 }
 0x1f3   :  { %6173 = vst [vmem:[#allocation19_spill] sm:$0xff] %v2878_v2 }
 0x1f4   :  { %v2880_v14 = vpop.permute.xlu1 %296  ;;  %1459 = vrot.lane.b32.xlu0 %v2756_v10, %s5967_s15  ;;  %s5973_s15 = smov 110  }
 0x1f6   :  { %1497 = vrot.lane.b32.xlu1 %v2737_v63, %s5969_s11  ;;  %v2886_v15 = vpop.permute.xlu0 %298 }
 0x1f8   :  { %v2888_v16 = vpop.permute.xlu1 %336  ;;  %1499 = vrot.lane.b32.xlu0 %v2756_v10, %s5969_s11  ;;  %s2589_s11 = smov 109  }
 0x1fa   :  { %1537 = vrot.lane.b32.xlu1 %v2737_v63, %s5971_s1  ;;  %v2894_v17 = vpop.permute.xlu0 %338 }
 0x1fc   :  { %v2896_v18 = vpop.permute.xlu1 %376  ;;  %1539 = vrot.lane.b32.xlu0 %v2756_v10, %s5971_s1  ;;  %s2590_s1 = smov 99  }
 0x1fe   :  { %1577 = vrot.lane.b32.xlu1 %v2737_v63, %s5973_s15  ;;  %v2902_v19 = vpop.permute.xlu0 %378 }
 0x200   :  { %v2904_v20 = vpop.permute.xlu1 %416  ;;  %1579 = vrot.lane.b32.xlu0 %v2756_v10, %s5973_s15  ;;  %s2591_s15 = smov 98  }
 0x202   :  { %1617 = vrot.lane.b32.xlu1 %v2737_v63, %s2589_s11  ;;  %v2910_v21 = vpop.permute.xlu0 %418 }
 0x204   :  { %v2912_v22 = vpop.permute.xlu1 %456  ;;  %1619 = vrot.lane.b32.xlu0 %v2756_v10, %s2589_s11 }
 0x206   :  { %1657 = vrot.lane.b32.xlu1 %v2737_v63, %s2590_s1  ;;  %v2918_v24 = vpop.permute.xlu0 %458 }
 0x208   :  { %v2920_v25 = vpop.permute.xlu1 %496  ;;  %1659 = vrot.lane.b32.xlu0 %v2756_v10, %s2590_s1 }
 0x20a   :  { %1697 = vrot.lane.b32.xlu1 %v2737_v63, %s2591_s15  ;;  %v2926_v26 = vpop.permute.xlu0 %498 }
 0x20c   :  { %v2928_v27 = vpop.permute.xlu1 %536  ;;  %1699 = vrot.lane.b32.xlu0 %v2756_v10, %s2591_s15 }
 0x20e   :  { %v2932_v28 = vpop.permute.xlu0 %538  ;;  %259 = vrot.lane.b32.xlu1 %v2756_v10, %s2557_s12 }
 0x210   :  { %v2936_v30 = vpop.permute.xlu1 %576  ;;  %331 = vrot.lane.b32.xlu0 %v2749_v7, %s2559_s14 }
 0x212   :  { %v2940_v31 = vpop.permute.xlu0 %578  ;;  %289 = vrot.lane.b32.xlu1 %v2742_v4, %s6020_s13  ;;  %s3308_s13 = sld [smem:[#allocation9 + $0x4f]] }
 0x214   :  { %v2944_v32 = vpop.permute.xlu1 %616  ;;  %371 = vrot.lane.b32.xlu0 %v2749_v7, %s2560_s16 }
 0x216   :  { %v2948_v33 = vpop.permute.xlu0 %618  ;;  %329 = vrot.lane.b32.xlu1 %v2742_v4, %s2559_s14  ;;  %s6194_s14 = smov 114  }
 0x218   :  { %v2952_v35 = vpop.permute.xlu1 %656  ;;  %411 = vrot.lane.b32.xlu0 %v2749_v7, %s2561_s17 }
 0x21a   :  { %v2956_v36 = vpop.permute.xlu0 %658  ;;  %369 = vrot.lane.b32.xlu1 %v2742_v4, %s2560_s16  ;;  %s6197_s16 = smov 113  }
 0x21c   :  { %v2960_v37 = vpop.permute.xlu1 %696  ;;  %451 = vrot.lane.b32.xlu0 %v2749_v7, %s2562_s18 }
 0x21e   :  { %v2964_v38 = vpop.permute.xlu0 %698  ;;  %409 = vrot.lane.b32.xlu1 %v2742_v4, %s2561_s17  ;;  %s6200_s17 = smov 112  }
 0x220   :  { %v2968_v39 = vpop.permute.xlu1 %736  ;;  %491 = vrot.lane.b32.xlu0 %v2749_v7, %s2563_s19 }
 0x222   :  { %v2972_v40 = vpop.permute.xlu0 %738  ;;  %449 = vrot.lane.b32.xlu1 %v2742_v4, %s2562_s18  ;;  %s6203_s18 = smov 111  }
 0x224   :  { %v2976_v41 = vpop.permute.xlu1 %776  ;;  %531 = vrot.lane.b32.xlu0 %v2749_v7, %s2564_s20 }
 0x226   :  { %v2980_v42 = vpop.permute.xlu0 %778  ;;  %489 = vrot.lane.b32.xlu1 %v2742_v4, %s2563_s19  ;;  %s6206_s19 = smov 110  }
 0x228   :  { %v2984_v43 = vpop.permute.xlu1 %816  ;;  %571 = vrot.lane.b32.xlu0 %v2749_v7, %s2565_s22 }
 0x22a   :  { %v2988_v44 = vpop.permute.xlu0 %818  ;;  %529 = vrot.lane.b32.xlu1 %v2742_v4, %s2564_s20  ;;  %s3196_s20 = sld [smem:[#allocation9 + $0x32]] }
 0x22c   :  { %v2992_v45 = vpop.permute.xlu1 %856  ;;  %611 = vrot.lane.b32.xlu0 %v2749_v7, %s2566_s23 }
 0x22e   :  { %v2996_v46 = vpop.permute.xlu0 %858  ;;  %569 = vrot.lane.b32.xlu1 %v2742_v4, %s2565_s22  ;;  %s3198_s22 = sld [smem:[#allocation9 + $0x33]] }
 0x230   :  { %v3000_v47 = vpop.permute.xlu1 %896  ;;  %651 = vrot.lane.b32.xlu0 %v2749_v7, %s2567_s24 }
 0x232   :  { %v3004_v48 = vpop.permute.xlu0 %898  ;;  %609 = vrot.lane.b32.xlu1 %v2742_v4, %s2566_s23  ;;  %s3204_s23 = sld [smem:[#allocation9 + $0x34]] }
 0x234   :  { %v3008_v50 = vpop.permute.xlu1 %936  ;;  %691 = vrot.lane.b32.xlu0 %v2749_v7, %s2568_s25 }
 0x236   :  { %v3012_v51 = vpop.permute.xlu0 %938  ;;  %649 = vrot.lane.b32.xlu1 %v2742_v4, %s2567_s24  ;;  %s3206_s24 = sld [smem:[#allocation9 + $0x35]] }
 0x238   :  { %v3016_v52 = vpop.permute.xlu1 %976  ;;  %731 = vrot.lane.b32.xlu0 %v2749_v7, %s2569_s26  ;;  %6212 = sst [smem:[#allocation52_spill]] %s3204_s23  ;;  %s3318_s23 = sld [smem:[#allocation9 + $0x52]] }
 0x23a   :  { %v3020_v53 = vpop.permute.xlu0 %978  ;;  %689 = vrot.lane.b32.xlu1 %v2742_v4, %s2568_s25  ;;  %s3208_s25 = sld [smem:[#allocation9 + $0x36]] }
 0x23c   :  { %v3024_v54 = vpop.permute.xlu1 %1016  ;;  %771 = vrot.lane.b32.xlu0 %v2749_v7, %s2570_s27 }
 0x23e   :  { %v3028_v55 = vpop.permute.xlu0 %1018  ;;  %729 = vrot.lane.b32.xlu1 %v2742_v4, %s2569_s26  ;;  %s3210_s26 = sld [smem:[#allocation9 + $0x37]]  ;;  %6232 = sst [smem:[#allocation71_spill]] %s3318_s23 }
 0x23f   :  { %s3421_s23 = sld [smem:[#allocation9 + $0x4]] }
 0x240   :  { %v3032_v56 = vpop.permute.xlu1 %1056  ;;  %811 = vrot.lane.b32.xlu0 %v2749_v7, %s2571_s28 }
 0x242   :  { %v3036_v58 = vpop.permute.xlu0 %1058  ;;  %769 = vrot.lane.b32.xlu1 %v2742_v4, %s2570_s27  ;;  %s3216_s27 = sld [smem:[#allocation9 + $0x38]] }
 0x244   :  { %v3040_v59 = vpop.permute.xlu1 %1096  ;;  %851 = vrot.lane.b32.xlu0 %v2749_v7, %s2572_s29  ;;  %6213 = sst [smem:[#allocation53_spill]] %s3210_s26  ;;  %s6234_s26 = smov 50  }
 0x246   :  { %v3044_v61 = vpop.permute.xlu0 %1098  ;;  %809 = vrot.lane.b32.xlu1 %v2742_v4, %s2571_s28  ;;  %s3218_s28 = sld [smem:[#allocation9 + $0x39]] }
 0x248   :  { %v3048_v62 = vpop.permute.xlu1 %1136  ;;  %891 = vrot.lane.b32.xlu0 %v2749_v7, %s2573_s30 }
 0x24a   :  { %v3052_v0 = vpop.permute.xlu0 %1138  ;;  %849 = vrot.lane.b32.xlu1 %v2742_v4, %s2572_s29  ;;  %s3220_s29 = sld [smem:[#allocation9 + $0x3a]] }
 0x24c   :  { %v3056_v3 = vpop.permute.xlu1 %1176  ;;  %931 = vrot.lane.b32.xlu0 %v2749_v7, %s2554_s21  ;;  %6215 = sst [smem:[#allocation55_spill]] %s3218_s28  ;;  %s3335_s28 = sld [smem:[#allocation9 + $0x54]] }
 0x24e   :  { %v3060_v5 = vpop.permute.xlu0 %1178  ;;  %889 = vrot.lane.b32.xlu1 %v2742_v4, %s2573_s30  ;;  %s3226_s30 = sld [smem:[#allocation9 + $0x3b]] }
 0x250   :  { %v3064_v6 = vpop.permute.xlu1 %1257  ;;  %971 = vrot.lane.b32.xlu0 %v2749_v7, %s2574_s0  ;;  %6216 = sst [smem:[#allocation56_spill]] %s3220_s29 }
 0x251   :  { %s3329_s29 = sld [smem:[#allocation9 + $0x53]] }
 0x252   :  { %v3068_v8 = vpop.permute.xlu0 %1259  ;;  %929 = vrot.lane.b32.xlu1 %v2742_v4, %s2554_s21  ;;  %s6191_s21 = smov 115  }
 0x254   :  { %v3072_v1 = vpop.permute.xlu1 %1297  ;;  %1011 = vrot.lane.b32.xlu0 %v2749_v7, %s2575_s4 }
 0x255   :  { %6174 = vst [vmem:[#allocation20_spill] sm:$0xff] %v3072_v1 }
 0x256   :  { %v3076_v9 = vpop.permute.xlu0 %1299  ;;  %969 = vrot.lane.b32.xlu1 %v2742_v4, %s2574_s0  ;;  %s3228_s0 = sld [smem:[#allocation9 + $0x3c]] }
 0x257   :  { %6175 = vst [vmem:[#allocation21_spill] sm:$0xff] %v3076_v9  ;;  %v6246_v9 = vstv %s3198_s22  ;;  %s3471_s22 = sld [smem:[#allocation9 + $0x5]] }
 0x258   :  { %v3080_v11 = vpop.permute.xlu1 %1337  ;;  %1051 = vrot.lane.b32.xlu0 %v2749_v7, %s2576_s6 }
 0x259   :  { %6176 = vst [vmem:[#allocation22_spill] sm:$0xff] %v3080_v11 }
 0x25a   :  { %v3084_v23 = vpop.permute.xlu0 %1339  ;;  %1009 = vrot.lane.b32.xlu1 %v2742_v4, %s2575_s4  ;;  %s3230_s4 = sld [smem:[#allocation9 + $0x3d]] }
 0x25b   :  { %6177 = vst [vmem:[#allocation23_spill] sm:$0xff] %v3084_v23 }
 0x25c   :  { %v3088_v60 = vpop.permute.xlu1 %1377  ;;  %1091 = vrot.lane.b32.xlu0 %v2749_v7, %s2577_s7 }
 0x25d   :  { %6178 = vst [vmem:[#allocation24_spill] sm:$0xff] %v3088_v60 }
 0x25e   :  { %v3092_v49 = vpop.permute.xlu0 %1379  ;;  %1049 = vrot.lane.b32.xlu1 %v2742_v4, %s2576_s6  ;;  %s3232_s6 = sld [smem:[#allocation9 + $0x3e]] }
 0x25f   :  { %6179 = vst [vmem:[#allocation25_spill] sm:$0xff] %v3092_v49 }
 0x260   :  { %v3096_v2 = vpop.permute.xlu1 %1417  ;;  %1131 = vrot.lane.b32.xlu0 %v2749_v7, %s2578_s8 }
 0x261   :  { %6180 = vst [vmem:[#allocation26_spill] sm:$0xff] %v3096_v2 }
 0x262   :  { %v3100_v57 = vpop.permute.xlu0 %1419  ;;  %1089 = vrot.lane.b32.xlu1 %v2742_v4, %s2577_s7  ;;  %s6018_s7 = smov 97  }
 0x263   :  { %6181 = vst [vmem:[#allocation27_spill] sm:$0xff] %v3100_v57 }
 0x264   :  { %v3104_v11 = vpop.permute.xlu1 %1457  ;;  %1171 = vrot.lane.b32.xlu0 %v2749_v7, %s2579_s9  ;;  %6218 = sst [smem:[#allocation58_spill]] %s3232_s6  ;;  %s3345_s6 = sld [smem:[#allocation9 + $0x55]] }
 0x265   :  { %6182 = vst [vmem:[#allocation28_spill] sm:$0xff] %v3104_v11 }
 0x266   :  { %v3108_v60 = vpop.permute.xlu0 %1459  ;;  %1129 = vrot.lane.b32.xlu1 %v2742_v4, %s2578_s8  ;;  %s3243_s8 = sld [smem:[#allocation9 + $0x40]] }
 0x267   :  { %6183 = vst [vmem:[#allocation29_spill] sm:$0xff] %v3108_v60 }
 0x268   :  { %v3112_v49 = vpop.permute.xlu1 %1497  ;;  %1252 = vrot.lane.b32.xlu0 %v2749_v7, %s2580_s3 }
 0x269   :  { %6184 = vst [vmem:[#allocation30_spill] sm:$0xff] %v3112_v49 }
 0x26a   :  { %v3116_v2 = vpop.permute.xlu0 %1499  ;;  %1169 = vrot.lane.b32.xlu1 %v2742_v4, %s2579_s9  ;;  %s3245_s9 = sld [smem:[#allocation9 + $0x41]] }
 0x26b   :  { %6185 = vst [vmem:[#allocation31_spill] sm:$0xff] %v3116_v2 }
 0x26c   :  { %v3120_v57 = vpop.permute.xlu1 %1537  ;;  %1292 = vrot.lane.b32.xlu0 %v2749_v7, %s2581_s10  ;;  %6220 = sst [smem:[#allocation60_spill]] %s3243_s8  ;;  %s6238_s8 = smov 97  }
 0x26d   :  { %6186 = vst [vmem:[#allocation32_spill] sm:$0xff] %v3120_v57 }
 0x26e   :  { %v3124_v11 = vpop.permute.xlu0 %1539  ;;  %1250 = vrot.lane.b32.xlu1 %v2742_v4, %s2580_s3  ;;  %s3247_s3 = sld [smem:[#allocation9 + $0x42]] }
 0x26f   :  { %6187 = vst [vmem:[#allocation33_spill] sm:$0xff] %v3124_v11 }
 0x270   :  { %v3128_v60 = vpop.permute.xlu1 %1577  ;;  %1332 = vrot.lane.b32.xlu0 %v2749_v7, %s2582_s2  ;;  %6221 = sst [smem:[#allocation61_spill]] %s3245_s9  ;;  %s3351_s9 = sld [smem:[#allocation9 + $0x31]] }
 0x271   :  { %6188 = vst [vmem:[#allocation34_spill] sm:$0xff] %v3128_v60 }
 0x272   :  { %v3132_v49 = vpop.permute.xlu0 %1579  ;;  %1290 = vrot.lane.b32.xlu1 %v2742_v4, %s2581_s10  ;;  %s3256_s10 = sld [smem:[#allocation9 + $0x43]] }
 0x273   :  { %6189 = vst [vmem:[#allocation35_spill] sm:$0xff] %v3132_v49 }
 0x274   :  { %v3136_v2 = vpop.permute.xlu1 %1617  ;;  %1372 = vrot.lane.b32.xlu0 %v2749_v7, %s6191_s21 }
 0x275   :  { %6190 = vst [vmem:[#allocation36_spill] sm:$0xff] %v3136_v2 }
 0x276   :  { %v3140_v57 = vpop.permute.xlu0 %1619  ;;  %1330 = vrot.lane.b32.xlu1 %v2742_v4, %s2582_s2  ;;  %s3258_s2 = sld [smem:[#allocation9 + $0x44]] }
 0x277   :  { %6192 = vst [vmem:[#allocation37_spill] sm:$0xff] %v3140_v57 }
 0x278   :  { %v3144_v11 = vpop.permute.xlu1 %1657  ;;  %1412 = vrot.lane.b32.xlu0 %v2749_v7, %s6194_s14 }
 0x279   :  { %6193 = vst [vmem:[#allocation38_spill] sm:$0xff] %v3144_v11 }
 0x27a   :  { %v3148_v60 = vpop.permute.xlu0 %1659  ;;  %1370 = vrot.lane.b32.xlu1 %v2742_v4, %s6191_s21  ;;  %s3263_s21 = sld [smem:[#allocation9 + $0x46]] }
 0x27b   :  { %6195 = vst [vmem:[#allocation39_spill] sm:$0xff] %v3148_v60 }
 0x27c   :  { %v3152_v49 = vpop.permute.xlu1 %1697  ;;  %1452 = vrot.lane.b32.xlu0 %v2749_v7, %s6197_s16 }
 0x27d   :  { %6196 = vst [vmem:[#allocation40_spill] sm:$0xff] %v3152_v49 }
 0x27e   :  { %v3156_v2 = vpop.permute.xlu0 %1699  ;;  %1410 = vrot.lane.b32.xlu1 %v2742_v4, %s6194_s14  ;;  %s3272_s14 = sld [smem:[#allocation9 + $0x48]] }
 0x27f   :  { %6198 = vst [vmem:[#allocation41_spill] sm:$0xff] %v3156_v2 }
 0x280   :  { %v3160_v57 = vpop.permute.xlu1 %259  ;;  %1492 = vrot.lane.b32.xlu0 %v2749_v7, %s6200_s17 }
 0x281   :  { %6199 = vst [vmem:[#allocation42_spill] sm:$0xff] %v3160_v57 }
 0x282   :  { %1450 = vrot.lane.b32.xlu1 %v2742_v4, %s6197_s16  ;;  %v3166_v11 = vpop.permute.xlu0 %331  ;;  %s3274_s16 = sld [smem:[#allocation9 + $0x4a]] }
 0x283   :  { %6201 = vst [vmem:[#allocation43_spill] sm:$0xff] %v3166_v11 }
 0x284   :  { %v3168_v60 = vpop.permute.xlu1 %289  ;;  %1532 = vrot.lane.b32.xlu0 %v2749_v7, %s6203_s18 }
 0x285   :  { %6202 = vst [vmem:[#allocation44_spill] sm:$0xff] %v3168_v60 }
 0x286   :  { %1490 = vrot.lane.b32.xlu1 %v2742_v4, %s6200_s17  ;;  %v3174_v49 = vpop.permute.xlu0 %371  ;;  %s3284_s17 = sld [smem:[#allocation9 + $0x4b]] }
 0x287   :  { %6204 = vst [vmem:[#allocation45_spill] sm:$0xff] %v3174_v49 }
 0x288   :  { %v3176_v2 = vpop.permute.xlu1 %329  ;;  %1572 = vrot.lane.b32.xlu0 %v2749_v7, %s6206_s19  ;;  %6225 = sst [smem:[#allocation64_spill]] %s3274_s16  ;;  %s3375_s16 = sld [smem:[#allocation9 + $0x2]] }
 0x289   :  { %6205 = vst [vmem:[#allocation46_spill] sm:$0xff] %v3176_v2 }
 0x28a   :  { %1530 = vrot.lane.b32.xlu1 %v2742_v4, %s6203_s18  ;;  %v3182_v57 = vpop.permute.xlu0 %411  ;;  %s3286_s18 = sld [smem:[#allocation9 + $0x4c]] }
 0x28b   :  { %6207 = vst [vmem:[#allocation47_spill] sm:$0xff] %v3182_v57 }
 0x28c   :  { %v3184_v11 = vpop.permute.xlu1 %369  ;;  %1612 = vrot.lane.b32.xlu0 %v2749_v7, %s2589_s11 }
 0x28d   :  { %6208 = vst [vmem:[#allocation48_spill] sm:$0xff] %v3184_v11  ;;  %v3239_v11 = vsub.s32 1, %v2699_v29 }
 0x28e   :  { %1570 = vrot.lane.b32.xlu1 %v2742_v4, %s6206_s19  ;;  %v3190_v60 = vpop.permute.xlu0 %451  ;;  %s3296_s19 = sld [smem:[#allocation9 + $0x4e]] }
 0x28f   :  { %6209 = vst [vmem:[#allocation49_spill] sm:$0xff] %v3190_v60 }
 0x290   :  { %v3192_v49 = vpop.permute.xlu1 %409  ;;  %1652 = vrot.lane.b32.xlu0 %v2749_v7, %s2590_s1  ;;  %6227 = sst [smem:[#allocation66_spill]] %s3286_s18  ;;  %s6049_s18 = smov 95  }
 0x291   :  { %6210 = vst [vmem:[#allocation50_spill] sm:$0xff] %v3192_v49  ;;  %v1210_v49 = vld [vmem:[#allocation8 + $0x30] ss:$8 sm:$0x3] }
 0x292   :  { %1610 = vrot.lane.b32.xlu1 %v2742_v4, %s2589_s11  ;;  %v3202_v57 = vpop.permute.xlu0 %491  ;;  %v1229_v29 = vrot.slane %v1210_v49, %v2702_v34  ;;  %s3261_s11 = sld [smem:[#allocation9 + $0x45]] }
 0x293   :  { %6211 = vst [vmem:[#allocation51_spill] sm:$0xff] %v3202_v57 }
 0x294   :  { %v3212_v60 = vpop.permute.xlu1 %449  ;;  %1692 = vrot.lane.b32.xlu0 %v2749_v7, %s2591_s15  ;;  %v3289_v1 = vmul.f32 %v2759_v12, %v1229_v29  ;;  %6229 = sst [smem:[#allocation68_spill]] %s3296_s19  ;;  %s6240_s19 = sld [smem:[#allocation52_spill]] }
 0x295   :  { %6214 = vst [vmem:[#allocation54_spill] sm:$0xff] %v3212_v60 }
 0x296   :  { %1650 = vrot.lane.b32.xlu1 %v2742_v4, %s2590_s1  ;;  %v3224_v57 = vpop.permute.xlu0 %531  ;;  %s3241_s1 = sld [smem:[#allocation9 + $0x3f]]  ;;  %6228 = vst [vmem:[#allocation67_spill] sm:$0xff] %v3289_v1 }
 0x297   :  { %6217 = vst [vmem:[#allocation57_spill] sm:$0xff] %v3224_v57 }
 0x298   :  { %v3234_v60 = vpop.permute.xlu1 %489  ;;  %1732 = vrot.lane.b32.xlu0 %v2749_v7, %s6018_s7 }
 0x299   :  { %6219 = vst [vmem:[#allocation59_spill] sm:$0xff] %v3234_v60  ;;  %v6223_v60 = vlaneseq }
 0x29a   :  { %1690 = vrot.lane.b32.xlu1 %v2742_v4, %s2591_s15  ;;  %v3251_v57 = vpop.permute.xlu0 %571  ;;  %s3270_s15 = sld [smem:[#allocation9 + $0x47]] }
 0x29b   :  { %6222 = vst [vmem:[#allocation62_spill] sm:$0xff] %v3251_v57  ;;  %v3254_v2 = vand.u32 127, %v6223_v60  ;;  %v1233_v60 = vrot.slane %v1210_v49, %v3239_v11 }
 0x29c   :  { %v3265_v23 = vpop.permute.xlu1 %529  ;;  %1739 = vrot.lane.b32.xlu0 %v2756_v10, %s6018_s7  ;;  %s6024_s7 = smov 96  }
 0x29d   :  { %6224 = vst [vmem:[#allocation63_spill] sm:$0xff] %v3265_v23  ;;  %vm6061_vm5 = vcmp.lt.s32.totalorder %v3254_v2, 50  ;;  %vm333_vm6 = vcmp.lt.s32.totalorder %v3254_v2, 49  ;;  %vm373_vm7 = vcmp.lt.s32.totalorder %v3254_v2, 48  ;;  %vm413_vm8 = vcmp.lt.s32.totalorder %v3254_v2, 47 }
 0x29e   :  { %v3276_v57 = vpop.permute.xlu0 %611  ;;  %242 = vrot.lane.b32.xlu1 %v2749_v7, %s2557_s12  ;;  %s3294_s12 = sld [smem:[#allocation9 + $0x4d]]  ;;  %v3303_v29 = vmul.f32 %v2764_v13, %v1233_v60  ;;  %vm6095_vm9 = vcmp.lt.s32.totalorder %v3254_v2, 46  ;;  %vm6086_vm10 = vcmp.lt.s32.totalorder %v3254_v2, 45  ;;  %vm6079_vm11 = vcmp.lt.s32.totalorder %v3254_v2, 35 }
 0x29f   :  { %6226 = vst [vmem:[#allocation65_spill] sm:$0xff] %v3276_v57  ;;  %vm6078_vm12 = vcmp.lt.s32.totalorder %v3254_v2, 34  ;;  %v301_v60 = vsel %vm6061_vm5, %v2886_v15, %v2880_v14  ;;  %v341_v57 = vsel %vm333_vm6, %v2894_v17, %v2888_v16  ;;  %vm6075_vm13 = vcmp.lt.s32.totalorder %v3254_v2, 33 }
 0x2a0   :  { %v3298_v49 = vpop.permute.xlu1 %569  ;;  %1772 = vrot.lane.b32.xlu0 %v2749_v7, %s6024_s7  ;;  %6231 = vst [vmem:[#allocation70_spill] sm:$0xff] %v3303_v29  ;;  %s3316_s7 = sld [smem:[#allocation9 + $0x51]]  ;;  %v6241_v23 = vstv %s3196_s20  ;;  %vm6074_vm14 = vcmp.lt.s32.totalorder %v3254_v2, 32  ;;  %vm6062_vm15 = vcmp.lt.s32.totalorder %v3254_v2, 31  ;;  %vm773_vm0 = vcmp.lt.s32.totalorder %v3254_v2, 29  ;;  %s6250_s20 = smov 95  }
 0x2a1   :  { %6230 = vst [vmem:[#allocation69_spill] sm:$0xff] %v3298_v49  ;;  %v300_v49 = vsel %vm6061_vm5, %v2880_v14, %v2886_v15  ;;  %v340_v14 = vsel %vm333_vm6, %v2888_v16, %v2894_v17  ;;  %v381_v15 = vsel %vm373_vm7, %v2902_v19, %v2896_v18  ;;  %v3393_v1 = vmul.f32 %v6241_v23, %v301_v60 }
 0x2a2   :  { %v3320_v13 = vpop.permute.xlu0 %651  ;;  %291 = vrot.lane.b32.xlu1 %v2749_v7, %s6234_s26  ;;  %s6236_s26 = smov 96   ;;  %v3410_v60 = vmul.f32 %v6241_v23, %v300_v49  ;;  %v6247_v17 = vmov %v6246_v9  ;;  %v3438_v49 = vld [vmem:[#allocation8 + $0x2] ss:$8 sm:$0x3]  ;;  %vm6067_vm1 = vcmp.lt.s32.totalorder %v3254_v2, 30  ;;  %vm813_vm2 = vcmp.lt.s32.totalorder %v3254_v2, 19 }
 0x2a3   :  { %6233 = vst [vmem:[#allocation72_spill] sm:$0xff] %v3320_v13  ;;  %6242 = vst [vmem:[#allocation76_spill] sm:$0xff] %v3393_v1  ;;  %v3425_v16 = vmul.f32 %v6247_v17, %v340_v14  ;;  %v6248_v1 = vstv %s6240_s19  ;;  %v6251_v17 = vstv %s3206_s24  ;;  %s3489_s24 = sld [smem:[#allocation9 + $0x6]]  ;;  %s6057_s19 = smov 94   ;;  %vm853_vm3 = vcmp.lt.s32.totalorder %v3254_v2, 18 }
 0x2a4   :  { %v3337_v29 = vpop.permute.xlu1 %609  ;;  %1779 = vrot.lane.b32.xlu0 %v2756_v10, %s6236_s26  ;;  %6245 = vst [vmem:[#allocation78_spill] sm:$0xff] %v3410_v60  ;;  %vm893_vm4 = vcmp.lt.s32.totalorder %v3254_v2, 17  ;;  %vm933_vm5 = vcmp.lt.s32.totalorder %v3254_v2, 16 }
 0x2a5   :  { %6235 = vst [vmem:[#allocation73_spill] sm:$0xff] %v3337_v29 }
 0x2a6   :  { %v3353_v13 = vpop.permute.xlu0 %691  ;;  %1730 = vrot.lane.b32.xlu1 %v2742_v4, %s6238_s8 }
 0x2a7   :  { %6237 = vst [vmem:[#allocation74_spill] sm:$0xff] %v3353_v13  ;;  %v3414_v13 = vmul.f32 %v6246_v9, %v341_v57  ;;  %v420_v57 = vsel %vm413_vm8, %v2904_v20, %v2910_v21 }
 0x2a8   :  { %v3377_v12 = vpop.permute.xlu1 %649  ;;  %1812 = vrot.lane.b32.xlu0 %v2749_v7, %s6049_s18  ;;  %s3402_s18 = sld [smem:[#allocation9 + $0x3]] }
 0x2a9   :  { %6239 = vst [vmem:[#allocation75_spill] sm:$0xff] %v3377_v12  ;;  %v380_v12 = vsel %vm373_vm7, %v2896_v18, %v2902_v19  ;;  %v421_v18 = vsel %vm413_vm8, %v2910_v21, %v2904_v20  ;;  %v460_v20 = vsel %vm6095_vm9, %v2912_v22, %v2918_v24  ;;  %v461_v21 = vsel %vm6095_vm9, %v2918_v24, %v2912_v22 }
 0x2aa   :  { %v3404_v29 = vpop.permute.xlu0 %731  ;;  %1737 = vrot.lane.b32.xlu1 %v2737_v63, %s6238_s8  ;;  %v3446_v14 = vmul.f32 %v6248_v1, %v380_v12  ;;  %v3459_v9 = vmul.f32 %v6251_v17, %v421_v18  ;;  %v500_v12 = vsel %vm6086_vm10, %v2920_v25, %v2926_v26  ;;  %v6252_v18 = vmov %v6251_v17  ;;  %s6253_s8 = sld [smem:[#allocation53_spill]] }
 0x2ab   :  { %6244 = vst [vmem:[#allocation77_spill] sm:$0xff] %v3404_v29  ;;  %v3429_v29 = vmul.f32 %v6248_v1, %v381_v15  ;;  %v501_v1 = vsel %vm6086_vm10, %v2926_v26, %v2920_v25  ;;  %v3477_v17 = vmul.f32 %v6252_v18, %v420_v57  ;;  %v541_v25 = vsel %vm6079_vm11, %v2932_v28, %v2928_v27  ;;  %v3487_v15 = vld [vmem:[#allocation8 + $0x3] ss:$8 sm:$0x3] }
 0x2ac   :  { %v3440_v23 = vpop.permute.xlu1 %689  ;;  %1819 = vrot.lane.b32.xlu0 %v2756_v10, %s6250_s20  ;;  %v6255_v57 = vstv %s3208_s25  ;;  %v540_v26 = vsel %vm6079_vm11, %v2928_v27, %v2932_v28  ;;  %s6262_s25 = sld [smem:[#allocation55_spill]]  ;;  %v580_v27 = vsel %vm6078_vm12, %v2936_v30, %v2940_v31  ;;  %v581_v28 = vsel %vm6078_vm12, %v2940_v31, %v2936_v30 }
 0x2ad   :  { %6249 = vst [vmem:[#allocation79_spill] sm:$0xff] %v3440_v23  ;;  %6254 = vst [vmem:[#allocation80_spill] sm:$0xff] %v3477_v17  ;;  %v3493_v18 = vmul.f32 %v6255_v57, %v461_v21  ;;  %v6256_v19 = vmov %v6255_v57  ;;  %v3505_v23 = vld [vmem:[#allocation8 + $0x4] ss:$8 sm:$0x3]  ;;  %v6263_v22 = vstv %s3216_s27  ;;  %v621_v30 = vsel %vm6075_vm13, %v2948_v33, %v2944_v32  ;;  %s6271_s27 = smov 94  }
 0x2ae   :  { %6243 = sst [smem:[#allocation52_spill]] %s3402_s18  ;;  %v772_v24 = vpop.permute.xlu0 %771  ;;  %1770 = vrot.lane.b32.xlu1 %v2742_v4, %s6236_s26  ;;  %v3497_v60 = vmul.f32 %v6256_v19, %v460_v20  ;;  %v620_v31 = vsel %vm6075_vm13, %v2944_v32, %v2948_v33  ;;  %v661_v32 = vsel %vm6074_vm14, %v2956_v36, %v2952_v35  ;;  %vm1334_vm13 = vcmp.lt.s32.totalorder %v3254_v2, 125 }
 0x2af   :  { %s3553_s18 = sld [smem:[#allocation9 + $0x8]]  ;;  %vm1414_vm12 = vcmp.lt.s32.totalorder %v3254_v2, 114  ;;  %vm1494_vm11 = vcmp.lt.s32.totalorder %v3254_v2, 112  ;;  %vm1574_vm10 = vcmp.lt.s32.totalorder %v3254_v2, 110  ;;  %vm1654_vm9 = vcmp.lt.s32.totalorder %v3254_v2, 99 }
 0x2b0   :  { %v3507_v17 = vpop.permute.xlu1 %729  ;;  %1852 = vrot.lane.b32.xlu0 %v2749_v7, %s6057_s19  ;;  %v6258_v19 = vstv %s6253_s8  ;;  %s3536_s8 = sld [smem:[#allocation9 + $0x7]]  ;;  %s6267_s19 = sld [smem:[#allocation56_spill]] }
 0x2b1   :  { %6257 = vst [vmem:[#allocation81_spill] sm:$0xff] %v3507_v17  ;;  %v3513_v20 = vmul.f32 %v6258_v19, %v501_v1  ;;  %v6260_v21 = vmov %v6258_v19  ;;  %v3529_v17 = vmul.f32 %v6263_v22, %v541_v25  ;;  %v3551_v25 = vld [vmem:[#allocation8 + $0x5] ss:$8 sm:$0x3] }
 0x2b2   :  { %v3517_v57 = vmul.f32 %v6260_v21, %v500_v12  ;;  %v812_v21 = vpop.permute.xlu0 %811  ;;  %1777 = vrot.lane.b32.xlu1 %v2737_v63, %s6236_s26  ;;  %v6268_v19 = vstv %s6262_s25  ;;  %v3570_v1 = vld [vmem:[#allocation8 + $0x6] ss:$8 sm:$0x3]  ;;  %s3600_s26 = sld [smem:[#allocation9 + $0x9]]  ;;  %s3617_s25 = sld [smem:[#allocation9 + $0xa]] }
 0x2b3   :  { %6259 = vst [vmem:[#allocation82_spill] sm:$0xff] %v3513_v20  ;;  %v3557_v12 = vmul.f32 %v6268_v19, %v581_v28 }
 0x2b4   :  { %6261 = vst [vmem:[#allocation83_spill] sm:$0xff] %v3517_v57  ;;  %v6265_v57 = vmov %v6263_v22  ;;  %1859 = vrot.lane.b32.xlu0 %v2756_v10, %s6271_s27  ;;  %v6278_v22 = vstv %s3226_s30  ;;  %s3664_s30 = sld [smem:[#allocation9 + $0xb]] }
 0x2b5   :  { %v3542_v20 = vmul.f32 %v6265_v57, %v540_v26  ;;  %v6269_v26 = vmov %v6268_v19 }
 0x2b6   :  { %6264 = sst [smem:[#allocation53_spill]] %s3536_s8  ;;  %v3561_v57 = vmul.f32 %v6269_v26, %v580_v27  ;;  %v660_v27 = vsel %vm6074_vm14, %v2952_v35, %v2956_v36  ;;  %v6274_v19 = vstv %s6267_s19  ;;  %v852_v36 = vpop.permute.xlu0 %851  ;;  %1810 = vrot.lane.b32.xlu1 %v2742_v4, %s6250_s20  ;;  %v3615_v35 = vld [vmem:[#allocation8 + $0x7] ss:$8 sm:$0x3]  ;;  %s6063_s19 = smov 93   ;;  %vm1254_vm14 = vcmp.lt.s32.totalorder %v3254_v2, 127 }
 0x2b7   :  { %6266 = vst [vmem:[#allocation84_spill] sm:$0xff] %v3542_v20  ;;  %v770_v20 = vpop.permute.xlu1 %769  ;;  %v3592_v26 = vmul.f32 %v6274_v19, %v621_v30  ;;  %v701_v30 = vsel %vm6062_vm15, %v2964_v38, %v2960_v37  ;;  %s3681_s8 = sld [smem:[#allocation9 + $0xc]] }
 0x2b8   :  { %6270 = vst [vmem:[#allocation85_spill] sm:$0xff] %v3561_v57  ;;  %v3584_v33 = vsel %vm773_vm0, %v770_v20, %v772_v24  ;;  %v3588_v28 = vsel %vm773_vm0, %v772_v24, %v770_v20  ;;  %6275 = sst [smem:[#allocation55_spill]] %s3600_s26  ;;  %v6276_v24 = vmov %v6274_v19  ;;  %v700_v19 = vsel %vm6062_vm15, %v2960_v37, %v2964_v38  ;;  %1892 = vrot.lane.b32.xlu0 %v2749_v7, %s6063_s19  ;;  %s6287_s19 = sld [smem:[#allocation58_spill]] }
 0x2b9   :  { %6272 = vst [vmem:[#allocation86_spill] sm:$0xff] %v3584_v33  ;;  %6273 = vst [vmem:[#allocation87_spill] sm:$0xff] %v3588_v28  ;;  %v3606_v20 = vmul.f32 %v6276_v24, %v620_v31  ;;  %v3621_v33 = vmul.f32 %v6278_v22, %v661_v32  ;;  %v6279_v31 = vmov %v6278_v22  ;;  %v3634_v28 = vld [vmem:[#allocation8 + $0x10] ss:$8 sm:$0x3]  ;;  %v740_v22 = vsel %vm6067_vm1, %v2968_v39, %v2972_v40  ;;  %s3745_s26 = sld [smem:[#allocation9 + $0xe]] }
 0x2ba   :  { %v3625_v24 = vmul.f32 %v6279_v31, %v660_v27  ;;  %v741_v37 = vsel %vm6067_vm1, %v2972_v40, %v2968_v39  ;;  %v6283_v32 = vstv %s3228_s0  ;;  %vm973_vm15 = vcmp.lt.s32.totalorder %v3254_v2, 15  ;;  %6284 = sst [smem:[#allocation56_spill]] %s3664_s30  ;;  %v892_v40 = vpop.permute.xlu0 %891  ;;  %1817 = vrot.lane.b32.xlu1 %v2737_v63, %s6250_s20  ;;  %v3679_v39 = vld [vmem:[#allocation8 + $0x11] ss:$8 sm:$0x3]  ;;  %s6291_s0 = smov 93  }
 0x2bb   :  { %6277 = vst [vmem:[#allocation88_spill] sm:$0xff] %v3606_v20  ;;  %v810_v20 = vpop.permute.xlu1 %809  ;;  %v3656_v31 = vmul.f32 %v6283_v32, %v701_v30  ;;  %v781_v30 = vsel %vm773_vm0, %v2980_v42, %v2976_v41  ;;  %v6288_v57 = vstv %s3230_s4  ;;  %vm1013_vm1 = vcmp.lt.s32.totalorder %v3254_v2, 14  ;;  %s3728_s4 = sld [smem:[#allocation9 + $0xd]]  ;;  %s3809_s30 = sld [smem:[#allocation9 + $0x10]] }
 0x2bc   :  { %6280 = vst [vmem:[#allocation89_spill] sm:$0xff] %v3625_v24  ;;  %v3648_v38 = vsel %vm813_vm2, %v810_v20, %v812_v21  ;;  %v3652_v27 = vsel %vm813_vm2, %v812_v21, %v810_v20  ;;  %v6285_v21 = vmov %v6283_v32  ;;  %v780_v32 = vsel %vm773_vm0, %v2976_v41, %v2980_v42  ;;  %1899 = vrot.lane.b32.xlu0 %v2756_v10, %s6291_s0  ;;  %s6297_s20 = sld [smem:[#allocation60_spill]] }
 0x2bd   :  { %6281 = vst [vmem:[#allocation90_spill] sm:$0xff] %v3648_v38  ;;  %6282 = vst [vmem:[#allocation91_spill] sm:$0xff] %v3652_v27  ;;  %v3670_v20 = vmul.f32 %v6285_v21, %v700_v19  ;;  %v3685_v38 = vmul.f32 %v6288_v57, %v741_v37  ;;  %v6289_v19 = vmov %v6288_v57  ;;  %v3698_v27 = vld [vmem:[#allocation8 + $0x12] ss:$8 sm:$0x3]  ;;  %v820_v57 = vsel %vm813_vm2, %v2984_v43, %v2988_v44 }
 0x2be   :  { %v3689_v21 = vmul.f32 %v6289_v19, %v740_v22  ;;  %v821_v41 = vsel %vm813_vm2, %v2988_v44, %v2984_v43  ;;  %v6294_v37 = vstv %s6287_s19  ;;  %vm1053_vm0 = vcmp.lt.s32.totalorder %v3254_v2, 13  ;;  %v932_v44 = vpop.permute.xlu0 %931  ;;  %1850 = vrot.lane.b32.xlu1 %v2742_v4, %s6271_s27  ;;  %v3743_v43 = vld [vmem:[#allocation8 + $0x13] ss:$8 sm:$0x3]  ;;  %s6070_s19 = smov 83  }
 0x2bf   :  { %6286 = vst [vmem:[#allocation92_spill] sm:$0xff] %v3670_v20  ;;  %v850_v20 = vpop.permute.xlu1 %849  ;;  %v3720_v19 = vmul.f32 %v6294_v37, %v781_v30  ;;  %v861_v30 = vsel %vm853_vm3, %v2996_v46, %v2992_v45  ;;  %v6298_v24 = vstv %s3241_s1  ;;  %vm1093_vm2 = vcmp.lt.s32.totalorder %v3254_v2, 3  ;;  %s6302_s1 = sld [smem:[#allocation61_spill]] }
 0x2c0   :  { %6290 = vst [vmem:[#allocation93_spill] sm:$0xff] %v3689_v21  ;;  %v3712_v42 = vsel %vm853_vm3, %v850_v20, %v852_v36  ;;  %v3716_v22 = vsel %vm853_vm3, %v852_v36, %v850_v20  ;;  %v6295_v36 = vmov %v6294_v37  ;;  %v860_v37 = vsel %vm853_vm3, %v2992_v45, %v2996_v46  ;;  %1932 = vrot.lane.b32.xlu0 %v2749_v7, %s6070_s19  ;;  %s3792_s19 = sld [smem:[#allocation9 + $0xf]] }
 0x2c1   :  { %6292 = vst [vmem:[#allocation94_spill] sm:$0xff] %v3712_v42  ;;  %6293 = vst [vmem:[#allocation95_spill] sm:$0xff] %v3716_v22  ;;  %v3734_v20 = vmul.f32 %v6295_v36, %v780_v32  ;;  %v3749_v42 = vmul.f32 %v6298_v24, %v821_v41  ;;  %v6299_v32 = vmov %v6298_v24  ;;  %v3762_v22 = vld [vmem:[#allocation8 + $0x14] ss:$8 sm:$0x3]  ;;  %v900_v24 = vsel %vm893_vm4, %v3000_v47, %v3004_v48 }
 0x2c2   :  { %v3753_v36 = vmul.f32 %v6299_v32, %v820_v57  ;;  %v901_v45 = vsel %vm893_vm4, %v3004_v48, %v3000_v47  ;;  %v6303_v41 = vstv %s6297_s20  ;;  %vm1133_vm3 = vcmp.lt.s32.totalorder %v3254_v2, 2  ;;  %v972_v48 = vpop.permute.xlu0 %971  ;;  %1857 = vrot.lane.b32.xlu1 %v2737_v63, %s6271_s27  ;;  %v3807_v47 = vld [vmem:[#allocation8 + $0x15] ss:$8 sm:$0x3]  ;;  %s6310_s27 = smov 83   ;;  %s3856_s20 = sld [smem:[#allocation9 + $0x11]] }
 0x2c3   :  { %6296 = vst [vmem:[#allocation96_spill] sm:$0xff] %v3734_v20  ;;  %v890_v20 = vpop.permute.xlu1 %889  ;;  %v3784_v32 = vmul.f32 %v6303_v41, %v861_v30  ;;  %v941_v30 = vsel %vm933_vm5, %v3012_v51, %v3008_v50 }
 0x2c4   :  { %6300 = vst [vmem:[#allocation97_spill] sm:$0xff] %v3753_v36  ;;  %v3776_v46 = vsel %vm893_vm4, %v890_v20, %v892_v40  ;;  %v3780_v57 = vsel %vm893_vm4, %v892_v40, %v890_v20  ;;  %v6305_v40 = vmov %v6303_v41  ;;  %v940_v41 = vsel %vm933_vm5, %v3008_v50, %v3012_v51  ;;  %1939 = vrot.lane.b32.xlu0 %v2756_v10, %s6310_s27 }
 0x2c5   :  { %6301 = vst [vmem:[#allocation98_spill] sm:$0xff] %v3776_v46  ;;  %6304 = vst [vmem:[#allocation99_spill] sm:$0xff] %v3784_v32  ;;  %v3798_v20 = vmul.f32 %v6305_v40, %v860_v37  ;;  %v6307_v21 = vstv %s6302_s1  ;;  %vm1173_vm4 = vcmp.lt.s32.totalorder %v3254_v2, 1  ;;  %v981_v50 = vsel %vm973_vm15, %v3020_v53, %v3016_v52  ;;  %s3873_s1 = sld [smem:[#allocation9 + $0x12]] }
 0x2c6   :  { %v3813_v32 = vmul.f32 %v6307_v21, %v901_v45  ;;  %v6308_v37 = vmov %v6307_v21  ;;  %v980_v21 = vsel %vm973_vm15, %v3016_v52, %v3020_v53  ;;  %v6312_v45 = vstv %s3247_s3  ;;  %v1012_v53 = vpop.permute.xlu0 %1011  ;;  %1890 = vrot.lane.b32.xlu1 %v2742_v4, %s6291_s0  ;;  %v3871_v52 = vld [vmem:[#allocation8 + $0x17] ss:$8 sm:$0x3]  ;;  %s6076_s3 = smov 82  }
 0x2c7   :  { %6306 = vst [vmem:[#allocation100_spill] sm:$0xff] %v3798_v20  ;;  %v3817_v40 = vmul.f32 %v6308_v37, %v900_v24  ;;  %v3826_v20 = vld [vmem:[#allocation8 + $0x16] ss:$8 sm:$0x3]  ;;  %v930_v46 = vpop.permute.xlu1 %929  ;;  %v3848_v37 = vmul.f32 %v6312_v45, %v941_v30  ;;  %v1021_v30 = vsel %vm1013_vm1, %v3028_v55, %v3024_v54  ;;  %v6316_v36 = vstv %s3256_s10  ;;  %s3922_s10 = sld [smem:[#allocation9 + $0x13]] }
 0x2c8   :  { %v3840_v51 = vsel %vm933_vm5, %v930_v46, %v932_v44  ;;  %v3844_v24 = vsel %vm933_vm5, %v932_v44, %v930_v46  ;;  %v6314_v44 = vmov %v6312_v45  ;;  %v1020_v45 = vsel %vm1013_vm1, %v3024_v54, %v3028_v55  ;;  %1972 = vrot.lane.b32.xlu0 %v2749_v7, %s6076_s3  ;;  %s3937_s3 = sld [smem:[#allocation9 + $0x14]] }
 0x2c9   :  { %6309 = vst [vmem:[#allocation101_spill] sm:$0xff] %v3817_v40  ;;  %6311 = vst [vmem:[#allocation102_spill] sm:$0xff] %v3840_v51  ;;  %v3862_v46 = vmul.f32 %v6314_v44, %v940_v41  ;;  %v6318_v41 = vmov %v6316_v36  ;;  %vm1294_vm5 = vcmp.lt.s32.totalorder %v3254_v2, 126  ;;  %v1061_v54 = vsel %vm1053_vm0, %v3036_v58, %v3032_v56 }
 0x2ca   :  { %6313 = vst [vmem:[#allocation103_spill] sm:$0xff] %v3848_v37  ;;  %v3877_v37 = vmul.f32 %v6316_v36, %v981_v50  ;;  %v3881_v44 = vmul.f32 %v6318_v41, %v980_v21  ;;  %v1060_v36 = vsel %vm1053_vm0, %v3032_v56, %v3036_v58  ;;  %v6320_v50 = vstv %s3258_s2  ;;  %v1052_v58 = vpop.permute.xlu0 %1051  ;;  %1897 = vrot.lane.b32.xlu1 %v2737_v63, %s6291_s0  ;;  %v3935_v56 = vld [vmem:[#allocation8 + $0x21] ss:$8 sm:$0x3]  ;;  %s6331_s2 = smov 82   ;;  %s4001_s0 = sld [smem:[#allocation9 + $0x16]] }
 0x2cb   :  { %6315 = vst [vmem:[#allocation104_spill] sm:$0xff] %v3862_v46  ;;  %v3890_v46 = vld [vmem:[#allocation8 + $0x20] ss:$8 sm:$0x3]  ;;  %v970_v51 = vpop.permute.xlu1 %969  ;;  %v3912_v41 = vmul.f32 %v6320_v50, %v1021_v30  ;;  %v1101_v30 = vsel %vm1093_vm2, %v3044_v61, %v3040_v59  ;;  %6325 = vst [vmem:[#allocation109_spill] sm:$0xff] %v3935_v56  ;;  %v6326_v40 = vstv %s3261_s11  ;;  %s3986_s11 = sld [smem:[#allocation9 + $0x15]] }
 0x2cc   :  { %6317 = vst [vmem:[#allocation105_spill] sm:$0xff] %v3877_v37  ;;  %6319 = vst [vmem:[#allocation106_spill] sm:$0xff] %v3881_v44  ;;  %v3904_v55 = vsel %vm973_vm15, %v970_v51, %v972_v48  ;;  %v3908_v21 = vsel %vm973_vm15, %v972_v48, %v970_v51  ;;  %v6323_v48 = vmov %v6320_v50  ;;  %v1100_v50 = vsel %vm1093_vm2, %v3040_v59, %v3044_v61  ;;  %v6433_v56 = vld [vmem:[#allocation38_spill] sm:$0xff] }
 0x2cd   :  { %6321 = vst [vmem:[#allocation107_spill] sm:$0xff] %v3912_v41  ;;  %6322 = sst [smem:[#allocation58_spill]] %s3922_s10  ;;  %v3926_v51 = vmul.f32 %v6323_v48, %v1020_v45  ;;  %v3941_v41 = vmul.f32 %v6326_v40, %v1061_v54  ;;  %v6328_v45 = vmov %v6326_v40  ;;  %vm1374_vm15 = vcmp.lt.s32.totalorder %v3254_v2, 115  ;;  %1979 = vrot.lane.b32.xlu0 %v2756_v10, %s6331_s2  ;;  %s4065_s10 = sld [smem:[#allocation9 + $0x19]] }
 0x2ce   :  { %v3945_v48 = vmul.f32 %v6328_v45, %v1060_v36  ;;  %v1140_v40 = vsel %vm1133_vm3, %v3048_v62, %v3052_v0  ;;  %v1141_v59 = vsel %vm1133_vm3, %v3052_v0, %v3048_v62  ;;  %v6334_v54 = vstv %s3263_s21  ;;  %v1092_v0 = vpop.permute.xlu0 %1091  ;;  %1930 = vrot.lane.b32.xlu1 %v2742_v4, %s6310_s27  ;;  %v3999_v62 = vld [vmem:[#allocation8 + $0x23] ss:$8 sm:$0x3]  ;;  %s6080_s21 = smov 81  }
 0x2cf   :  { %6324 = vst [vmem:[#allocation108_spill] sm:$0xff] %v3926_v51  ;;  %6327 = vst [vmem:[#allocation110_spill] sm:$0xff] %v3941_v41  ;;  %v3954_v51 = vld [vmem:[#allocation8 + $0x22] ss:$8 sm:$0x3]  ;;  %v1010_v37 = vpop.permute.xlu1 %1009  ;;  %v3976_v45 = vmul.f32 %v6334_v54, %v1101_v30  ;;  %v1181_v30 = vsel %vm1173_vm4, %v3060_v5, %v3056_v3  ;;  %v6340_v44 = vstv %s3270_s15  ;;  %s6346_s15 = sld [smem:[#allocation64_spill]] }
 0x2d0   :  { %6329 = vst [vmem:[#allocation111_spill] sm:$0xff] %v3945_v48  ;;  %6330 = vst [vmem:[#allocation112_spill] sm:$0xff] %v3954_v51  ;;  %v3968_v61 = vsel %vm1013_vm1, %v1010_v37, %v1012_v53  ;;  %v3972_v36 = vsel %vm1013_vm1, %v1012_v53, %v1010_v37  ;;  %v6337_v37 = vmov %v6334_v54  ;;  %v1180_v54 = vsel %vm1173_vm4, %v3056_v3, %v3060_v5 }
 0x2d1   :  { %6332 = vst [vmem:[#allocation113_spill] sm:$0xff] %v3968_v61  ;;  %6333 = vst [vmem:[#allocation114_spill] sm:$0xff] %v3972_v36  ;;  %6336 = sst [smem:[#allocation60_spill]] %s3986_s11  ;;  %v3990_v53 = vmul.f32 %v6337_v37, %v1100_v50  ;;  %v6342_v50 = vmov %v6340_v44  ;;  %vm6102_vm1 = vcmp.lt.s32.totalorder %v3254_v2, 113  ;;  %2012 = vrot.lane.b32.xlu0 %v2749_v7, %s6080_s21  ;;  %v1262_v3 = vsel %vm1254_vm14, %v3068_v8, %v3064_v6  ;;  %s4050_s21 = sld [smem:[#allocation9 + $0x17]]  ;;  %v6462_v36 = vld [vmem:[#allocation48_spill] sm:$0xff] }
 0x2d2   :  { %6335 = vst [vmem:[#allocation115_spill] sm:$0xff] %v3976_v45  ;;  %6339 = vst [vmem:[#allocation117_spill] sm:$0xff] %v3999_v62  ;;  %v4005_v45 = vmul.f32 %v6340_v44, %v1141_v59  ;;  %v4009_v37 = vmul.f32 %v6342_v50, %v1140_v40  ;;  %v1261_v44 = vsel %vm1254_vm14, %v3064_v6, %v3068_v8  ;;  %v6348_v59 = vstv %s3272_s14  ;;  %v1132_v8 = vpop.permute.xlu0 %1131  ;;  %v4063_v6 = vld [vmem:[#allocation8 + $0x25] ss:$8 sm:$0x3]  ;;  %s6359_s14 = smov 81  }
 0x2d3   :  { %6338 = vst [vmem:[#allocation116_spill] sm:$0xff] %v3990_v53  ;;  %v4018_v53 = vld [vmem:[#allocation8 + $0x24] ss:$8 sm:$0x3]  ;;  %v1050_v41 = vpop.permute.xlu1 %1049  ;;  %v4040_v50 = vmul.f32 %v6348_v59, %v1181_v30  ;;  %1937 = vrot.lane.b32.xlu1 %v2737_v63, %s6310_s27  ;;  %v6352_v30 = vld [vmem:[#allocation21_spill] sm:$0xff]  ;;  %s6364_s27 = sld [smem:[#allocation66_spill]] }
 0x2d4   :  { %6341 = vst [vmem:[#allocation118_spill] sm:$0xff] %v4005_v45  ;;  %6343 = vst [vmem:[#allocation119_spill] sm:$0xff] %v4009_v37  ;;  %v4032_v5 = vsel %vm1053_vm0, %v1050_v41, %v1052_v58  ;;  %v4036_v40 = vsel %vm1053_vm0, %v1052_v58, %v1050_v41  ;;  %v6350_v41 = vmov %v6348_v59  ;;  %v6353_v59 = vld [vmem:[#allocation20_spill] sm:$0xff]  ;;  %vm1534_vm0 = vcmp.lt.s32.totalorder %v3254_v2, 111  ;;  %s4129_s11 = sld [smem:[#allocation9 + $0x1b]] }
 0x2d5   :  { %6344 = vst [vmem:[#allocation120_spill] sm:$0xff] %v4018_v53  ;;  %6345 = vst [vmem:[#allocation121_spill] sm:$0xff] %v4032_v5  ;;  %v4054_v58 = vmul.f32 %v6350_v41, %v1180_v54  ;;  %v1301_v48 = vsel %vm1294_vm5, %v6353_v59, %v6352_v30  ;;  %v6355_v45 = vstv %s6346_s15  ;;  %2019 = vrot.lane.b32.xlu0 %v2756_v10, %s6359_s14  ;;  %s4114_s15 = sld [smem:[#allocation9 + $0x1a]] }
 0x2d6   :  { %6347 = vst [vmem:[#allocation122_spill] sm:$0xff] %v4036_v40  ;;  %6349 = vst [vmem:[#allocation123_spill] sm:$0xff] %v4040_v50  ;;  %v4069_v62 = vmul.f32 %v6355_v45, %v1261_v44  ;;  %v6357_v54 = vmov %v6355_v45  ;;  %v1302_v50 = vsel %vm1294_vm5, %v6352_v30, %v6353_v59  ;;  %v4084_v45 = vld [vmem:[#allocation8 + $0x26] ss:$8 sm:$0x3]  ;;  %v6453_v40 = vstv %s3375_s16 }
 0x2d7   :  { %6351 = vst [vmem:[#allocation124_spill] sm:$0xff] %v4054_v58  ;;  %6354 = vst [vmem:[#allocation21_spill] sm:$0xff] %v4063_v6  ;;  %v4073_v41 = vmul.f32 %v6357_v54, %v1262_v3  ;;  %v1090_v58 = vpop.permute.xlu1 %1089  ;;  %v6361_v44 = vld [vmem:[#allocation23_spill] sm:$0xff]  ;;  %v6362_v3 = vld [vmem:[#allocation22_spill] sm:$0xff]  ;;  %1970 = vrot.lane.b32.xlu1 %v2742_v4, %s6331_s2 }
 0x2d8   :  { %6356 = vst [vmem:[#allocation20_spill] sm:$0xff] %v4069_v62  ;;  %6360 = vst [vmem:[#allocation126_spill] sm:$0xff] %v4084_v45  ;;  %v1341_v54 = vsel %vm1334_vm13, %v6362_v3, %v6361_v44  ;;  %v1342_v30 = vsel %vm1334_vm13, %v6361_v44, %v6362_v3  ;;  %v4096_v59 = vsel %vm1093_vm2, %v1090_v58, %v1092_v0  ;;  %v1172_v3 = vpop.permute.xlu0 %1171  ;;  %v4127_v44 = vld [vmem:[#allocation8 + $0x27] ss:$8 sm:$0x3] }
 0x2d9   :  { %6358 = vst [vmem:[#allocation125_spill] sm:$0xff] %v4073_v41  ;;  %6363 = vst [vmem:[#allocation23_spill] sm:$0xff] %v4096_v59  ;;  %v4100_v37 = vsel %vm1093_vm2, %v1092_v0, %v1090_v58  ;;  %v6366_v41 = vstv %s3284_s17  ;;  %v6374_v6 = vstv %s6364_s27  ;;  %vm1614_vm2 = vcmp.lt.s32.totalorder %v3254_v2, 109  ;;  %s6098_s17 = smov 80   ;;  %s6382_s27 = sld [smem:[#allocation68_spill]] }
 0x2da   :  { %6365 = vst [vmem:[#allocation22_spill] sm:$0xff] %v4100_v37  ;;  %v4104_v62 = vmul.f32 %v6366_v41, %v1301_v48  ;;  %v6369_v0 = vmov %v6366_v41  ;;  %v6371_v48 = vld [vmem:[#allocation25_spill] sm:$0xff]  ;;  %v6372_v41 = vld [vmem:[#allocation24_spill] sm:$0xff]  ;;  %v4133_v59 = vmul.f32 %v6374_v6, %v1341_v54  ;;  %v6376_v37 = vmov %v6374_v6  ;;  %2052 = vrot.lane.b32.xlu0 %v2749_v7, %s6098_s17  ;;  %v6379_v6 = vld [vmem:[#allocation27_spill] sm:$0xff]  ;;  %s4178_s17 = sld [smem:[#allocation9 + $0x1c]] }
 0x2db   :  { %6368 = sst [smem:[#allocation61_spill]] %s4114_s15  ;;  %v4118_v58 = vmul.f32 %v6369_v0, %v1302_v50  ;;  %v1381_v53 = vsel %vm1374_vm15, %v6372_v41, %v6371_v48  ;;  %6373 = vst [vmem:[#allocation25_spill] sm:$0xff] %v4127_v44  ;;  %v4137_v50 = vmul.f32 %v6376_v37, %v1342_v30  ;;  %v1382_v0 = vsel %vm1374_vm15, %v6371_v48, %v6372_v41  ;;  %v4148_v37 = vld [vmem:[#allocation8 + $0x31] ss:$8 sm:$0x3]  ;;  %s4257_s15 = sld [smem:[#allocation9 + $0x1f]] }
 0x2dc   :  { %6367 = vst [vmem:[#allocation127_spill] sm:$0xff] %v4104_v62  ;;  %6375 = vst [vmem:[#allocation24_spill] sm:$0xff] %v4133_v59  ;;  %v1130_v62 = vpop.permute.xlu1 %1129  ;;  %v6380_v54 = vld [vmem:[#allocation26_spill] sm:$0xff]  ;;  %1977 = vrot.lane.b32.xlu1 %v2737_v63, %s6331_s2  ;;  %s4193_s2 = sld [smem:[#allocation9 + $0x1d]] }
 0x2dd   :  { %6370 = vst [vmem:[#allocation128_spill] sm:$0xff] %v4118_v58  ;;  %6377 = vst [vmem:[#allocation129_spill] sm:$0xff] %v4137_v50  ;;  %v1421_v30 = vsel %vm1414_vm12, %v6380_v54, %v6379_v6  ;;  %v1422_v48 = vsel %vm1414_vm12, %v6379_v6, %v6380_v54  ;;  %v4160_v41 = vsel %vm1133_vm3, %v1130_v62, %v1132_v8  ;;  %v6384_v50 = vstv %s3294_s12  ;;  %v1253_v58 = vpop.permute.xlu0 %1252  ;;  %s6395_s12 = smov 80  }
 0x2de   :  { %6378 = vst [vmem:[#allocation130_spill] sm:$0xff] %v4148_v37  ;;  %6381 = vst [vmem:[#allocation27_spill] sm:$0xff] %v4160_v41  ;;  %v4164_v51 = vsel %vm1133_vm3, %v1132_v8, %v1130_v62  ;;  %v4168_v59 = vmul.f32 %v6384_v50, %v1381_v53  ;;  %v6386_v62 = vmov %v6384_v50  ;;  %v6388_v53 = vld [vmem:[#allocation29_spill] sm:$0xff]  ;;  %v6389_v50 = vld [vmem:[#allocation28_spill] sm:$0xff]  ;;  %2059 = vrot.lane.b32.xlu0 %v2756_v10, %s6395_s12  ;;  %vm1694_vm3 = vcmp.lt.s32.totalorder %v3254_v2, 98 }
 0x2df   :  { %6383 = vst [vmem:[#allocation26_spill] sm:$0xff] %v4164_v51  ;;  %v4182_v8 = vmul.f32 %v6386_v62, %v1382_v0  ;;  %v4191_v51 = vld [vmem:[#allocation8 + $0x32] ss:$8 sm:$0x3]  ;;  %v6391_v45 = vstv %s6382_s27  ;;  %v1462_v62 = vsel %vm6102_vm1, %v6388_v53, %v6389_v50  ;;  %s4230_s27 = sld [smem:[#allocation9 + $0x1e]]  ;;  %v6401_v6 = vstv %s3308_s13  ;;  %s6111_s13 = smov 79  }
 0x2e0   :  { %6385 = vst [vmem:[#allocation131_spill] sm:$0xff] %v4168_v59  ;;  %v1461_v59 = vsel %vm6102_vm1, %v6389_v50, %v6388_v53  ;;  %6390 = vst [vmem:[#allocation29_spill] sm:$0xff] %v4191_v51  ;;  %v4197_v54 = vmul.f32 %v6391_v45, %v1421_v30  ;;  %v6393_v44 = vmov %v6391_v45  ;;  %v1170_v41 = vpop.permute.xlu1 %1169  ;;  %v6397_v45 = vld [vmem:[#allocation31_spill] sm:$0xff]  ;;  %v6398_v30 = vld [vmem:[#allocation30_spill] sm:$0xff]  ;;  %vm246_vm1 = vcmp.lt.s32.totalorder %v3254_v2, 51  ;;  %2010 = vrot.lane.b32.xlu1 %v2742_v4, %s6359_s14 }
 0x2e1   :  { %6387 = vst [vmem:[#allocation132_spill] sm:$0xff] %v4182_v8  ;;  %v4201_v0 = vmul.f32 %v6393_v44, %v1422_v48  ;;  %v4211_v8 = vld [vmem:[#allocation8 + $0x33] ss:$8 sm:$0x3]  ;;  %v1501_v44 = vsel %vm1494_vm11, %v6398_v30, %v6397_v45  ;;  %v1502_v48 = vsel %vm1494_vm11, %v6397_v45, %v6398_v30  ;;  %v4224_v53 = vsel %vm1173_vm4, %v1170_v41, %v1172_v3  ;;  %v1293_v45 = vpop.permute.xlu0 %1292  ;;  %6408 = sst [smem:[#allocation64_spill]] %s4257_s15  ;;  %v6413_v51 = vld [vmem:[#allocation35_spill] sm:$0xff] }
 0x2e2   :  { %6392 = vst [vmem:[#allocation28_spill] sm:$0xff] %v4197_v54  ;;  %6396 = vst [vmem:[#allocation134_spill] sm:$0xff] %v4211_v8  ;;  %v4228_v50 = vsel %vm1173_vm4, %v1172_v3, %v1170_v41  ;;  %v6403_v41 = vmov %v6401_v6  ;;  %v4255_v30 = vld [vmem:[#allocation8 + $0x34] ss:$8 sm:$0x3]  ;;  %v6409_v54 = vstv %s3310_s5  ;;  %2092 = vrot.lane.b32.xlu0 %v2749_v7, %s6111_s13  ;;  %s6415_s5 = sld [smem:[#allocation71_spill]] }
 0x2e3   :  { %6394 = vst [vmem:[#allocation133_spill] sm:$0xff] %v4201_v0  ;;  %6399 = vst [vmem:[#allocation31_spill] sm:$0xff] %v4224_v53  ;;  %v4234_v0 = vmul.f32 %v6401_v6, %v1461_v59  ;;  %v4246_v37 = vmul.f32 %v6403_v41, %v1462_v62  ;;  %v6405_v53 = vld [vmem:[#allocation33_spill] sm:$0xff]  ;;  %v4261_v3 = vmul.f32 %v6409_v54, %v1501_v44  ;;  %v6411_v62 = vmov %v6409_v54  ;;  %v6414_v54 = vld [vmem:[#allocation34_spill] sm:$0xff]  ;;  %s4304_s13 = sld [smem:[#allocation9 + $0x20]]  ;;  %s4397_s15 = sld [smem:[#allocation9 + $0x23]] }
 0x2e4   :  { %6400 = vst [vmem:[#allocation30_spill] sm:$0xff] %v4228_v50  ;;  %v6406_v50 = vld [vmem:[#allocation32_spill] sm:$0xff]  ;;  %6407 = vst [vmem:[#allocation33_spill] sm:$0xff] %v4255_v30  ;;  %v4265_v41 = vmul.f32 %v6411_v62, %v1502_v48  ;;  %v1581_v44 = vsel %vm1574_vm10, %v6414_v54, %v6413_v51  ;;  %v1582_v48 = vsel %vm1574_vm10, %v6413_v51, %v6414_v54  ;;  %v4291_v62 = vld [vmem:[#allocation8 + $0x35] ss:$8 sm:$0x3]  ;;  %2017 = vrot.lane.b32.xlu1 %v2737_v63, %s6359_s14 }
 0x2e5   :  { %6402 = vst [vmem:[#allocation135_spill] sm:$0xff] %v4234_v0  ;;  %6404 = vst [vmem:[#allocation136_spill] sm:$0xff] %v4246_v37  ;;  %v1541_v59 = vsel %vm1534_vm0, %v6406_v50, %v6405_v53  ;;  %v1542_v6 = vsel %vm1534_vm0, %v6405_v53, %v6406_v50  ;;  %v1251_v37 = vpop.permute.xlu1 %1250  ;;  %v6419_v0 = vstv %s3316_s7  ;;  %v4319_v8 = vld [vmem:[#allocation8 + $0x36] ss:$8 sm:$0x3]  ;;  %s6430_s7 = smov 79  }
 0x2e6   :  { %6410 = vst [vmem:[#allocation32_spill] sm:$0xff] %v4261_v3  ;;  %6412 = vst [vmem:[#allocation137_spill] sm:$0xff] %v4265_v41  ;;  %v4285_v53 = vsel %vm1254_vm14, %v1251_v37, %v1253_v58  ;;  %v4289_v50 = vsel %vm1254_vm14, %v1253_v58, %v1251_v37  ;;  %v4295_v41 = vmul.f32 %v6419_v0, %v1541_v59  ;;  %v1333_v3 = vpop.permute.xlu0 %1332  ;;  %v6421_v58 = vmov %v6419_v0  ;;  %v6424_v0 = vld [vmem:[#allocation36_spill] sm:$0xff]  ;;  %v6432_v51 = vld [vmem:[#allocation39_spill] sm:$0xff]  ;;  %s4350_s14 = sld [smem:[#allocation9 + $0x21]] }
 0x2e7   :  { %6416 = vst [vmem:[#allocation35_spill] sm:$0xff] %v4285_v53  ;;  %6417 = vst [vmem:[#allocation34_spill] sm:$0xff] %v4289_v50  ;;  %v4308_v37 = vmul.f32 %v6421_v58, %v1542_v6  ;;  %v6423_v50 = vld [vmem:[#allocation37_spill] sm:$0xff]  ;;  %2099 = vrot.lane.b32.xlu0 %v2756_v10, %s6430_s7  ;;  %vm6501_vm4 = vcmp.lt.s32.totalorder %v3254_v2, 35 }
 0x2e8   :  { %6418 = vst [vmem:[#allocation138_spill] sm:$0xff] %v4291_v62  ;;  %6420 = vst [vmem:[#allocation139_spill] sm:$0xff] %v4295_v41  ;;  %v1621_v59 = vsel %vm1614_vm2, %v6424_v0, %v6423_v50  ;;  %v1622_v54 = vsel %vm1614_vm2, %v6423_v50, %v6424_v0  ;;  %v6426_v41 = vstv %s6415_s5  ;;  %v4335_v0 = vld [vmem:[#allocation8 + $0x37] ss:$8 sm:$0x3]  ;;  %v6436_v50 = vstv %s3329_s29  ;;  %2050 = vrot.lane.b32.xlu1 %v2742_v4, %s6395_s12  ;;  %s4366_s5 = sld [smem:[#allocation9 + $0x22]] }
 0x2e9   :  { %6422 = vst [vmem:[#allocation140_spill] sm:$0xff] %v4308_v37  ;;  %6425 = vst [vmem:[#allocation37_spill] sm:$0xff] %v4319_v8  ;;  %v4323_v30 = vmul.f32 %v6426_v41, %v1581_v44  ;;  %v6428_v6 = vmov %v6426_v41  ;;  %v1291_v37 = vpop.permute.xlu1 %1290  ;;  %v1661_v41 = vsel %vm1654_vm9, %v6433_v56, %v6432_v51  ;;  %v4354_v53 = vmul.f32 %v6436_v50, %v1621_v59  ;;  %v6440_v59 = vld [vmem:[#allocation46_spill] sm:$0xff]  ;;  %s2602_s29 = smov 78  }
 0x2ea   :  { %v4327_v58 = vmul.f32 %v6428_v6, %v1582_v48  ;;  %6431 = vst [vmem:[#allocation142_spill] sm:$0xff] %v4335_v0  ;;  %v4343_v44 = vsel %vm1294_vm5, %v1291_v37, %v1293_v45  ;;  %v4347_v48 = vsel %vm1294_vm5, %v1293_v45, %v1291_v37  ;;  %v1373_v62 = vpop.permute.xlu0 %1372  ;;  %v1662_v37 = vsel %vm1654_vm9, %v6432_v51, %v6433_v56  ;;  %vm6503_vm5 = vmmov %vm6501_vm4 }
 0x2eb   :  { %6427 = vst [vmem:[#allocation36_spill] sm:$0xff] %v4323_v30  ;;  %6434 = vst [vmem:[#allocation39_spill] sm:$0xff] %v4343_v44  ;;  %v6442_v6 = vstv %s3335_s28  ;;  %2132 = vrot.lane.b32.xlu0 %v2749_v7, %s2602_s29  ;;  %v6447_v44 = vld [vmem:[#allocation18_spill] sm:$0xff]  ;;  %v6451_v0 = vstv %s3335_s28  ;;  %s6463_s28 = sld [smem:[#allocation52_spill]] }
 0x2ec   :  { %6429 = vst [vmem:[#allocation141_spill] sm:$0xff] %v4327_v58  ;;  %6435 = vst [vmem:[#allocation38_spill] sm:$0xff] %v4347_v48  ;;  %v6438_v58 = vmov %v6436_v50  ;;  %v4381_v45 = vmul.f32 %v6442_v6, %v1661_v41  ;;  %v4395_v6 = vld [vmem:[#allocation8 + $0x40] ss:$8 sm:$0x3]  ;;  %v6448_v50 = vld [vmem:[#allocation42_spill] sm:$0xff]  ;;  %v4417_v48 = vmul.f32 %v6451_v0, %v1662_v37  ;;  %2057 = vrot.lane.b32.xlu1 %v2737_v63, %s6395_s12 }
 0x2ed   :  { %6437 = vst [vmem:[#allocation143_spill] sm:$0xff] %v4354_v53  ;;  %v4358_v30 = vmul.f32 %v6438_v58, %v1622_v54  ;;  %v6441_v54 = vld [vmem:[#allocation43_spill] sm:$0xff]  ;;  %v6445_v53 = vld [vmem:[#allocation40_spill] sm:$0xff]  ;;  %v1331_v51 = vpop.permute.xlu1 %1330  ;;  %v261_v5 = vsel %vm246_vm1, %v6447_v44, %v6448_v50  ;;  %s4535_s12 = sld [smem:[#allocation9 + $0x1]] }
 0x2ee   :  { %v335_v58 = vsel %vm333_vm6, %v6441_v54, %v6440_v59  ;;  %6443 = vst [vmem:[#allocation46_spill] sm:$0xff] %v4381_v45  ;;  %6446 = vst [vmem:[#allocation43_spill] sm:$0xff] %v4395_v6  ;;  %v4409_v45 = vsel %vm1334_vm13, %v1331_v51, %v1333_v3  ;;  %v4413_v41 = vsel %vm1334_vm13, %v1333_v3, %v1331_v51  ;;  %vm6490_vm13 = vcmp.lt.s32.totalorder %v3254_v2, 113 }
 0x2ef   :  { %6439 = vst [vmem:[#allocation144_spill] sm:$0xff] %v4358_v30  ;;  %v6444_v30 = vld [vmem:[#allocation41_spill] sm:$0xff]  ;;  %6450 = vst [vmem:[#allocation40_spill] sm:$0xff] %v4413_v41  ;;  %v345_v61 = vmul.f32 %v6453_v40, %v335_v58  ;;  %v4440_v40 = vld [vmem:[#allocation8 + $0x41] ss:$8 sm:$0x3]  ;;  %v6459_v58 = vstv %s3351_s9  ;;  %2139 = vrot.lane.b32.xlu0 %v2756_v10, %s2602_s29 }
 0x2f0   :  { %v1701_v8 = vsel %vm1694_vm3, %v6445_v53, %v6444_v30  ;;  %v1702_v56 = vsel %vm1694_vm3, %v6444_v30, %v6445_v53  ;;  %v262_v30 = vsel %vm246_vm1, %v6448_v50, %v6447_v44  ;;  %v334_v53 = vsel %vm333_vm6, %v6440_v59, %v6441_v54  ;;  %6449 = vst [vmem:[#allocation41_spill] sm:$0xff] %v4409_v45  ;;  %v1413_v59 = vpop.permute.xlu0 %1412  ;;  %v6461_v41 = vld [vmem:[#allocation45_spill] sm:$0xff]  ;;  %s4497_s9 = sld [smem:[#allocation9]]  ;;  %vm6492_vm14 = vmmov %vm6490_vm13 }
 0x2f1   :  { %6452 = vst [vmem:[#allocation18_spill] sm:$0xff] %v4417_v48  ;;  %v6454_v45 = vstv %s3345_s6  ;;  %6458 = vst [vmem:[#allocation146_spill] sm:$0xff] %v4440_v40  ;;  %v4444_v50 = vmul.f32 %v6459_v58, %v262_v30  ;;  %v6460_v48 = vstv %s3375_s16  ;;  %s4458_s6 = sld [smem:[#allocation9 + $0x24]]  ;;  %2090 = vrot.lane.b32.xlu1 %v2742_v4, %s6430_s7  ;;  %s2603_s16 = smov 77   ;;  %v6474_v40 = vld [vmem:[#allocation49_spill] sm:$0xff]  ;;  %vm6475_vm6 = vcmp.lt.s32.totalorder %v3254_v2, 46 }
 0x2f2   :  { %v4430_v3 = vmul.f32 %v6454_v45, %v1701_v8  ;;  %v6456_v51 = vmov %v6454_v45  ;;  %v346_v54 = vmul.f32 %v6460_v48, %v334_v53  ;;  %v374_v8 = vsel %vm373_vm7, %v6462_v36, %v6461_v41 }
 0x2f3   :  { %v4434_v0 = vmul.f32 %v6456_v51, %v1702_v56  ;;  %v375_v45 = vsel %vm373_vm7, %v6461_v41, %v6462_v36  ;;  %v1371_v56 = vpop.permute.xlu1 %1370  ;;  %v6464_v48 = vmov %v6459_v58  ;;  %v4473_v41 = vld [vmem:[#allocation8 + $0x42] ss:$8 sm:$0x3]  ;;  %v350_v58 = vadd.f32 %v3414_v13, %v345_v61  ;;  %v6472_v61 = vld [vmem:[#allocation50_spill] sm:$0xff]  ;;  %2172 = vrot.lane.b32.xlu0 %v2749_v7, %s2603_s16  ;;  %vm6480_vm7 = vmmov %vm6475_vm6 }
 0x2f4   :  { %6455 = vst [vmem:[#allocation42_spill] sm:$0xff] %v4430_v3  ;;  %v4462_v30 = vmul.f32 %v6464_v48, %v261_v5  ;;  %v4466_v53 = vsel %vm1374_vm15, %v1371_v56, %v1373_v62  ;;  %v4470_v51 = vsel %vm1374_vm15, %v1373_v62, %v1371_v56  ;;  %6467 = vst [vmem:[#allocation147_spill] sm:$0xff] %v4473_v41  ;;  %v1453_v44 = vpop.permute.xlu0 %1452  ;;  %v6469_v62 = vstv %s6463_s28  ;;  %v6471_v13 = vld [vmem:[#allocation47_spill] sm:$0xff]  ;;  %s6543_s28 = sld [smem:[#allocation56_spill]] }
 0x2f5   :  { %6457 = vst [vmem:[#allocation145_spill] sm:$0xff] %v4434_v0  ;;  %6465 = vst [vmem:[#allocation45_spill] sm:$0xff] %v4466_v53  ;;  %v4483_v0 = vld [vmem:[#allocation8 + $0x43] ss:$8 sm:$0x3]  ;;  %v385_v56 = vmul.f32 %v6469_v62, %v375_v45  ;;  %v6470_v36 = vmov %v6469_v62  ;;  %v414_v6 = vsel %vm413_vm8, %v6472_v61, %v6471_v13  ;;  %v415_v5 = vsel %vm413_vm8, %v6471_v13, %v6472_v61 }
 0x2f6   :  { %6466 = vst [vmem:[#allocation48_spill] sm:$0xff] %v4470_v51  ;;  %6468 = vst [vmem:[#allocation148_spill] sm:$0xff] %v4483_v0  ;;  %v386_v3 = vmul.f32 %v6470_v36, %v374_v8  ;;  %v351_v48 = vadd.f32 %v3425_v16, %v346_v54  ;;  %v6473_v62 = vld [vmem:[#allocation54_spill] sm:$0xff]  ;;  %v6478_v61 = vstv %s3421_s23  ;;  %2097 = vrot.lane.b32.xlu1 %v2737_v63, %s6430_s7  ;;  %vm6485_vm8 = vcmp.lt.s32.totalorder %v3254_v2, 45  ;;  %s4584_s23 = sld [smem:[#allocation9 + $0x25]]  ;;  %s6502_s7 = sld [smem:[#allocation53_spill]] }
 0x2f7   :  { %v1411_v37 = vpop.permute.xlu1 %1410  ;;  %v455_v13 = vsel %vm6475_vm6, %v6474_v40, %v6473_v62  ;;  %v425_v45 = vmul.f32 %v6478_v61, %v415_v5  ;;  %v6479_v8 = vmov %v6478_v61  ;;  %v454_v41 = vsel %vm6480_vm7, %v6473_v62, %v6474_v40  ;;  %v6483_v62 = vld [vmem:[#allocation59_spill] sm:$0xff]  ;;  %v6484_v61 = vld [vmem:[#allocation51_spill] sm:$0xff]  ;;  %2179 = vrot.lane.b32.xlu0 %v2756_v10, %s2603_s16 }
 0x2f8   :  { %v4513_v16 = vsel %vm1414_vm12, %v1411_v37, %v1413_v59  ;;  %v4517_v7 = vsel %vm1414_vm12, %v1413_v59, %v1411_v37  ;;  %v426_v36 = vmul.f32 %v6479_v8, %v414_v6  ;;  %v4533_v37 = vld [vmem:[#allocation8 + $0x44] ss:$8 sm:$0x3]  ;;  %v6482_v6 = vrot.slane %v3438_v49, %v2702_v34  ;;  %vm6488_vm12 = vmmov %vm6485_vm8 }
 0x2f9   :  { %6476 = vst [vmem:[#allocation47_spill] sm:$0xff] %v4513_v16  ;;  %6477 = vst [vmem:[#allocation50_spill] sm:$0xff] %v4517_v7  ;;  %v1493_v16 = vpop.permute.xlu0 %1492  ;;  %v390_v8 = vadd.f32 %v3429_v29, %v385_v56  ;;  %v391_v40 = vadd.f32 %v3446_v14, %v386_v3  ;;  %v495_v54 = vsel %vm6485_vm8, %v6484_v61, %v6483_v62  ;;  %v6487_v7 = vstv %s3471_s22  ;;  %s4599_s22 = sld [smem:[#allocation9 + $0x56]] }
 0x2fa   :  { %6481 = vst [vmem:[#allocation54_spill] sm:$0xff] %v4533_v37  ;;  %v4540_v5 = vmul.f32 %v6482_v6, %v350_v58  ;;  %v6486_v59 = vrot.slane %v3438_v49, %v3239_v11  ;;  %v465_v51 = vmul.f32 %v6487_v7, %v455_v13  ;;  %v494_v29 = vsel %vm6488_vm12, %v6483_v62, %v6484_v61  ;;  %v6500_v13 = vld [vmem:[#allocation57_spill] sm:$0xff] }
 0x2fb   :  { %v1451_v58 = vpop.permute.xlu1 %1450  ;;  %v6489_v3 = vmov %v6487_v7  ;;  %v4574_v7 = vld [vmem:[#allocation8] ss:$8 sm:$0x3]  ;;  %v430_v10 = vadd.f32 %v3459_v9, %v425_v45  ;;  %v6495_v62 = vstv %s3489_s24  ;;  %2130 = vrot.lane.b32.xlu1 %v2742_v4, %s2602_s29  ;;  %v6497_v9 = vrot.slane %v3487_v15, %v3239_v11  ;;  %s6521_s24 = sld [smem:[#allocation55_spill]] }
 0x2fc   :  { %v4551_v0 = vmul.f32 %v6486_v59, %v351_v48  ;;  %v466_v56 = vmul.f32 %v6489_v3, %v454_v41  ;;  %v4566_v49 = vsel %vm6490_vm13, %v1451_v58, %v1453_v44  ;;  %v4570_v48 = vsel %vm6492_vm14, %v1453_v44, %v1451_v58  ;;  %v6494_v59 = vld [vmem:[#allocation80_spill] sm:$0xff]  ;;  %v6499_v3 = vld [vmem:[#allocation63_spill] sm:$0xff] }
 0x2fd   :  { %6491 = vst [vmem:[#allocation49_spill] sm:$0xff] %v4566_v49  ;;  %6493 = vst [vmem:[#allocation59_spill] sm:$0xff] %v4570_v48  ;;  %v431_v6 = vadd.f32 %v6494_v59, %v426_v36  ;;  %v505_v61 = vmul.f32 %v6495_v62, %v495_v54  ;;  %v1533_v41 = vpop.permute.xlu0 %1532  ;;  %v6496_v44 = vrot.slane %v3487_v15, %v2702_v34  ;;  %v6498_v36 = vmov %v6495_v62  ;;  %v6533_v49 = vld [vmem:[#allocation75_spill] sm:$0xff] }
 0x2fe   :  { %v4594_v45 = vmul.f32 %v6497_v9, %v391_v40  ;;  %v506_v54 = vmul.f32 %v6498_v36, %v494_v29  ;;  %v470_v62 = vadd.f32 %v3493_v18, %v465_v51  ;;  %v535_v14 = vsel %vm6501_vm4, %v6500_v13, %v6499_v3  ;;  %v4623_v9 = vld [vmem:[#allocation8 + $0x1] ss:$8 sm:$0x3] }
 0x2ff   :  { %v4589_v58 = vmul.f32 %v6496_v44, %v390_v8  ;;  %v1491_v8 = vpop.permute.xlu1 %1490  ;;  %v471_v29 = vadd.f32 %v3497_v60, %v466_v56  ;;  %v534_v18 = vsel %vm6503_vm5, %v6499_v3, %v6500_v13  ;;  %v6506_v36 = vrot.slane %v3505_v23, %v2702_v34  ;;  %v6508_v13 = vld [vmem:[#allocation82_spill] sm:$0xff]  ;;  %2137 = vrot.lane.b32.xlu1 %v2737_v63, %s2602_s29  ;;  %s4691_s29 = sld [smem:[#allocation9 + $0x26]] }
 0x300   :  { %v4617_v51 = vsel %vm1494_vm11, %v1491_v8, %v1493_v16  ;;  %v4621_v44 = vsel %vm1494_vm11, %v1493_v16, %v1491_v8  ;;  %v6507_v56 = vrot.slane %v3505_v23, %v3239_v11  ;;  %v510_v3 = vadd.f32 %v6508_v13, %v505_v61  ;;  %v6509_v8 = vld [vmem:[#allocation83_spill] sm:$0xff] }
 0x301   :  { %6504 = vst [vmem:[#allocation51_spill] sm:$0xff] %v4617_v51  ;;  %6505 = vst [vmem:[#allocation80_spill] sm:$0xff] %v4621_v44  ;;  %v4628_v60 = vmul.f32 %v6506_v36, %v430_v10  ;;  %v1573_v15 = vpop.permute.xlu0 %1572  ;;  %v511_v59 = vadd.f32 %v6509_v8, %v506_v54  ;;  %v6510_v37 = vstv %s6502_s7  ;;  %v6511_v10 = vld [vmem:[#allocation62_spill] sm:$0xff]  ;;  %vm6513_vm11 = vcmp.lt.s32.totalorder %v3254_v2, 34  ;;  %s4740_s7 = sld [smem:[#allocation9 + $0x27]] }
 0x302   :  { %v4633_v40 = vmul.f32 %v6507_v56, %v431_v6  ;;  %v545_v44 = vmul.f32 %v6510_v37, %v535_v14  ;;  %v6512_v36 = vld [vmem:[#allocation69_spill] sm:$0xff]  ;;  %vm6514_vm15 = vmmov %vm6513_vm11  ;;  %v6515_v61 = vrot.slane %v3551_v25, %v2702_v34  ;;  %v6516_v13 = vmov %v6510_v37 }
 0x303   :  { %v574_v23 = vsel %vm6513_vm11, %v6512_v36, %v6511_v10  ;;  %v575_v6 = vsel %vm6514_vm15, %v6511_v10, %v6512_v36  ;;  %v546_v54 = vmul.f32 %v6516_v13, %v534_v18  ;;  %v1531_v8 = vpop.permute.xlu1 %1530  ;;  %v6517_v16 = vrot.slane %v3551_v25, %v3239_v11  ;;  %v6518_v10 = vld [vmem:[#allocation73_spill] sm:$0xff]  ;;  %v6519_v36 = vld [vmem:[#allocation65_spill] sm:$0xff]  ;;  %2170 = vrot.lane.b32.xlu1 %v2742_v4, %s2603_s16 }
 0x304   :  { %v4653_v56 = vmul.f32 %v6515_v61, %v470_v62  ;;  %vm6520_vm6 = vcmp.lt.s32.totalorder %v3254_v2, 33  ;;  %v4672_v18 = vsel %vm1534_vm0, %v1531_v8, %v1533_v41  ;;  %v4676_v61 = vsel %vm1534_vm0, %v1533_v41, %v1531_v8 }
 0x305   :  { %v4664_v51 = vmul.f32 %v6517_v16, %v471_v29  ;;  %v615_v62 = vsel %vm6520_vm6, %v6519_v36, %v6518_v10  ;;  %6522 = vst [vmem:[#allocation63_spill] sm:$0xff] %v4672_v18  ;;  %6523 = vst [vmem:[#allocation57_spill] sm:$0xff] %v4676_v61  ;;  %v6524_v13 = vstv %s3553_s18  ;;  %v1613_v16 = vpop.permute.xlu0 %1612  ;;  %v4689_v18 = vld [vmem:[#allocation8 + $0x45] ss:$8 sm:$0x3]  ;;  %v6528_v41 = vrot.slane %v3570_v1, %v2702_v34  ;;  %v6532_v61 = vld [vmem:[#allocation72_spill] sm:$0xff] }
 0x306   :  { %v585_v14 = vmul.f32 %v6524_v13, %v575_v6  ;;  %v6525_v25 = vmov %v6524_v13  ;;  %vm6526_vm7 = vmmov %vm6520_vm6  ;;  %6527 = vst [vmem:[#allocation82_spill] sm:$0xff] %v4689_v18  ;;  %v6530_v13 = vld [vmem:[#allocation84_spill] sm:$0xff]  ;;  %vm6534_vm0 = vcmp.lt.s32.totalorder %v3254_v2, 32  ;;  %s4716_s18 = sld [smem:[#allocation9 + $0x57]]  ;;  %vm6542_vm12 = vcmp.lt.s32.totalorder %v3254_v2, 31 }
 0x307   :  { %v586_v37 = vmul.f32 %v6525_v25, %v574_v23  ;;  %v614_v29 = vsel %vm6526_vm7, %v6518_v10, %v6519_v36  ;;  %v4696_v6 = vmul.f32 %v6528_v41, %v510_v3  ;;  %v6529_v23 = vrot.slane %v3570_v1, %v3239_v11  ;;  %vm6535_vm8 = vmmov %vm6534_vm0  ;;  %2177 = vrot.lane.b32.xlu1 %v2737_v63, %s2603_s16  ;;  %s4794_s16 = sld [smem:[#allocation9 + $0x28]] }
 0x308   :  { %v550_v10 = vadd.f32 %v3529_v17, %v545_v44  ;;  %v551_v4 = vadd.f32 %v6530_v13, %v546_v54  ;;  %v6531_v25 = vstv %s6521_s24  ;;  %v654_v53 = vsel %vm6534_vm0, %v6533_v49, %v6532_v61  ;;  %v6541_v13 = vld [vmem:[#allocation74_spill] sm:$0xff]  ;;  %s4815_s24 = sld [smem:[#allocation9 + $0x59]] }
 0x309   :  { %v4701_v8 = vmul.f32 %v6529_v23, %v511_v59  ;;  %v625_v48 = vmul.f32 %v6531_v25, %v615_v62  ;;  %v655_v1 = vsel %vm6535_vm8, %v6532_v61, %v6533_v49  ;;  %v1571_v59 = vpop.permute.xlu1 %1570  ;;  %v6536_v17 = vmov %v6531_v25  ;;  %v6539_v23 = vld [vmem:[#allocation85_spill] sm:$0xff]  ;;  %v6540_v61 = vld [vmem:[#allocation79_spill] sm:$0xff]  ;;  %v1653_v25 = vpop.permute.xlu0 %1652 }
 0x30a   :  { %v626_v44 = vmul.f32 %v6536_v17, %v614_v29  ;;  %v4722_v3 = vsel %vm1574_vm10, %v1571_v59, %v1573_v15  ;;  %v4726_v54 = vsel %vm1574_vm10, %v1573_v15, %v1571_v59  ;;  %v590_v41 = vadd.f32 %v3557_v12, %v585_v14  ;;  %vm6546_vm10 = vmmov %vm6542_vm12  ;;  %v6548_v62 = vld [vmem:[#allocation77_spill] sm:$0xff] }
 0x30b   :  { %6537 = vst [vmem:[#allocation83_spill] sm:$0xff] %v4722_v3  ;;  %6538 = vst [vmem:[#allocation62_spill] sm:$0xff] %v4726_v54  ;;  %v591_v49 = vadd.f32 %v6539_v23, %v586_v37  ;;  %v695_v29 = vsel %vm6542_vm12, %v6541_v13, %v6540_v61  ;;  %v6544_v59 = vstv %s3617_s25  ;;  %v694_v14 = vsel %vm6546_vm10, %v6540_v61, %v6541_v13  ;;  %v6547_v23 = vld [vmem:[#allocation81_spill] sm:$0xff]  ;;  %s4769_s25 = sld [smem:[#allocation9 + $0x58]]  ;;  %v6604_v3 = vld [vmem:[#allocation100_spill] sm:$0xff] }
 0x30c   :  { %v665_v17 = vmul.f32 %v6544_v59, %v655_v1  ;;  %v6545_v12 = vmov %v6544_v59  ;;  %vm6549_vm13 = vcmp.lt.s32.totalorder %v3254_v2, 30  ;;  %v6550_v15 = vrot.slane %v3615_v35, %v2702_v34 }
 0x30d   :  { %v666_v37 = vmul.f32 %v6545_v12, %v654_v53  ;;  %v735_v63 = vsel %vm6549_vm13, %v6548_v62, %v6547_v23  ;;  %v6551_v53 = vrot.slane %v3615_v35, %v3239_v11  ;;  %v630_v59 = vadd.f32 %v3592_v26, %v625_v48  ;;  %vm6552_vm14 = vmmov %vm6549_vm13  ;;  %v1611_v13 = vpop.permute.xlu1 %1610  ;;  %v6553_v12 = vld [vmem:[#allocation88_spill] sm:$0xff]  ;;  %v4782_v48 = vld [vmem:[#allocation8 + $0x46] ss:$8 sm:$0x3] }
 0x30e   :  { %v4757_v36 = vmul.f32 %v6550_v15, %v550_v10  ;;  %v734_v61 = vsel %vm6552_vm14, %v6547_v23, %v6548_v62  ;;  %v631_v18 = vadd.f32 %v6553_v12, %v626_v44  ;;  %v6554_v10 = vstv %s6543_s28  ;;  %6557 = vst [vmem:[#allocation65_spill] sm:$0xff] %v4782_v48  ;;  %v1693_v12 = vpop.permute.xlu0 %1692  ;;  %s4866_s28 = sld [smem:[#allocation9 + $0x5a]] }
 0x30f   :  { %v4762_v1 = vmul.f32 %v6551_v53, %v551_v4  ;;  %v705_v15 = vmul.f32 %v6554_v10, %v695_v29  ;;  %v4776_v35 = vsel %vm1614_vm2, %v1611_v13, %v1613_v16  ;;  %v4780_v26 = vsel %vm1614_vm2, %v1613_v16, %v1611_v13 }
 0x310   :  { %6555 = vst [vmem:[#allocation69_spill] sm:$0xff] %v4776_v35  ;;  %6556 = vst [vmem:[#allocation73_spill] sm:$0xff] %v4780_v26  ;;  %v6558_v4 = vrot.slane %v3634_v28, %v2702_v34  ;;  %v6559_v23 = vmov %v6554_v10  ;;  %v6560_v53 = vstv %s3681_s8  ;;  %v6561_v35 = vrot.slane %v3634_v28, %v3239_v11  ;;  %v6562_v26 = vld [vmem:[#allocation89_spill] sm:$0xff]  ;;  %s4855_s8 = sld [smem:[#allocation9 + $0x29]] }
 0x311   :  { %v706_v44 = vmul.f32 %v6559_v23, %v694_v14  ;;  %v745_v29 = vmul.f32 %v6560_v53, %v735_v63  ;;  %v670_v13 = vadd.f32 %v3621_v33, %v665_v17  ;;  %v671_v54 = vadd.f32 %v6562_v26, %v666_v37  ;;  %v1651_v23 = vpop.permute.xlu1 %1650  ;;  %v6569_v26 = vld [vmem:[#allocation92_spill] sm:$0xff]  ;;  %v6574_v10 = vld [vmem:[#allocation93_spill] sm:$0xff] }
 0x312   :  { %v4787_v62 = vmul.f32 %v6558_v4, %v590_v41  ;;  %v4799_v16 = vmul.f32 %v6561_v35, %v591_v49  ;;  %v6563_v41 = vmov %v6560_v53  ;;  %v6564_v14 = vrot.slane %v3679_v39, %v2702_v34  ;;  %v4831_v35 = vld [vmem:[#allocation8 + $0x47] ss:$8 sm:$0x3]  ;;  %v4838_v33 = vpop.permute.xlu0 %1732 }
 0x313   :  { %v746_v4 = vmul.f32 %v6563_v41, %v734_v61  ;;  %v6565_v49 = vrot.slane %v3679_v39, %v3239_v11  ;;  %v710_v37 = vadd.f32 %v3656_v31, %v705_v15  ;;  %v4829_v61 = vsel %vm1654_vm9, %v1653_v25, %v1651_v23  ;;  %6568 = vst [vmem:[#allocation75_spill] sm:$0xff] %v4831_v35  ;;  %v6579_v53 = vld [vmem:[#allocation90_spill] sm:$0xff]  ;;  %v6593_v35 = vld [vmem:[#allocation97_spill] sm:$0xff] }
 0x314   :  { %v4808_v63 = vmul.f32 %v6564_v14, %v630_v59  ;;  %v4825_v59 = vsel %vm1654_vm9, %v1651_v23, %v1653_v25  ;;  %6567 = vst [vmem:[#allocation72_spill] sm:$0xff] %v4829_v61  ;;  %v711_v41 = vadd.f32 %v6569_v26, %v706_v44  ;;  %v750_v39 = vadd.f32 %v3685_v38, %v745_v29  ;;  %v6575_v26 = vld [vmem:[#allocation86_spill] sm:$0xff] }
 0x315   :  { %v4820_v17 = vmul.f32 %v6565_v49, %v631_v18  ;;  %6566 = vst [vmem:[#allocation84_spill] sm:$0xff] %v4825_v59  ;;  %v6570_v18 = vld [vmem:[#allocation87_spill] sm:$0xff]  ;;  %v6571_v14 = vstv %s3728_s4  ;;  %v6572_v15 = vrot.slane %v3698_v27, %v2702_v34  ;;  %v6573_v25 = vrot.slane %v3698_v27, %v3239_v11  ;;  %s5047_s4 = sld [smem:[#allocation9 + $0x2b]] }
 0x316   :  { %v785_v49 = vmul.f32 %v6571_v14, %v6570_v18  ;;  %v751_v44 = vadd.f32 %v6574_v10, %v746_v4  ;;  %v6576_v38 = vmov %v6571_v14  ;;  %v6577_v18 = vld [vmem:[#allocation91_spill] sm:$0xff]  ;;  %v6578_v14 = vstv %s3745_s26  ;;  %s4917_s26 = sld [smem:[#allocation9 + $0x2a]] }
 0x317   :  { %v4844_v28 = vmul.f32 %v6572_v15, %v670_v13  ;;  %v4849_v23 = vmul.f32 %v6573_v25, %v671_v54  ;;  %v786_v29 = vmul.f32 %v6576_v38, %v6575_v26  ;;  %v825_v31 = vmul.f32 %v6578_v14, %v6577_v18  ;;  %v1691_v15 = vpop.permute.xlu1 %1690  ;;  %v4883_v25 = vld [vmem:[#allocation8 + $0x50] ss:$8 sm:$0x3] }
 0x318   :  { %v6580_v48 = vmov %v6578_v14  ;;  %v6581_v54 = vrot.slane %v3743_v43, %v2702_v34  ;;  %v4875_v4 = vsel %vm1694_vm3, %v1691_v15, %v1693_v12  ;;  %6584 = vst [vmem:[#allocation74_spill] sm:$0xff] %v4883_v25  ;;  %v6585_v26 = vrot.slane %v3743_v43, %v3239_v11  ;;  %v4896_v14 = vpop.permute.xlu0 %1739 }
 0x319   :  { %v826_v13 = vmul.f32 %v6580_v48, %v6579_v53  ;;  %6582 = vst [vmem:[#allocation85_spill] sm:$0xff] %v4875_v4  ;;  %v4879_v48 = vsel %vm1694_vm3, %v1693_v12, %v1691_v15  ;;  %v790_v12 = vadd.f32 %v3720_v19, %v785_v49  ;;  %vm1734_vm9 = vcmp.lt.s32.totalorder %v3254_v2, 97  ;;  %v6589_v53 = vld [vmem:[#allocation95_spill] sm:$0xff] }
 0x31a   :  { %v4871_v10 = vmul.f32 %v6581_v54, %v710_v37  ;;  %6583 = vst [vmem:[#allocation79_spill] sm:$0xff] %v4879_v48  ;;  %v4888_v38 = vmul.f32 %v6585_v26, %v711_v41  ;;  %v6586_v37 = vrot.slane %v3762_v22, %v2702_v34  ;;  %v6587_v54 = vrot.slane %v3762_v22, %v3239_v11  ;;  %v6588_v41 = vld [vmem:[#allocation96_spill] sm:$0xff] }
 0x31b   :  { %v791_v26 = vadd.f32 %v6588_v41, %v786_v29  ;;  %v6590_v27 = vstv %s3792_s19  ;;  %v830_v49 = vadd.f32 %v3749_v42, %v825_v31  ;;  %v831_v48 = vadd.f32 %v6593_v35, %v826_v13  ;;  %v243_v15 = vpop.permute.xlu1 %242  ;;  %v6597_v41 = vld [vmem:[#allocation19_spill] sm:$0xff]  ;;  %v4931_v35 = vld [vmem:[#allocation8 + $0x51] ss:$8 sm:$0x3]  ;;  %s6631_s19 = sld [smem:[#allocation58_spill]] }
 0x31c   :  { %v4893_v18 = vmul.f32 %v6586_v37, %v750_v39  ;;  %v4903_v43 = vmul.f32 %v6587_v54, %v751_v44  ;;  %v865_v39 = vmul.f32 %v6590_v27, %v6589_v53  ;;  %v6591_v37 = vld [vmem:[#allocation94_spill] sm:$0xff]  ;;  %v6592_v61 = vmov %v6590_v27  ;;  %6598 = vst [vmem:[#allocation81_spill] sm:$0xff] %v4931_v35 }
 0x31d   :  { %v866_v19 = vmul.f32 %v6592_v61, %v6591_v37  ;;  %v6594_v44 = vstv %s3809_s30  ;;  %v6595_v54 = vld [vmem:[#allocation98_spill] sm:$0xff]  ;;  %v247_v42 = vsel %vm246_vm1, %v6597_v41, %v243_v15  ;;  %v248_v61 = vsel %vm246_vm1, %v243_v15, %v6597_v41  ;;  %v6603_v41 = vld [vmem:[#allocation99_spill] sm:$0xff]  ;;  %s4954_s30 = sld [smem:[#allocation9 + $0x5b]] }
 0x31e   :  { %v905_v29 = vmul.f32 %v6594_v44, %v3780_v57  ;;  %v6596_v27 = vmov %v6594_v44  ;;  %v6599_v31 = vrot.slane %v3807_v47, %v2702_v34  ;;  %v6600_v57 = vstv %s4497_s9  ;;  %s5127_s9 = sld [smem:[#allocation9 + $0x5d]] }
 0x31f   :  { %v906_v53 = vmul.f32 %v6596_v27, %v6595_v54  ;;  %v265_v37 = vmul.f32 %v6600_v57, %v248_v61  ;;  %v6601_v44 = vmov %v6600_v57  ;;  %v4942_v27 = vpop.permute.xlu0 %1772  ;;  %v6602_v4 = vrot.slane %v3807_v47, %v3239_v11 }
 0x320   :  { %v4936_v13 = vmul.f32 %v6599_v31, %v790_v12  ;;  %v266_v54 = vmul.f32 %v6601_v44, %v247_v42  ;;  %v870_v59 = vadd.f32 %v6603_v41, %v865_v39  ;;  %v871_v12 = vadd.f32 %v6604_v3, %v866_v19  ;;  %v6607_v19 = vld [vmem:[#allocation101_spill] sm:$0xff]  ;;  %v6608_v41 = vld [vmem:[#allocation44_spill] sm:$0xff] }
 0x321   :  { %v4949_v15 = vmul.f32 %v6602_v4, %v791_v26  ;;  %v6605_v42 = vrot.slane %v3826_v20, %v2702_v34  ;;  %v6606_v57 = vrot.slane %v3826_v20, %v3239_v11  ;;  %v292_v4 = vpop.permute.xlu1 %291  ;;  %v910_v39 = vadd.f32 %v3813_v32, %v905_v29 }
 0x322   :  { %v911_v44 = vadd.f32 %v6607_v19, %v906_v53  ;;  %vm6609_vm1 = vcmp.lt.s32.totalorder %v3254_v2, 50  ;;  %vm1774_vm3 = vcmp.lt.s32.totalorder %v3254_v2, 96  ;;  %v6613_v29 = vrot.slane %v3871_v52, %v2702_v34 }
 0x323   :  { %v4959_v61 = vmul.f32 %v6605_v42, %v830_v49  ;;  %v4964_v47 = vmul.f32 %v6606_v57, %v831_v48  ;;  %v294_v49 = vsel %vm6609_vm1, %v6608_v41, %v292_v4  ;;  %vm6610_vm2 = vmmov %vm6609_vm1  ;;  %v270_v48 = vadd.f32 %v4444_v50, %v265_v37  ;;  %v4983_v32 = vpop.permute.xlu0 %1779 }
 0x324   :  { %v295_v20 = vsel %vm6610_vm2, %v292_v4, %v6608_v41  ;;  %v271_v42 = vadd.f32 %v4462_v30, %v266_v54  ;;  %v6611_v57 = vstv %s4535_s12  ;;  %v4989_v53 = vmul.f32 %v6613_v29, %v870_v59  ;;  %v6616_v54 = vld [vmem:[#allocation102_spill] sm:$0xff]  ;;  %s5149_s12 = sld [smem:[#allocation9 + $0x2d]] }
 0x325   :  { %v305_v22 = vmul.f32 %v6611_v57, %v295_v20  ;;  %v6612_v3 = vmov %v6611_v57  ;;  %v6614_v4 = vrot.slane %v3871_v52, %v3239_v11  ;;  %v6615_v50 = vstv %s3856_s20  ;;  %v6619_v57 = vld [vmem:[#allocation78_spill] sm:$0xff]  ;;  %v1731_v29 = vpop.permute.xlu1 %1730  ;;  %s5070_s20 = sld [smem:[#allocation9 + $0x5c]] }
 0x326   :  { %v306_v31 = vmul.f32 %v6612_v3, %v294_v49  ;;  %v945_v30 = vmul.f32 %v6615_v50, %v3844_v24  ;;  %v6617_v3 = vmov %v6615_v50  ;;  %v6618_v49 = vld [vmem:[#allocation76_spill] sm:$0xff]  ;;  %v6621_v24 = vrot.slane %v3890_v46, %v3239_v11 }
 0x327   :  { %v4994_v19 = vmul.f32 %v6614_v4, %v871_v12  ;;  %v946_v41 = vmul.f32 %v6617_v3, %v6616_v54  ;;  %v310_v20 = vadd.f32 %v6618_v49, %v305_v22  ;;  %v6620_v12 = vrot.slane %v3890_v46, %v2702_v34  ;;  %v5023_v54 = vld [vmem:[#allocation8 + $0x52] ss:$8 sm:$0x3] }
 0x328   :  { %v311_v59 = vadd.f32 %v6619_v57, %v306_v31  ;;  %v5015_v50 = vmul.f32 %v6621_v24, %v911_v44  ;;  %v1735_v22 = vsel %vm1734_vm9, %v1731_v29, %v4838_v33  ;;  %v1736_v31 = vsel %vm1734_vm9, %v4838_v33, %v1731_v29  ;;  %6622 = vst [vmem:[#allocation77_spill] sm:$0xff] %v5023_v54  ;;  %v5037_v29 = vpop.permute.xlu0 %1812  ;;  %v6627_v24 = vld [vmem:[#allocation103_spill] sm:$0xff] }
 0x329   :  { %v5010_v4 = vmul.f32 %v6620_v12, %v910_v39  ;;  %v6623_v3 = vrot.slane %v4574_v7, %v2702_v34  ;;  %v6624_v46 = vrot.slane %v4574_v7, %v3239_v11  ;;  %v6625_v49 = vrot.slane %v4623_v9, %v2702_v34 }
 0x32a   :  { %v6626_v12 = vrot.slane %v4623_v9, %v3239_v11  ;;  %v950_v37 = vadd.f32 %v6627_v24, %v945_v30  ;;  %v6628_v52 = vstv %s3873_s1  ;;  %s5086_s1 = sld [smem:[#allocation9 + $0x2c]]  ;;  %v6683_v54 = vstv %s4065_s10  ;;  %s5237_s10 = sld [smem:[#allocation9 + $0x5f]] }
 0x32b   :  { %v283_v39 = vmul.f32 %v6623_v3, %v270_v48  ;;  %v284_v44 = vmul.f32 %v6624_v46, %v271_v42  ;;  %v323_v57 = vmul.f32 %v6625_v49, %v310_v20  ;;  %v985_v48 = vmul.f32 %v6628_v52, %v3908_v21  ;;  %v6630_v20 = vld [vmem:[#allocation104_spill] sm:$0xff]  ;;  %v6638_v3 = vld [vmem:[#allocation114_spill] sm:$0xff] }
 0x32c   :  { %v324_v33 = vmul.f32 %v6626_v12, %v311_v59  ;;  %v6629_v7 = vmov %v6628_v52  ;;  %v951_v46 = vadd.f32 %v6630_v20, %v946_v41  ;;  %v1738_v59 = vpop.permute.xlu1 %1737  ;;  %v6632_v12 = vstv %s4584_s23  ;;  %v5068_v20 = vpop.permute.xlu0 %1819  ;;  %s5213_s23 = sld [smem:[#allocation9 + $0x2e]] }
 0x32d   :  { %v986_v42 = vmul.f32 %v6629_v7, %v3904_v55  ;;  %v325_v49 = vadd.f32 %v323_v57, %v283_v39  ;;  %v1746_v24 = vmul.f32 %v6632_v12, %v1735_v22  ;;  %v6633_v21 = vmov %v6632_v12 }
 0x32e   :  { %v326_v9 = vadd.f32 %v324_v33, %v284_v44  ;;  %v1747_v52 = vmul.f32 %v6633_v21, %v1736_v31  ;;  %v1741_v55 = vsel %vm1734_vm9, %v1738_v59, %v4896_v14  ;;  %v1742_v41 = vsel %vm1734_vm9, %v4896_v14, %v1738_v59  ;;  %v6636_v31 = vld [vmem:[#allocation105_spill] sm:$0xff]  ;;  %v6637_v21 = vld [vmem:[#allocation106_spill] sm:$0xff] }
 0x32f   :  { %v365_v39 = vadd.f32 %v4540_v5, %v325_v49  ;;  %v6634_v57 = vstv %s4599_s22  ;;  %v990_v12 = vadd.f32 %v6636_v31, %v985_v48  ;;  %v991_v30 = vadd.f32 %v6637_v21, %v986_v42  ;;  %v6640_v5 = vld [vmem:[#allocation113_spill] sm:$0xff]  ;;  %v6642_v48 = vld [vmem:[#allocation122_spill] sm:$0xff]  ;;  %s6686_s22 = sld [smem:[#allocation61_spill]] }
 0x330   :  { %v366_v44 = vadd.f32 %v4551_v0, %v326_v9  ;;  %v1749_v33 = vmul.f32 %v6634_v57, %v1741_v55  ;;  %v6635_v7 = vmov %v6634_v57  ;;  %v6639_v14 = vstv %s6631_s19  ;;  %v1771_v57 = vpop.permute.xlu1 %1770  ;;  %v6644_v31 = vld [vmem:[#allocation121_spill] sm:$0xff]  ;;  %s5332_s19 = sld [smem:[#allocation9 + $0x30]] }
 0x331   :  { %v1750_v22 = vmul.f32 %v6635_v7, %v1742_v41  ;;  %v1025_v59 = vmul.f32 %v6639_v14, %v6638_v3  ;;  %v6641_v49 = vmov %v6639_v14  ;;  %v405_v0 = vadd.f32 %v4589_v58, %v365_v39 }
 0x332   :  { %v1026_v26 = vmul.f32 %v6641_v49, %v6640_v5  ;;  %v406_v9 = vadd.f32 %v4594_v45, %v366_v44  ;;  %v5082_v55 = vadd.f32 %v1749_v33, %v1746_v24  ;;  %v6643_v42 = vstv %s3937_s3  ;;  %v6646_v24 = vld [vmem:[#allocation109_spill] sm:$0xff]  ;;  %s6648_s3 = sld [smem:[#allocation60_spill]]  ;;  %v6650_v49 = vld [vmem:[#allocation112_spill] sm:$0xff] }
 0x333   :  { %v5084_v41 = vadd.f32 %v1750_v22, %v1747_v52  ;;  %v1065_v7 = vmul.f32 %v6643_v42, %v6642_v48  ;;  %v6645_v3 = vmov %v6643_v42  ;;  %v5097_v58 = vsel %vm1774_vm3, %v1771_v57, %v4942_v27  ;;  %v5111_v22 = vpop.permute.xlu0 %1852  ;;  %v6654_v42 = vld [vmem:[#allocation108_spill] sm:$0xff] }
 0x334   :  { %v1066_v21 = vmul.f32 %v6645_v3, %v6644_v31  ;;  %v5102_v45 = vsel %vm1774_vm3, %v4942_v27, %v1771_v57  ;;  %v6647_v52 = vrot.slane %v6646_v24, %v2702_v34  ;;  %v445_v44 = vadd.f32 %v4628_v60, %v405_v0  ;;  %v6652_v60 = vld [vmem:[#allocation107_spill] sm:$0xff] }
 0x335   :  { %v446_v33 = vadd.f32 %v4633_v40, %v406_v9  ;;  %v6649_v27 = vrot.slane %v6646_v24, %v3239_v11  ;;  %v1030_v40 = vadd.f32 %v6652_v60, %v1025_v59  ;;  %v6653_v9 = vrot.slane %v6650_v49, %v3239_v11  ;;  %v5139_v24 = vld [vmem:[#allocation8 + $0x53] ss:$8 sm:$0x3]  ;;  %v6656_v59 = vld [vmem:[#allocation110_spill] sm:$0xff] }
 0x336   :  { %v5107_v39 = vmul.f32 %v6647_v52, %v950_v37  ;;  %v6651_v37 = vrot.slane %v6650_v49, %v2702_v34  ;;  %v485_v31 = vadd.f32 %v4653_v56, %v445_v44  ;;  %6655 = vst [vmem:[#allocation88_spill] sm:$0xff] %v5139_v24  ;;  %v1070_v52 = vadd.f32 %v6656_v59, %v1065_v7  ;;  %v6658_v60 = vld [vmem:[#allocation22_spill] sm:$0xff]  ;;  %v6682_v24 = vld [vmem:[#allocation35_spill] sm:$0xff] }
 0x337   :  { %v5118_v5 = vmul.f32 %v6649_v27, %v951_v46  ;;  %v5132_v48 = vmul.f32 %v6653_v9, %v991_v30  ;;  %v1031_v46 = vadd.f32 %v6654_v42, %v1026_v26  ;;  %v486_v3 = vadd.f32 %v4664_v51, %v446_v33  ;;  %v6657_v27 = vld [vmem:[#allocation111_spill] sm:$0xff]  ;;  %v6660_v30 = vld [vmem:[#allocation23_spill] sm:$0xff]  ;;  %v6662_v56 = vld [vmem:[#allocation26_spill] sm:$0xff]  ;;  %v5156_v0 = vpop.permute.xlu0 %1859 }
 0x338   :  { %v5123_v57 = vmul.f32 %v6651_v37, %v990_v12  ;;  %v5137_v12 = vpop.permute.xlu1 %1777  ;;  %v1071_v37 = vadd.f32 %v6657_v27, %v1066_v21  ;;  %v6659_v49 = vstv %s6648_s3  ;;  %v6663_v44 = vstv %s4001_s0  ;;  %v6664_v21 = vld [vmem:[#allocation117_spill] sm:$0xff]  ;;  %s5195_s0 = sld [smem:[#allocation9 + $0x5e]]  ;;  %s6731_s3 = sld [smem:[#allocation64_spill]] }
 0x339   :  { %v1105_v14 = vmul.f32 %v6659_v49, %v6658_v60  ;;  %v6661_v9 = vmov %v6659_v49  ;;  %v1145_v51 = vmul.f32 %v6663_v44, %v6662_v56  ;;  %v525_v33 = vadd.f32 %v4696_v6, %v485_v31  ;;  %v6666_v60 = vld [vmem:[#allocation27_spill] sm:$0xff] }
 0x33a   :  { %v1106_v26 = vmul.f32 %v6661_v9, %v6660_v30  ;;  %v526_v42 = vadd.f32 %v4701_v8, %v486_v3  ;;  %v6665_v59 = vrot.slane %v6664_v21, %v2702_v34  ;;  %v6667_v49 = vmov %v6663_v44  ;;  %v6675_v44 = vld [vmem:[#allocation118_spill] sm:$0xff]  ;;  %v6676_v9 = vld [vmem:[#allocation30_spill] sm:$0xff] }
 0x33b   :  { %v1146_v30 = vmul.f32 %v6667_v49, %v6666_v60  ;;  %v6668_v8 = vrot.slane %v6664_v21, %v3239_v11  ;;  %v565_v3 = vadd.f32 %v4757_v36, %v525_v33  ;;  %v6672_v36 = vld [vmem:[#allocation115_spill] sm:$0xff]  ;;  %v1150_v6 = vadd.f32 %v6675_v44, %v1145_v51  ;;  %v6684_v51 = vld [vmem:[#allocation34_spill] sm:$0xff] }
 0x33c   :  { %v5162_v27 = vmul.f32 %v6665_v59, %v1030_v40  ;;  %v566_v40 = vadd.f32 %v4762_v1, %v526_v42  ;;  %v5178_v56 = vpop.permute.xlu1 %1810  ;;  %v6669_v59 = vld [vmem:[#allocation120_spill] sm:$0xff]  ;;  %v1110_v33 = vadd.f32 %v6672_v36, %v1105_v14  ;;  %v6677_v7 = vstv %s4050_s21  ;;  %v6680_v36 = vld [vmem:[#allocation31_spill] sm:$0xff]  ;;  %s5269_s21 = sld [smem:[#allocation9 + $0x2f]] }
 0x33d   :  { %v5174_v31 = vmul.f32 %v6668_v8, %v1031_v46  ;;  %v6670_v60 = vrot.slane %v6669_v59, %v2702_v34  ;;  %v6671_v21 = vrot.slane %v6669_v59, %v3239_v11  ;;  %v6673_v8 = vld [vmem:[#allocation116_spill] sm:$0xff]  ;;  %v1266_v35 = vmul.f32 %v6683_v54, %v6682_v24 }
 0x33e   :  { %v1111_v1 = vadd.f32 %v6673_v8, %v1106_v26  ;;  %v5193_v42 = vld [vmem:[#allocation8 + $0x54] ss:$8 sm:$0x3]  ;;  %v606_v59 = vadd.f32 %v4799_v16, %v566_v40  ;;  %v6681_v26 = vmov %v6677_v7  ;;  %vm1814_vm4 = vcmp.lt.s32.totalorder %v3254_v2, 95 }
 0x33f   :  { %v5184_v49 = vmul.f32 %v6670_v60, %v1070_v52  ;;  %v5189_v46 = vmul.f32 %v6671_v21, %v1071_v37  ;;  %6674 = vst [vmem:[#allocation89_spill] sm:$0xff] %v5193_v42  ;;  %v1185_v52 = vmul.f32 %v6677_v7, %v6676_v9  ;;  %v605_v60 = vadd.f32 %v4787_v62, %v565_v3  ;;  %v5203_v37 = vpop.permute.xlu0 %1892  ;;  %v6679_v21 = vld [vmem:[#allocation119_spill] sm:$0xff]  ;;  %v6687_v40 = vld [vmem:[#allocation21_spill] sm:$0xff] }
 0x340   :  { %6678 = vst [vmem:[#allocation92_spill] sm:$0xff] %v5203_v37  ;;  %v1151_v14 = vadd.f32 %v6679_v21, %v1146_v30  ;;  %v1186_v8 = vmul.f32 %v6681_v26, %v6680_v36  ;;  %v6685_v7 = vmov %v6683_v54  ;;  %v646_v16 = vadd.f32 %v4820_v17, %v606_v59  ;;  %v5220_v3 = vpop.permute.xlu1 %1817  ;;  %v6692_v26 = vld [vmem:[#allocation123_spill] sm:$0xff] }
 0x341   :  { %v1267_v9 = vmul.f32 %v6685_v7, %v6684_v51  ;;  %v645_v62 = vadd.f32 %v4808_v63, %v605_v60  ;;  %v6688_v44 = vrot.slane %v6687_v40, %v2702_v34  ;;  %v6689_v24 = vrot.slane %v6687_v40, %v3239_v11  ;;  %v6690_v60 = vld [vmem:[#allocation126_spill] sm:$0xff]  ;;  %v5249_v40 = vld [vmem:[#allocation8 + $0x55] ss:$8 sm:$0x3]  ;;  %v6696_v63 = vld [vmem:[#allocation20_spill] sm:$0xff] }
 0x342   :  { %v6691_v59 = vrot.slane %v6690_v60, %v2702_v34  ;;  %6693 = vst [vmem:[#allocation87_spill] sm:$0xff] %v5249_v40  ;;  %v1271_v30 = vadd.f32 %v6696_v63, %v1266_v35  ;;  %vm1854_vm5 = vcmp.lt.s32.totalorder %v3254_v2, 94  ;;  %vm1894_vm11 = vcmp.lt.s32.totalorder %v3254_v2, 93 }
 0x343   :  { %v5227_v54 = vmul.f32 %v6688_v44, %v1110_v33  ;;  %v5232_v21 = vmul.f32 %v6689_v24, %v1111_v1  ;;  %v1190_v33 = vadd.f32 %v6692_v26, %v1185_v52  ;;  %v685_v51 = vadd.f32 %v4844_v28, %v645_v62  ;;  %v5247_v7 = vpop.permute.xlu0 %1899  ;;  %v6697_v52 = vld [vmem:[#allocation39_spill] sm:$0xff]  ;;  %v6699_v28 = vld [vmem:[#allocation125_spill] sm:$0xff] }
 0x344   :  { %v5242_v36 = vmul.f32 %v6691_v59, %v1150_v6  ;;  %v686_v1 = vadd.f32 %v4849_v23, %v646_v16  ;;  %v6694_v44 = vrot.slane %v6690_v60, %v3239_v11  ;;  %v6695_v6 = vld [vmem:[#allocation124_spill] sm:$0xff]  ;;  %v6698_v26 = vstv %s6686_s22  ;;  %v6700_v23 = vld [vmem:[#allocation38_spill] sm:$0xff]  ;;  %v5267_v60 = vpop.permute.xlu1 %1850 }
 0x345   :  { %v1191_v59 = vadd.f32 %v6695_v6, %v1186_v8  ;;  %v1306_v17 = vmul.f32 %v6698_v26, %v6697_v52  ;;  %v1272_v62 = vadd.f32 %v6699_v28, %v1267_v9  ;;  %v6701_v16 = vmov %v6698_v26  ;;  %v6704_v6 = vld [vmem:[#allocation25_spill] sm:$0xff] }
 0x346   :  { %v5254_v24 = vmul.f32 %v6694_v44, %v1151_v14  ;;  %v1307_v25 = vmul.f32 %v6701_v16, %v6700_v23  ;;  %v725_v42 = vadd.f32 %v4871_v10, %v685_v51  ;;  %v726_v37 = vadd.f32 %v4888_v38, %v686_v1  ;;  %v6702_v14 = vld [vmem:[#allocation41_spill] sm:$0xff]  ;;  %v6706_v38 = vld [vmem:[#allocation40_spill] sm:$0xff] }
 0x347   :  { %v6703_v8 = vstv %s4129_s11  ;;  %v6705_v10 = vrot.slane %v6704_v6, %v2702_v34  ;;  %v5289_v23 = vpop.permute.xlu0 %1932  ;;  %v5291_v16 = vld [vmem:[#allocation8 + $0x56] ss:$8 sm:$0x3]  ;;  %s5305_s11 = sld [smem:[#allocation9 + $0x60]]  ;;  %v6718_v44 = vstv %s4178_s17  ;;  %s5347_s17 = sld [smem:[#allocation9 + $0x61]]  ;;  %vm1934_vm15 = vcmp.lt.s32.totalorder %v3254_v2, 83 }
 0x348   :  { %v1346_v35 = vmul.f32 %v6703_v8, %v6702_v14  ;;  %v6707_v1 = vmov %v6703_v8  ;;  %v765_v26 = vadd.f32 %v4893_v18, %v725_v42  ;;  %v766_v28 = vadd.f32 %v4903_v43, %v726_v37  ;;  %6708 = vst [vmem:[#allocation93_spill] sm:$0xff] %v5289_v23  ;;  %6709 = vst [vmem:[#allocation86_spill] sm:$0xff] %v5291_v16  ;;  %v6715_v9 = vld [vmem:[#allocation128_spill] sm:$0xff] }
 0x349   :  { %v5282_v51 = vmul.f32 %v6705_v10, %v1190_v33  ;;  %v1347_v52 = vmul.f32 %v6707_v1, %v6706_v38  ;;  %v6710_v14 = vrot.slane %v6704_v6, %v3239_v11  ;;  %v6711_v33 = vld [vmem:[#allocation130_spill] sm:$0xff]  ;;  %v6713_v1 = vld [vmem:[#allocation127_spill] sm:$0xff]  ;;  %v1312_v6 = vadd.f32 %v6715_v9, %v1307_v25  ;;  %v6741_v16 = vld [vmem:[#allocation132_spill] sm:$0xff] }
 0x34a   :  { %v6712_v10 = vrot.slane %v6711_v33, %v2702_v34  ;;  %v1311_v18 = vadd.f32 %v6713_v1, %v1306_v17  ;;  %v6714_v43 = vrot.slane %v6711_v33, %v3239_v11  ;;  %v6717_v1 = vld [vmem:[#allocation45_spill] sm:$0xff]  ;;  %v6719_v33 = vld [vmem:[#allocation129_spill] sm:$0xff]  ;;  %v6720_v25 = vld [vmem:[#allocation48_spill] sm:$0xff]  ;;  %v6721_v9 = vmov %v6718_v44 }
 0x34b   :  { %v5296_v8 = vmul.f32 %v6710_v14, %v1191_v59  ;;  %v805_v59 = vadd.f32 %v4936_v13, %v765_v26  ;;  %v806_v14 = vadd.f32 %v4949_v15, %v766_v28  ;;  %v1386_v42 = vmul.f32 %v6718_v44, %v6717_v1  ;;  %v5330_v26 = vpop.permute.xlu0 %1939 }
 0x34c   :  { %v5301_v38 = vmul.f32 %v6712_v10, %v1271_v30  ;;  %v5310_v37 = vmul.f32 %v6714_v43, %v1272_v62  ;;  %v5315_v30 = vpop.permute.xlu1 %1857  ;;  %v6716_v10 = vld [vmem:[#allocation24_spill] sm:$0xff]  ;;  %v1352_v43 = vadd.f32 %v6719_v33, %v1347_v52  ;;  %v1387_v40 = vmul.f32 %v6721_v9, %v6720_v25  ;;  %6722 = vst [vmem:[#allocation91_spill] sm:$0xff] %v5330_v26  ;;  %v6727_v33 = vld [vmem:[#allocation50_spill] sm:$0xff] }
 0x34d   :  { %v1351_v17 = vadd.f32 %v6716_v10, %v1346_v35  ;;  %v845_v13 = vadd.f32 %v4959_v61, %v805_v59  ;;  %v846_v15 = vadd.f32 %v4964_v47, %v806_v14  ;;  %v6723_v35 = vld [vmem:[#allocation29_spill] sm:$0xff]  ;;  %v6725_v10 = vld [vmem:[#allocation47_spill] sm:$0xff]  ;;  %v6726_v52 = vstv %s4193_s2 }
 0x34e   :  { %v6724_v44 = vrot.slane %v6723_v35, %v2702_v34  ;;  %v1426_v1 = vmul.f32 %v6726_v52, %v6725_v10  ;;  %v6728_v25 = vmov %v6726_v52  ;;  %v6729_v47 = vrot.slane %v6723_v35, %v3239_v11  ;;  %v5359_v52 = vld [vmem:[#allocation8 + $0x57] ss:$8 sm:$0x3]  ;;  %v6735_v35 = vld [vmem:[#allocation131_spill] sm:$0xff] }
 0x34f   :  { %v1427_v9 = vmul.f32 %v6728_v25, %v6727_v33  ;;  %v885_v14 = vadd.f32 %v4989_v53, %v845_v13  ;;  %6732 = vst [vmem:[#allocation96_spill] sm:$0xff] %v5359_v52  ;;  %v6733_v33 = vld [vmem:[#allocation134_spill] sm:$0xff]  ;;  %v6737_v62 = vstv %s4230_s27  ;;  %v6738_v13 = vld [vmem:[#allocation59_spill] sm:$0xff]  ;;  %v1392_v23 = vadd.f32 %v6741_v16, %v1387_v40 }
 0x350   :  { %v5337_v28 = vmul.f32 %v6724_v44, %v1311_v18  ;;  %v5352_v59 = vmul.f32 %v6729_v47, %v1312_v6  ;;  %v886_v18 = vadd.f32 %v4994_v19, %v846_v15  ;;  %v5356_v44 = vpop.permute.xlu1 %1890  ;;  %v6734_v25 = vrot.slane %v6733_v33, %v2702_v34  ;;  %v6736_v47 = vld [vmem:[#allocation49_spill] sm:$0xff] }
 0x351   :  { %6730 = vst [vmem:[#allocation90_spill] sm:$0xff] %v5356_v44  ;;  %v1391_v6 = vadd.f32 %v6735_v35, %v1386_v42  ;;  %v1466_v53 = vmul.f32 %v6737_v62, %v6736_v47  ;;  %v6739_v63 = vmov %v6737_v62  ;;  %v6740_v15 = vrot.slane %v6733_v33, %v3239_v11  ;;  %v6743_v42 = vld [vmem:[#allocation28_spill] sm:$0xff]  ;;  %v6744_v44 = vld [vmem:[#allocation133_spill] sm:$0xff]  ;;  %v6745_v33 = vld [vmem:[#allocation51_spill] sm:$0xff] }
 0x352   :  { %v5364_v61 = vmul.f32 %v6734_v25, %v1351_v17  ;;  %v1467_v19 = vmul.f32 %v6739_v63, %v6738_v13  ;;  %v925_v26 = vadd.f32 %v5010_v4, %v885_v14  ;;  %v926_v17 = vadd.f32 %v5015_v50, %v886_v18  ;;  %v5381_v25 = vpop.permute.xlu0 %1972 }
 0x353   :  { %v5376_v10 = vmul.f32 %v6740_v15, %v1352_v43  ;;  %6742 = vst [vmem:[#allocation95_spill] sm:$0xff] %v5381_v25  ;;  %v1431_v35 = vadd.f32 %v6743_v42, %v1426_v1  ;;  %v1432_v62 = vadd.f32 %v6744_v44, %v1427_v9  ;;  %v6746_v43 = vstv %s6731_s3  ;;  %v6747_v15 = vld [vmem:[#allocation80_spill] sm:$0xff]  ;;  %v5398_v1 = vld [vmem:[#allocation8 + $0x60] ss:$8 sm:$0x3] }
 0x354   :  { %v1506_v13 = vmul.f32 %v6746_v43, %v6745_v33  ;;  %v6748_v40 = vmov %v6746_v43  ;;  %v965_v4 = vadd.f32 %v5107_v39, %v925_v26  ;;  %v966_v50 = vadd.f32 %v5118_v5, %v926_v17  ;;  %v5396_v14 = vpop.permute.xlu1 %1897  ;;  %6749 = vst [vmem:[#allocation94_spill] sm:$0xff] %v5398_v1  ;;  %v6750_v9 = vld [vmem:[#allocation33_spill] sm:$0xff]  ;;  %v6752_v42 = vld [vmem:[#allocation135_spill] sm:$0xff] }
 0x355   :  { %v1507_v16 = vmul.f32 %v6748_v40, %v6747_v15  ;;  %v6751_v18 = vrot.slane %v6750_v9, %v2702_v34  ;;  %v1471_v63 = vadd.f32 %v6752_v42, %v1466_v53  ;;  %v6753_v33 = vld [vmem:[#allocation136_spill] sm:$0xff]  ;;  %v6754_v39 = vrot.slane %v6750_v9, %v3239_v11  ;;  %v6771_v53 = vld [vmem:[#allocation62_spill] sm:$0xff] }
 0x356   :  { %v1472_v43 = vadd.f32 %v6753_v33, %v1467_v19  ;;  %v1005_v26 = vadd.f32 %v5123_v57, %v965_v4  ;;  %v1006_v17 = vadd.f32 %v5132_v48, %v966_v50  ;;  %v6756_v19 = vld [vmem:[#allocation138_spill] sm:$0xff]  ;;  %v6759_v48 = vld [vmem:[#allocation32_spill] sm:$0xff]  ;;  %v6760_v50 = vld [vmem:[#allocation137_spill] sm:$0xff]  ;;  %v6779_v25 = vstv %s4397_s15  ;;  %s2605_s15 = smov [#allocation10]  }
 0x357   :  { %v5403_v44 = vmul.f32 %v6751_v18, %v1391_v6  ;;  %v5412_v5 = vmul.f32 %v6754_v39, %v1392_v23  ;;  %v5416_v6 = vpop.permute.xlu0 %1979  ;;  %v6757_v40 = vrot.slane %v6756_v19, %v2702_v34  ;;  %v6758_v23 = vrot.slane %v6756_v19, %v3239_v11  ;;  %s2268_s2 = sshll.u32 %s2605_s15, 4  ;;  %s2269_s2 = int_to_ptr.vmem [resolvable:$true] %s2268_s2 }
 0x358   :  { %6755 = vst [vmem:[#allocation97_spill] sm:$0xff] %v5416_v6  ;;  %v1511_v4 = vadd.f32 %v6759_v48, %v1506_v13  ;;  %v1512_v33 = vadd.f32 %v6760_v50, %v1507_v16  ;;  %v1046_v39 = vadd.f32 %v5174_v31, %v1006_v17  ;;  %v6765_v13 = vld [vmem:[#allocation63_spill] sm:$0xff]  ;;  %v6766_v48 = vstv %s4304_s13  ;;  %v6767_v50 = vld [vmem:[#allocation57_spill] sm:$0xff]  ;;  %s2518_s27 = scalar_lea.vmem %s2269_s2, 256  ;;  %p2523_p2 = scmp.lt.s32.totalorder %s2269_s2, %s2269_s2 }
 0x359   :  { %v5422_v18 = vmul.f32 %v6757_v40, %v1431_v35  ;;  %v5427_v9 = vmul.f32 %v6758_v23, %v1432_v62  ;;  %v1045_v35 = vadd.f32 %v5162_v27, %v1005_v26  ;;  %v5436_v40 = vpop.permute.xlu1 %1930  ;;  %v6762_v62 = vld [vmem:[#allocation37_spill] sm:$0xff]  ;;  %v1546_v16 = vmul.f32 %v6766_v48, %v6765_v13  ;;  %v6769_v26 = vld [vmem:[#allocation83_spill] sm:$0xff]  ;;  %p2519_p1 = scmp.ne.s32.totalorder %s2269_s2, %s2518_s27  ;;  %p2524_p3 = scmp.lt.s32.totalorder %s2518_s27, %s2518_s27 }
 0x35a   :  { %6761 = vst [vmem:[#allocation98_spill] sm:$0xff] %v5436_v40  ;;  %v6763_v19 = vrot.slane %v6762_v62, %v2702_v34  ;;  %v6764_v57 = vrot.slane %v6762_v62, %v3239_v11  ;;  %v6768_v42 = vmov %v6766_v48  ;;  %v6770_v31 = vstv %s4350_s14  ;;  %v6776_v48 = vld [vmem:[#allocation73_spill] sm:$0xff] }
 0x35b   :  { %v1547_v27 = vmul.f32 %v6768_v42, %v6767_v50  ;;  %v1586_v17 = vmul.f32 %v6770_v31, %v6769_v26  ;;  %v6772_v47 = vmov %v6770_v31  ;;  %v1086_v62 = vadd.f32 %v5189_v46, %v1046_v39  ;;  %v6778_v50 = vld [vmem:[#allocation84_spill] sm:$0xff]  ;;  %p2525_p4 = por %p2524_p3, %p2523_p2 }
 0x35c   :  { %v5441_v23 = vmul.f32 %v6763_v19, %v1471_v63  ;;  %v5446_v15 = vmul.f32 %v6764_v57, %v1472_v43  ;;  %v1587_v52 = vmul.f32 %v6772_v47, %v6771_v53  ;;  %v1085_v63 = vadd.f32 %v5184_v49, %v1045_v35  ;;  %v5462_v43 = vpop.permute.xlu0 %2012  ;;  %v6774_v57 = vld [vmem:[#allocation69_spill] sm:$0xff]  ;;  %v6780_v31 = vld [vmem:[#allocation72_spill] sm:$0xff] }
 0x35d   :  { %6773 = vst [vmem:[#allocation19_spill] sm:$0xff] %v5462_v43  ;;  %v6775_v19 = vstv %s4366_s5  ;;  %v1666_v26 = vmul.f32 %v6779_v25, %v6778_v50  ;;  %v6781_v6 = vmov %v6779_v25  ;;  %v6782_v53 = vld [vmem:[#allocation142_spill] sm:$0xff]  ;;  %v5489_v25 = vpop.permute.xlu1 %1937  ;;  %v6792_v43 = vld [vmem:[#allocation79_spill] sm:$0xff]  ;;  %vm1974_vm6 = vcmp.lt.s32.totalorder %v3254_v2, 82  ;;  %p2526_p5 = pnand %p2525_p4, %p2519_p1 }
 0x35e   :  { %v1626_v13 = vmul.f32 %v6775_v19, %v6774_v57  ;;  %v6777_v1 = vmov %v6775_v19  ;;  %v1667_v47 = vmul.f32 %v6781_v6, %v6780_v31  ;;  %v6783_v49 = vrot.slane %v6782_v53, %v2702_v34  ;;  %6787 = vst [vmem:[#allocation101_spill] sm:$0xff] %v5489_v25  ;;  %v6788_v19 = vld [vmem:[#allocation139_spill] sm:$0xff]  ;;  %v6790_v31 = vld [vmem:[#allocation85_spill] sm:$0xff] }
 0x35f   :  { %v1627_v42 = vmul.f32 %v6777_v1, %v6776_v48  ;;  %v6785_v46 = vrot.slane %v6782_v53, %v3239_v11  ;;  %v1125_v57 = vadd.f32 %v5227_v54, %v1085_v63  ;;  %v1126_v1 = vadd.f32 %v5232_v21, %v1086_v62  ;;  %v6789_v48 = vld [vmem:[#allocation140_spill] sm:$0xff]  ;;  %v6796_v25 = vld [vmem:[#allocation143_spill] sm:$0xff] }
 0x360   :  { %v5479_v35 = vmul.f32 %v6783_v49, %v1511_v4  ;;  %v1551_v6 = vadd.f32 %v6788_v19, %v1546_v16  ;;  %v1552_v50 = vadd.f32 %v6789_v48, %v1547_v27  ;;  %v6791_v4 = vstv %s4458_s6  ;;  %v5503_v62 = vpop.permute.xlu0 %2019  ;;  %v6797_v19 = vld [vmem:[#allocation144_spill] sm:$0xff]  ;;  %v6798_v48 = vld [vmem:[#allocation46_spill] sm:$0xff] }
 0x361   :  { %v5484_v39 = vmul.f32 %v6785_v46, %v1512_v33  ;;  %v1706_v49 = vmul.f32 %v6791_v4, %v6790_v31  ;;  %v6793_v40 = vmov %v6791_v4  ;;  %v6794_v33 = vld [vmem:[#allocation36_spill] sm:$0xff]  ;;  %v1165_v21 = vadd.f32 %v5242_v36, %v1125_v57  ;;  %v6799_v31 = vld [vmem:[#allocation18_spill] sm:$0xff] }
 0x362   :  { %6784 = vst [vmem:[#allocation99_spill] sm:$0xff] %v5479_v35  ;;  %v1707_v53 = vmul.f32 %v6793_v40, %v6792_v43  ;;  %v1591_v46 = vadd.f32 %v6794_v33, %v1586_v17  ;;  %v1166_v63 = vadd.f32 %v5254_v24, %v1126_v1  ;;  %v1631_v16 = vadd.f32 %v6796_v25, %v1626_v13  ;;  %v5520_v17 = vpop.permute.xlu1 %1970  ;;  %v6800_v43 = vld [vmem:[#allocation43_spill] sm:$0xff] }
 0x363   :  { %6786 = vst [vmem:[#allocation100_spill] sm:$0xff] %v5484_v39  ;;  %v6795_v39 = vld [vmem:[#allocation141_spill] sm:$0xff]  ;;  %v1632_v27 = vadd.f32 %v6797_v19, %v1627_v42  ;;  %v1671_v35 = vadd.f32 %v6798_v48, %v1666_v26  ;;  %v1672_v4 = vadd.f32 %v6799_v31, %v1667_v47  ;;  %v1205_v40 = vadd.f32 %v5282_v51, %v1165_v21  ;;  %v6805_v1 = vld [vmem:[#allocation146_spill] sm:$0xff] }
 0x364   :  { %v1592_v54 = vadd.f32 %v6795_v39, %v1587_v52  ;;  %v1206_v52 = vadd.f32 %v5296_v8, %v1166_v63  ;;  %v1781_v36 = vsel %vm1774_vm3, %v5137_v12, %v4983_v32  ;;  %v1782_v24 = vsel %vm1774_vm3, %v4983_v32, %v5137_v12  ;;  %v6803_v26 = vld [vmem:[#allocation42_spill] sm:$0xff]  ;;  %v6809_v63 = vld [vmem:[#allocation70_spill] sm:$0xff]  ;;  %v5546_v19 = vpop.permute.xlu0 %2052 }
 0x365   :  { %v6801_v13 = vrot.slane %v6800_v43, %v2702_v34  ;;  %v6802_v8 = vrot.slane %v6800_v43, %v3239_v11  ;;  %v1711_v47 = vadd.f32 %v6803_v26, %v1706_v49  ;;  %v6804_v39 = vld [vmem:[#allocation145_spill] sm:$0xff]  ;;  %v6806_v25 = vrot.slane %v6805_v1, %v2702_v34  ;;  %v6810_v49 = vld [vmem:[#allocation147_spill] sm:$0xff] }
 0x366   :  { %v1712_v57 = vadd.f32 %v6804_v39, %v1707_v53  ;;  %v6807_v12 = vrot.slane %v6805_v1, %v3239_v11  ;;  %v6811_v53 = vrot.slane %v6810_v49, %v2702_v34  ;;  %vm2014_vm7 = vcmp.lt.s32.totalorder %v3254_v2, 81 }
 0x367   :  { %v5525_v51 = vmul.f32 %v6801_v13, %v1551_v6  ;;  %v5530_v42 = vmul.f32 %v6802_v8, %v1552_v50  ;;  %v5537_v32 = vmul.f32 %v6806_v25, %v1591_v46  ;;  %v6808_v6 = vld [vmem:[#allocation67_spill] sm:$0xff]  ;;  %v1247_v50 = vadd.f32 %v6809_v63, %v1206_v52 }
 0x368   :  { %v5542_v33 = vmul.f32 %v6807_v12, %v1592_v54  ;;  %v1246_v21 = vadd.f32 %v6808_v6, %v1205_v40  ;;  %v5551_v48 = vmul.f32 %v6811_v53, %v1631_v16  ;;  %v6812_v46 = vrot.slane %v6810_v49, %v3239_v11  ;;  %v6815_v40 = vld [vmem:[#allocation148_spill] sm:$0xff] }
 0x369   :  { %v6813_v54 = vstv %s4716_s18  ;;  %v6816_v26 = vrot.slane %v6815_v40, %v2702_v34  ;;  %v6817_v39 = vrot.slane %v6815_v40, %v3239_v11  ;;  %v1287_v25 = vadd.f32 %v5310_v37, %v1247_v50 }
 0x36a   :  { %v5556_v31 = vmul.f32 %v6812_v46, %v1632_v27  ;;  %v1789_v43 = vmul.f32 %v6813_v54, %v1781_v36  ;;  %v6814_v13 = vmov %v6813_v54  ;;  %v1286_v16 = vadd.f32 %v5301_v38, %v1246_v21  ;;  %v5575_v27 = vpop.permute.xlu1 %1977  ;;  %v6818_v36 = vld [vmem:[#allocation54_spill] sm:$0xff]  ;;  %v5622_v46 = vpop.permute.xlu0 %2059 }
 0x36b   :  { %v1790_v8 = vmul.f32 %v6814_v13, %v1782_v24  ;;  %v5565_v52 = vmul.f32 %v6816_v26, %v1671_v35  ;;  %v5570_v1 = vmul.f32 %v6817_v39, %v1672_v4  ;;  %v6819_v24 = vrot.slane %v6818_v36, %v2702_v34 }
 0x36c   :  { %v6820_v35 = vrot.slane %v6818_v36, %v3239_v11  ;;  %v6821_v4 = vstv %s4691_s29  ;;  %v1326_v21 = vadd.f32 %v5337_v28, %v1286_v16  ;;  %v1327_v50 = vadd.f32 %v5352_v59, %v1287_v25 }
 0x36d   :  { %v5580_v12 = vmul.f32 %v6819_v24, %v1711_v47  ;;  %v1786_v63 = vmul.f32 %v6821_v4, %v5097_v58  ;;  %v6822_v38 = vmov %v6821_v4  ;;  %v1821_v47 = vsel %vm1814_vm4, %v5220_v3, %v5068_v20 }
 0x36e   :  { %v5585_v6 = vmul.f32 %v6820_v35, %v1712_v57  ;;  %v1787_v37 = vmul.f32 %v6822_v38, %v5102_v45  ;;  %v1822_v57 = vsel %vm1814_vm4, %v5068_v20, %v5220_v3  ;;  %v1815_v28 = vsel %vm1814_vm4, %v5178_v56, %v5037_v29  ;;  %v6832_v38 = vld [vmem:[#allocation65_spill] sm:$0xff] }
 0x36f   :  { %v1791_v58 = vadd.f32 %v1789_v43, %v1786_v63  ;;  %v1816_v59 = vsel %vm1814_vm4, %v5037_v29, %v5178_v56  ;;  %v1366_v49 = vadd.f32 %v5364_v61, %v1326_v21  ;;  %v1367_v20 = vadd.f32 %v5376_v10, %v1327_v50  ;;  %v5624_v29 = vpop.permute.xlu1 %2010  ;;  %v6823_v56 = vld [vmem:[#allocation82_spill] sm:$0xff] }
 0x370   :  { %v1792_v45 = vadd.f32 %v1790_v8, %v1787_v37  ;;  %v1861_v3 = vsel %vm1854_vm5, %v5315_v30, %v5156_v0  ;;  %v1862_v53 = vsel %vm1854_vm5, %v5156_v0, %v5315_v30  ;;  %v6824_v61 = vrot.slane %v6823_v56, %v2702_v34 }
 0x371   :  { %v6825_v54 = vrot.slane %v6823_v56, %v3239_v11  ;;  %v6826_v13 = vstv %s4769_s25  ;;  %v1406_v30 = vadd.f32 %v5403_v44, %v1366_v49  ;;  %v1407_v26 = vadd.f32 %v5412_v5, %v1367_v20 }
 0x372   :  { %v5630_v10 = vmul.f32 %v6824_v61, %v5082_v55  ;;  %v1829_v8 = vmul.f32 %v6826_v13, %v1821_v47  ;;  %v6827_v40 = vmov %v6826_v13  ;;  %v1855_v55 = vsel %vm1854_vm5, %v5267_v60, %v5111_v22  ;;  %v6837_v61 = vld [vmem:[#allocation92_spill] sm:$0xff]  ;;  %v6839_v13 = vld [vmem:[#allocation99_spill] sm:$0xff] }
 0x373   :  { %v5636_v43 = vmul.f32 %v6825_v54, %v5084_v41  ;;  %v1830_v0 = vmul.f32 %v6827_v40, %v1822_v57  ;;  %v1856_v41 = vsel %vm1854_vm5, %v5111_v22, %v5267_v60  ;;  %v6828_v39 = vstv %s4740_s7  ;;  %v5673_v50 = vpop.permute.xlu1 %2017  ;;  %v6838_v54 = vld [vmem:[#allocation90_spill] sm:$0xff]  ;;  %v6840_v40 = vld [vmem:[#allocation100_spill] sm:$0xff] }
 0x374   :  { %v1826_v16 = vmul.f32 %v6828_v39, %v1815_v28  ;;  %v6829_v25 = vmov %v6828_v39  ;;  %v6830_v24 = vstv %s4815_s24  ;;  %v1446_v5 = vadd.f32 %v5422_v18, %v1406_v30 }
 0x375   :  { %v1827_v36 = vmul.f32 %v6829_v25, %v1816_v59  ;;  %v1869_v35 = vmul.f32 %v6830_v24, %v1861_v3  ;;  %v6831_v44 = vmov %v6830_v24  ;;  %v1447_v63 = vadd.f32 %v5427_v9, %v1407_v26  ;;  %v5689_v3 = vpop.permute.xlu0 %2092  ;;  %v6846_v24 = vld [vmem:[#allocation98_spill] sm:$0xff] }
 0x376   :  { %v1870_v4 = vmul.f32 %v6831_v44, %v1862_v53  ;;  %v6833_v37 = vrot.slane %v6832_v38, %v2702_v34  ;;  %v6834_v22 = vrot.slane %v6832_v38, %v3239_v11  ;;  %v1831_v47 = vadd.f32 %v1829_v8, %v1826_v16 }
 0x377   :  { %v1832_v57 = vadd.f32 %v1830_v0, %v1827_v36  ;;  %v6835_v28 = vstv %s4794_s16  ;;  %v1486_v9 = vadd.f32 %v5441_v23, %v1446_v5  ;;  %v1902_v20 = vsel %vm1894_vm11, %v5247_v7, %v5396_v14  ;;  %v6842_v0 = vld [vmem:[#allocation101_spill] sm:$0xff] }
 0x378   :  { %v5666_v21 = vmul.f32 %v6833_v37, %v1791_v58  ;;  %v5671_v60 = vmul.f32 %v6834_v22, %v1792_v45  ;;  %v1866_v59 = vmul.f32 %v6835_v28, %v1855_v55  ;;  %v6836_v49 = vmov %v6835_v28  ;;  %v5709_v55 = vpop.permute.xlu1 %2050  ;;  %v6845_v36 = vld [vmem:[#allocation93_spill] sm:$0xff] }
 0x379   :  { %v1867_v18 = vmul.f32 %v6836_v49, %v1856_v41  ;;  %v1487_v58 = vadd.f32 %v5446_v15, %v1447_v63  ;;  %v1901_v45 = vsel %vm1894_vm11, %v5396_v14, %v5247_v7  ;;  %v1895_v23 = vsel %vm1894_vm11, %v6838_v54, %v6837_v61  ;;  %v6841_v14 = vld [vmem:[#allocation91_spill] sm:$0xff]  ;;  %v6847_v63 = vld [vmem:[#allocation97_spill] sm:$0xff] }
 0x37a   :  { %v1871_v53 = vadd.f32 %v1869_v35, %v1866_v59  ;;  %v1896_v15 = vsel %vm1894_vm11, %v6837_v61, %v6838_v54  ;;  %v1526_v8 = vadd.f32 %v6839_v13, %v1486_v9  ;;  %v1941_v30 = vsel %vm1934_vm15, %v6842_v0, %v6841_v14  ;;  %v2100_v54 = vpop.permute.xlu0 %2099 }
 0x37b   :  { %v1872_v56 = vadd.f32 %v1870_v4, %v1867_v18  ;;  %v1527_v7 = vadd.f32 %v6840_v40, %v1487_v58  ;;  %v1942_v26 = vsel %vm1934_vm15, %v6841_v14, %v6842_v0  ;;  %v6843_v41 = vstv %s4866_s28 }
 0x37c   :  { %v1909_v39 = vmul.f32 %v6843_v41, %v1901_v45  ;;  %v6844_v16 = vmov %v6843_v41  ;;  %v1935_v35 = vsel %vm1934_vm15, %v6846_v24, %v6845_v36  ;;  %v1936_v44 = vsel %vm1934_vm15, %v6845_v36, %v6846_v24 }
 0x37d   :  { %v1910_v25 = vmul.f32 %v6844_v16, %v1902_v20  ;;  %v1566_v4 = vadd.f32 %v5525_v51, %v1526_v8  ;;  %v1567_v5 = vadd.f32 %v5530_v42, %v1527_v7  ;;  %v1981_v38 = vsel %vm1974_vm6, %v5575_v27, %v6847_v63  ;;  %v6852_v20 = vld [vmem:[#allocation95_spill] sm:$0xff] }
 0x37e   :  { %v1982_v37 = vsel %vm1974_vm6, %v6847_v63, %v5575_v27  ;;  %v6848_v22 = vstv %s4855_s8  ;;  %v6850_v42 = vstv %s4954_s30  ;;  %vm2054_vm0 = vcmp.lt.s32.totalorder %v3254_v2, 80  ;;  %v6859_v63 = vld [vmem:[#allocation75_spill] sm:$0xff] }
 0x37f   :  { %v1906_v51 = vmul.f32 %v6848_v22, %v1895_v23  ;;  %v6849_v28 = vmov %v6848_v22  ;;  %v1949_v49 = vmul.f32 %v6850_v42, %v1941_v30  ;;  %v6851_v18 = vmov %v6850_v42  ;;  %v2058_v23 = vpop.permute.xlu1 %2057 }
 0x380   :  { %v1907_v59 = vmul.f32 %v6849_v28, %v1896_v15  ;;  %v1950_v9 = vmul.f32 %v6851_v18, %v1942_v26  ;;  %v1606_v58 = vadd.f32 %v5537_v32, %v1566_v4  ;;  %v1607_v45 = vadd.f32 %v5542_v33, %v1567_v5 }
 0x381   :  { %v1975_v27 = vsel %vm1974_vm6, %v5520_v17, %v6852_v20  ;;  %v1976_v61 = vsel %vm1974_vm6, %v6852_v20, %v5520_v17  ;;  %v6853_v15 = vstv %s4917_s26  ;;  %v6855_v40 = vstv %s5070_s20 }
 0x382   :  { %v1946_v13 = vmul.f32 %v6853_v15, %v1935_v35  ;;  %v6854_v8 = vmov %v6853_v15  ;;  %v1989_v7 = vmul.f32 %v6855_v40, %v1981_v38  ;;  %v6856_v33 = vmov %v6855_v40 }
 0x383   :  { %v1947_v32 = vmul.f32 %v6854_v8, %v1936_v44  ;;  %v1990_v14 = vmul.f32 %v6856_v33, %v1982_v37  ;;  %v1646_v0 = vadd.f32 %v5551_v48, %v1606_v58  ;;  %v1647_v30 = vadd.f32 %v5556_v31, %v1607_v45  ;;  %v6862_v37 = vld [vmem:[#allocation74_spill] sm:$0xff]  ;;  %v2133_v45 = vpop.permute.xlu0 %2132 }
 0x384   :  { %v1911_v26 = vadd.f32 %v1909_v39, %v1906_v51  ;;  %v1912_v41 = vadd.f32 %v1910_v25, %v1907_v59  ;;  %v1951_v16 = vadd.f32 %v1949_v49, %v1946_v13  ;;  %v6857_v24 = vstv %s5047_s4  ;;  %v2091_v25 = vpop.permute.xlu1 %2090 }
 0x385   :  { %v1952_v36 = vadd.f32 %v1950_v9, %v1947_v32  ;;  %v1986_v17 = vmul.f32 %v6857_v24, %v1975_v27  ;;  %v6858_v4 = vmov %v6857_v24  ;;  %vm2094_vm8 = vcmp.lt.s32.totalorder %v3254_v2, 79 }
 0x386   :  { %v1987_v5 = vmul.f32 %v6858_v4, %v1976_v61  ;;  %v1686_v35 = vadd.f32 %v5565_v52, %v1646_v0  ;;  %v1687_v44 = vadd.f32 %v5570_v1, %v1647_v30  ;;  %v6860_v38 = vrot.slane %v6859_v63, %v2702_v34 }
 0x387   :  { %v6861_v31 = vrot.slane %v6859_v63, %v3239_v11  ;;  %v6863_v22 = vrot.slane %v6862_v37, %v2702_v34  ;;  %v6864_v28 = vrot.slane %v6862_v37, %v3239_v11  ;;  %v1991_v52 = vadd.f32 %v1989_v7, %v1986_v17  ;;  %v6871_v7 = vld [vmem:[#allocation88_spill] sm:$0xff] }
 0x388   :  { %v1844_v48 = vmul.f32 %v6860_v38, %v1831_v47  ;;  %v1992_v42 = vadd.f32 %v1990_v14, %v1987_v5  ;;  %v1726_v1 = vadd.f32 %v5580_v12, %v1686_v35  ;;  %v1727_v49 = vadd.f32 %v5585_v6, %v1687_v44  ;;  %v6865_v47 = vld [vmem:[#allocation81_spill] sm:$0xff]  ;;  %v2098_v40 = vpop.permute.xlu1 %2097  ;;  %v6874_v14 = vld [vmem:[#allocation19_spill] sm:$0xff]  ;;  %v2140_v35 = vpop.permute.xlu0 %2139 }
 0x389   :  { %v1845_v39 = vmul.f32 %v6861_v31, %v1832_v57  ;;  %v1884_v51 = vmul.f32 %v6863_v22, %v1871_v53  ;;  %v1885_v59 = vmul.f32 %v6864_v28, %v1872_v56  ;;  %v6866_v18 = vrot.slane %v6865_v47, %v2702_v34  ;;  %v6868_v53 = vld [vmem:[#allocation77_spill] sm:$0xff] }
 0x38a   :  { %v6867_v57 = vrot.slane %v6865_v47, %v3239_v11  ;;  %v6869_v20 = vrot.slane %v6868_v53, %v2702_v34  ;;  %v6870_v56 = vrot.slane %v6868_v53, %v3239_v11  ;;  %v2021_v12 = vsel %vm2014_vm7, %v5673_v50, %v5503_v62 }
 0x38b   :  { %v1924_v9 = vmul.f32 %v6866_v18, %v1911_v26  ;;  %v2022_v6 = vsel %vm2014_vm7, %v5503_v62, %v5673_v50  ;;  %vm2134_vm12 = vcmp.lt.s32.totalorder %v3254_v2, 78  ;;  %v1766_v15 = vadd.f32 %v5630_v10, %v1726_v1 }
 0x38c   :  { %v1925_v58 = vmul.f32 %v6867_v57, %v1912_v41  ;;  %v1964_v27 = vmul.f32 %v6869_v20, %v1951_v16  ;;  %v1965_v61 = vmul.f32 %v6870_v56, %v1952_v36  ;;  %v1767_v13 = vadd.f32 %v5636_v43, %v1727_v49 }
 0x38d   :  { %v2061_v8 = vsel %vm2054_vm0, %v2058_v23, %v5622_v46  ;;  %v2062_v32 = vsel %vm2054_vm0, %v5622_v46, %v2058_v23  ;;  %v6872_v62 = vrot.slane %v6871_v7, %v2702_v34  ;;  %v6873_v33 = vrot.slane %v6871_v7, %v3239_v11 }
 0x38e   :  { %v2015_v43 = vsel %vm2014_vm7, %v5624_v29, %v6874_v14  ;;  %v2016_v0 = vsel %vm2014_vm7, %v6874_v14, %v5624_v29  ;;  %v1806_v46 = vadd.f32 %v5666_v21, %v1766_v15  ;;  %v1807_v23 = vadd.f32 %v5671_v60, %v1767_v13 }
 0x38f   :  { %v2004_v50 = vmul.f32 %v6872_v62, %v1991_v52  ;;  %v2005_v10 = vmul.f32 %v6873_v33, %v1992_v42  ;;  %v2055_v30 = vsel %vm2054_vm0, %v5709_v55, %v5546_v19  ;;  %v2056_v26 = vsel %vm2054_vm0, %v5546_v19, %v5709_v55  ;;  %v2131_v55 = vpop.permute.xlu1 %2130  ;;  %v6887_v33 = vld [vmem:[#allocation89_spill] sm:$0xff] }
 0x390   :  { %v6875_v41 = vstv %s5127_s9  ;;  %v6877_v21 = vstv %s5195_s0  ;;  %vm2174_vm10 = vcmp.lt.s32.totalorder %v3254_v2, 77  ;;  %v1846_v4 = vadd.f32 %v1844_v48, %v1806_v46 }
 0x391   :  { %v2029_v29 = vmul.f32 %v6875_v41, %v2021_v12  ;;  %v6876_v16 = vmov %v6875_v41  ;;  %v2069_v24 = vmul.f32 %v6877_v21, %v2061_v8  ;;  %v6878_v17 = vmov %v6877_v21  ;;  %v6892_v21 = vld [vmem:[#allocation87_spill] sm:$0xff] }
 0x392   :  { %v2030_v36 = vmul.f32 %v6876_v16, %v2022_v6  ;;  %v2070_v60 = vmul.f32 %v6878_v17, %v2062_v32  ;;  %v1847_v5 = vadd.f32 %v1845_v39, %v1807_v23  ;;  %v2101_v44 = vsel %vm2094_vm8, %v2098_v40, %v2100_v54 }
 0x393   :  { %v2102_v19 = vsel %vm2094_vm8, %v2100_v54, %v2098_v40  ;;  %v6879_v63 = vstv %s5086_s1  ;;  %v6881_v22 = vstv %s5149_s12  ;;  %v1886_v39 = vadd.f32 %v1884_v51, %v1846_v4  ;;  %v2138_v51 = vpop.permute.xlu1 %2137 }
 0x394   :  { %v2026_v38 = vmul.f32 %v6879_v63, %v2015_v43  ;;  %v6880_v31 = vmov %v6879_v63  ;;  %v2066_v28 = vmul.f32 %v6881_v22, %v2055_v30  ;;  %v6882_v52 = vmov %v6881_v22  ;;  %v6897_v63 = vld [vmem:[#allocation86_spill] sm:$0xff] }
 0x395   :  { %v2027_v37 = vmul.f32 %v6880_v31, %v2016_v0  ;;  %v2067_v48 = vmul.f32 %v6882_v52, %v2056_v26  ;;  %v1887_v42 = vadd.f32 %v1885_v59, %v1847_v5  ;;  %v2095_v1 = vsel %vm2094_vm8, %v2091_v25, %v5689_v3 }
 0x396   :  { %v2096_v54 = vsel %vm2094_vm8, %v5689_v3, %v2091_v25  ;;  %v2031_v49 = vadd.f32 %v2029_v29, %v2026_v38  ;;  %v6883_v18 = vstv %s5237_s10  ;;  %v1926_v56 = vadd.f32 %v1924_v9, %v1886_v39  ;;  %v2173_v9 = vpop.permute.xlu0 %2172 }
 0x397   :  { %v2032_v47 = vadd.f32 %v2030_v36, %v2027_v37  ;;  %v2109_v57 = vmul.f32 %v6883_v18, %v2101_v44  ;;  %v6884_v53 = vmov %v6883_v18  ;;  %v1927_v12 = vadd.f32 %v1925_v58, %v1887_v42  ;;  %v2171_v36 = vpop.permute.xlu1 %2170 }
 0x398   :  { %v2110_v20 = vmul.f32 %v6884_v53, %v2102_v19  ;;  %v2071_v6 = vadd.f32 %v2069_v24, %v2066_v28  ;;  %v2072_v15 = vadd.f32 %v2070_v60, %v2067_v48  ;;  %v6885_v59 = vstv %s5213_s23  ;;  %v6900_v28 = vld [vmem:[#allocation94_spill] sm:$0xff] }
 0x399   :  { %v2106_v13 = vmul.f32 %v6885_v59, %v2095_v1  ;;  %v6886_v8 = vmov %v6885_v59  ;;  %v2141_v3 = vsel %vm2134_vm12, %v2138_v51, %v2140_v35  ;;  %v2142_v25 = vsel %vm2134_vm12, %v2140_v35, %v2138_v51 }
 0x39a   :  { %v2107_v32 = vmul.f32 %v6886_v8, %v2096_v54  ;;  %v1966_v40 = vadd.f32 %v1964_v27, %v1926_v56  ;;  %v1967_v7 = vadd.f32 %v1965_v61, %v1927_v12  ;;  %v2135_v58 = vsel %vm2134_vm12, %v2131_v55, %v2133_v45  ;;  %v2180_v42 = vpop.permute.xlu0 %2179 }
 0x39b   :  { %v2136_v62 = vsel %vm2134_vm12, %v2133_v45, %v2131_v55  ;;  %v6888_v14 = vrot.slane %v6887_v33, %v2702_v34  ;;  %v6889_v0 = vrot.slane %v6887_v33, %v3239_v11  ;;  %v2111_v23 = vadd.f32 %v2109_v57, %v2106_v13 }
 0x39c   :  { %v2112_v27 = vadd.f32 %v2110_v20, %v2107_v32  ;;  %v2006_v30 = vadd.f32 %v2004_v50, %v1966_v40  ;;  %v2007_v61 = vadd.f32 %v2005_v10, %v1967_v7  ;;  %v6890_v26 = vstv %s5305_s11 }
 0x39d   :  { %v2044_v43 = vmul.f32 %v6888_v14, %v2031_v49  ;;  %v2045_v46 = vmul.f32 %v6889_v0, %v2032_v47  ;;  %v2149_v41 = vmul.f32 %v6890_v26, %v2141_v3  ;;  %v6891_v29 = vmov %v6890_v26  ;;  %v2178_v49 = vpop.permute.xlu1 %2177  ;;  %v6905_v3 = vld [vmem:[#allocation96_spill] sm:$0xff]  ;;  %v6909_v26 = vld [vmem:[#allocation15_spill] sm:$0xff] }
 0x39e   :  { %v2150_v16 = vmul.f32 %v6891_v29, %v2142_v25  ;;  %v6893_v45 = vrot.slane %v6892_v21, %v2702_v34  ;;  %v6894_v17 = vrot.slane %v6892_v21, %v3239_v11  ;;  %v6895_v4 = vstv %s5269_s21 }
 0x39f   :  { %v2146_v5 = vmul.f32 %v6895_v4, %v2135_v58  ;;  %v6896_v35 = vmov %v6895_v4  ;;  %v2046_v10 = vadd.f32 %v2044_v43, %v2006_v30  ;;  %v2047_v44 = vadd.f32 %v2045_v46, %v2007_v61 }
 0x3a0   :  { %v2084_v24 = vmul.f32 %v6893_v45, %v2071_v6  ;;  %v2085_v60 = vmul.f32 %v6894_v17, %v2072_v15  ;;  %v2147_v50 = vmul.f32 %v6896_v35, %v2136_v62  ;;  %v2175_v19 = vsel %vm2174_vm10, %v2171_v36, %v2173_v9 }
 0x3a1   :  { %v2176_v55 = vsel %vm2174_vm10, %v2173_v9, %v2171_v36  ;;  %v6898_v38 = vrot.slane %v6897_v63, %v2702_v34  ;;  %v6899_v37 = vrot.slane %v6897_v63, %v3239_v11  ;;  %v2201_v52 = vrot.slane %v6900_v28, %v3239_v11 }
 0x3a2   :  { %v2086_v48 = vadd.f32 %v2084_v24, %v2046_v10  ;;  %v2087_v39 = vadd.f32 %v2085_v60, %v2047_v44  ;;  %v2151_v1 = vadd.f32 %v2149_v41, %v2146_v5  ;;  %v2152_v54 = vadd.f32 %v2150_v16, %v2147_v50  ;;  %v6910_v44 = vld [vmem:[#allocation16_spill] sm:$0xff] }
 0x3a3   :  { %v2124_v31 = vmul.f32 %v6898_v38, %v2111_v23  ;;  %v2125_v22 = vmul.f32 %v6899_v37, %v2112_v27  ;;  %v6901_v47 = vstv %s5332_s19  ;;  %v2181_v20 = vsel %vm2174_vm10, %v2178_v49, %v2180_v42 }
 0x3a4   :  { %v2186_v18 = vmul.f32 %v6901_v47, %v2175_v19  ;;  %v6902_v57 = vmov %v6901_v47  ;;  %v2182_v56 = vsel %vm2174_vm10, %v2180_v42, %v2178_v49  ;;  %v6903_v15 = vstv %s5347_s17 }
 0x3a5   :  { %v2187_v53 = vmul.f32 %v6902_v57, %v2176_v55  ;;  %v2126_v12 = vadd.f32 %v2124_v31, %v2086_v48  ;;  %v2127_v6 = vadd.f32 %v2125_v22, %v2087_v39  ;;  %v2189_v51 = vmul.f32 %v6903_v15, %v2181_v20  ;;  %v6911_v55 = vld [vmem:[#allocation17_spill] sm:$0xff] }
 0x3a6   :  { %v6904_v59 = vmov %v6903_v15  ;;  %v2604_v8 = vmov 1966171168   ;;  %v6906_v25 = vrot.slane %v6905_v3, %v2702_v34  ;;  %v6907_v7 = vrot.slane %v6905_v3, %v3239_v11 }
 0x3a7   :  { %v2190_v13 = vmul.f32 %v6904_v59, %v2182_v56  ;;  %v2218_v32 = vunpack.c.l.s4 %v2604_v8  ;;  %v2191_v58 = vadd.f32 %v2189_v51, %v2186_v18  ;;  %v6908_v14 = vrot.slane %v6900_v28, %v2702_v34 }
 0x3a8   :  { %v2164_v40 = vmul.f32 %v6906_v25, %v2151_v1  ;;  %v2165_v9 = vmul.f32 %v6907_v7, %v2152_v54 }
 0x3a9   :  { %v2192_v62 = vadd.f32 %v2190_v13, %v2187_v53  ;;  %v2204_v43 = vmul.f32 %v6908_v14, %v2191_v58  ;;  %v2219_v46 = vunpack.c.0.s8 %v2218_v32 }
 0x3aa   :  { %v2166_v2 = vadd.f32 %v2164_v40, %v2126_v12  ;;  %v2167_v33 = vadd.f32 %v2165_v9, %v2127_v6 }
 0x3ab   :  { %v2205_v0 = vmul.f32 %v2201_v52, %v2192_v62  ;;  %v2222_v41 = vsub.s32 %v2219_v46, %v6909_v26 }
 0x3ac   :  { %v2206_v23 = vadd.f32 %v2204_v43, %v2166_v2 }
 0x3ad   :  { %v2207_v27 = vadd.f32 %v2205_v0, %v2167_v33 }
 0x3ae   :  { %vm2208_vm13 = vcmp.gt.f32.partialorder %v2206_v23, 0.0  ;;  %v2210_v30 = vmul.f32 0.1, %v2206_v23 }
 0x3af   :  { %vm2209_vm14 = vcmp.gt.f32.partialorder %v2207_v27, 0.0  ;;  %v2211_v61 = vmul.f32 0.1, %v2207_v27 }
 0x3b0   :  { %v2212_v29 = vsel %vm2208_vm13, %v2206_v23, %v2210_v30 }
 0x3b1   :  { %v2213_v16 = vsel %vm2209_vm14, %v2207_v27, %v2211_v61 }
 0x3b2   :  { %v2216_v36 = vcombine.low %v2212_v29, %v2213_v16 }
 0x3b4   :  { %v2223_v21 = vrot.slane %v2216_v36, %v2222_v41 }
 0x3b6   :  { %v2224_v45 = vcombine.high %v2223_v21, %v2223_v21  ;;  %v2231_v24 = vrot.slane %v2223_v21, %v2222_v41 }
 0x3b8   :  { %v2238_v17 = vrot.slane %v2224_v45, %v2222_v41  ;;  %v2242_v60 = vrot.slane %v2231_v24, %v2702_v34  ;;  %v2246_v4 = vrot.slane %v2231_v24, %v3239_v11 }
 0x3ba   :  { %v2250_v5 = vrot.slane %v2238_v17, %v2702_v34  ;;  %v2254_v35 = vrot.slane %v2238_v17, %v3239_v11  ;;  %v2255_v50 = vcombine.low %v2242_v60, %v2246_v4 }
 0x3bc   :  { %v2256_v10 = vcombine.low %v2250_v5, %v2254_v35  ;;  %v2259_v19 = vmul.f32 %v2255_v50, %v6910_v44 }
 0x3be   :  { %v2260_v63 = vmul.f32 %v2256_v10, %v6911_v55  ;;  %2261 = vst [vmem:[#allocation10] sm:$0xff] %v2259_v19 }
 0x3c0   :  { %2262 = vst [vmem:[#allocation10 + $0x8] sm:$0xff] %v2260_v63 }
 0x3c1   :  { %2529 = shalt.err (!%p2526_p5)
}
 0x3c2   :  { %s6912_s5 = sld [smem:[#allocation149_spill]] }
 0x3c8   :  { %s2530_s6 = scalar_lea.hbm %s6912_s5, 256 }
 0x3c9   :  { %p2531_p6 = scmp.ne.s32.totalorder %s6912_s5, %s2530_s6  ;;  %p2534_p7 = scmp.lt.u32.totalorder %s2530_s6, %s6912_s5 }
 0x3cb   :  { %p2536_p8 = pnand %p2534_p7, %p2531_p6 }
 0x3cd   :  { %2539 = shalt.err (!%p2536_p8)
}
 0x3ce   :  { %s6913_s16 = smov 8   ;;  %s6914_s24 = smov 128  }
 0x3cf   :  { %2274 = dma.vmem_to_hbm [thread:$0]  %s2269_s2, 256, %s6912_s5, [#allocation4], %s6914_s24, %s6914_s24, %s6913_s16  }
 0x3d0   :  { %2546 = dma.done.wait [#allocation4], 256  }
 0x3d1   :  { %2547 = vsyncadd [#allocation4], 4294967040 }
 0x3d2   :  { %2278 = vsyncpa [#allocation3], 1 }
 0x3d3   :  { %2279 = vsyncpa [#allocation7], 1 }
 0x3d4   :  { %2280 = vsyncpa [#allocation4], 1 }
 0x3d5   :  { %2281 = vsyncpa [#allocation5], 1 }

</bundles_post_ra>
